<compile_context>
chip_gen: v7x
topology: tpu7x:2x2x1
jax: 0.10.0
libtpu: 0.0.40
codegen_flags: <defaults>
</compile_context>

<pallas_src>
import functools

import jax
import jax.numpy as jnp
from jax.experimental import pallas as pl
from jax.experimental.pallas import tpu as pltpu


def _round_up(x, m):
    return (x + m - 1) // m * m


# -----------------------------------------------------------------------------
# Fused kernel: in-kernel im2col conv + SiLU + masked GAP + folded head/fc1
# -----------------------------------------------------------------------------
def _fused_cnn_kernel(x_ref, w_ref, c_ref, m_ref, bf_ref, o_ref, *, taps, lp):
    """Grid = (B,); one whole image per step.

    x_ref : (1, 4, R, 8)   bf16  parity-split, zero-padded image (cin 3->8)
    w_ref : (9, 8, Cp)     bf16  per-tap stem weights (cin 3->8, cout 48->Cp)
    c_ref : (2, Cp)        f32   row 0 = stem bias, row 1 = folded head∘fc1 wt
    m_ref : (lp, 1)        f32   GAP weights: 1/HW on valid rows, 0 elsewhere
    bf_ref: (1, 1)         f32   folded head∘fc1 bias (SMEM scalar)
    o_ref : (1, 1, 128)    f32   per-image output (lane-dense)
    """
    cp = w_ref.shape[-1]

    # stem conv: 9 taps, each a contiguous static slice of a parity plane,
    # accumulated as small bf16 MXU matmuls into an f32 slab.
    conv = jnp.zeros((lp, cp), jnp.float32)
    for t, (p, off) in enumerate(taps):
        tap = x_ref[0, p, off:off + lp, :]                     # [lp, 8] bf16
        conv = conv + jnp.dot(tap, w_ref[t],
                              preferred_element_type=jnp.float32)
    conv = conv + c_ref[0:1, :]                                # + stem bias

    # SiLU in f32 (keep f32 on v5e too — no bf16 VPU/EUP there).
    act = conv * jax.nn.sigmoid(conv)                          # [lp, Cp] f32

    # masked global average pool: mask + 1/HW scale are pre-folded into m_ref.
    feats = jnp.sum(act * m_ref[...], axis=0, keepdims=True)   # [1, Cp] f32

    # folded (classifier head ∘ fc1): one scalar per image.
    val = jnp.sum(feats * c_ref[1:2, :]) + bf_ref[0, 0]
    o_ref[...] = jnp.broadcast_to(val, o_ref.shape).astype(o_ref.dtype)


def fused_cnn(planes, w_taps, consts, gap_w, b_fold, *, taps, lp):
    """planes: [B, 4, R, 8] bf16 -> [B, 1] f32."""
    B, nparity, R, cinp = planes.shape
    cp = w_taps.shape[-1]
    out_lanes = 128
    vmem = pltpu.MemorySpace.VMEM

    kernel = functools.partial(_fused_cnn_kernel, taps=taps, lp=lp)
    out = pl.pallas_call(
        kernel,
        out_shape=jax.ShapeDtypeStruct((B, 1, out_lanes), jnp.float32),
        grid=(B,),
        in_specs=[
            pl.BlockSpec((1, nparity, R, cinp), lambda b: (b, 0, 0, 0),
                         memory_space=vmem),
            pl.BlockSpec((9, cinp, cp), lambda b: (0, 0, 0),
                         memory_space=vmem),
            pl.BlockSpec((2, cp), lambda b: (0, 0), memory_space=vmem),
            pl.BlockSpec((lp, 1), lambda b: (0, 0), memory_space=vmem),
            pl.BlockSpec(memory_space=pltpu.MemorySpace.SMEM),
        ],
        out_specs=pl.BlockSpec((1, 1, out_lanes), lambda b: (b, 0, 0),
                               memory_space=vmem),
        compiler_params=pltpu.CompilerParams(
            dimension_semantics=("parallel",),
            # actual footprint is ~1 MiB (planes 2x19KB, weights 18KB,
            # act slab 139KB, GAP vec 139KB) — keep the limit tight + headroom.
            vmem_limit_bytes=8 * 1024 * 1024),
    )(planes, w_taps, consts, gap_w, b_fold)
    return out[:, 0, :1]                                       # [B, 1]


# -----------------------------------------------------------------------------
# Wrapper: cheap 1x layout prep (pad, parity split, bf16 cast) + weight folding
# -----------------------------------------------------------------------------
def init_params(key):
    k = jax.random.split(key, 6)
    cin, cstem, kh, kw = 3, 48, 3, 3       # EfficientNet-B4 stem: 3->48, 3x3/s2
    nfeat, nclass = cstem, 1000            # classifier head -> 1000 logits
    return {
        # flatten order (kh, kw, cin) — a permute would be needed to load real
        # PyTorch [Cout, Cin, kh, kw] weights.
        "stem_w": jax.random.normal(k[0], (kh * kw * cin, cstem), jnp.float32) * 0.05,
        "stem_b": jax.random.normal(k[1], (cstem,), jnp.float32) * 0.01,
        "head_w": jax.random.normal(k[2], (nfeat, nclass), jnp.float32) * 0.05,
        "head_b": jax.random.normal(k[3], (nclass,), jnp.float32) * 0.01,
        "fc1_w": jax.random.normal(k[4], (1000, 1), jnp.float32) * 0.02,
        "fc1_b": jax.random.normal(k[5], (1,), jnp.float32) * 0.01,
    }


def cnn_forward(params, x_nchw):
    """Mirrors CNN.forward: x = backbone(img); x = fc1(x); returns [B, 1]."""
    B, C, H, W = x_nchw.shape
    assert C == 3 and H % 2 == 0 and W % 2 == 0
    oh, ow = H // 2, W // 2                       # stem output spatial dims
    hpp, wpp = (H + 2) // 2, (W + 2) // 2         # parity-plane dims (pad=1)
    lp = oh * wpp                                 # in-kernel conv-slab rows
    R = _round_up(hpp * wpp + 1, 8)               # plane rows (covers max slice)

    # NCHW -> NHWC, zero-pad spatially, space-to-depth parity split (1x data).
    x = jnp.transpose(x_nchw, (0, 2, 3, 1)).astype(jnp.float32)
    xp = jnp.pad(x, ((0, 0), (1, 1), (1, 1), (0, 0)))            # [B,H+2,W+2,3]
    planes = xp.reshape(B, hpp, 2, wpp, 2, C).transpose(0, 2, 4, 1, 3, 5)
    planes = planes.reshape(B, 4, hpp * wpp, C)                  # [B,4,HW',3]
    planes = jnp.pad(planes, ((0, 0), (0, 0), (0, R - hpp * wpp), (0, 8 - C)))
    planes = planes.astype(jnp.bfloat16)

    # per-tap stem weights [9, cin, cout] -> [9, 8, Cp] bf16
    cout = params["stem_w"].shape[1]
    cp = _round_up(cout, 128)
    w_taps = params["stem_w"].reshape(9, C, cout)
    w_taps = jnp.pad(w_taps, ((0, 0), (0, 8 - C), (0, cp - cout)))
    w_taps = w_taps.astype(jnp.bfloat16)

    # fold head (48->1000) and fc1 (1000->1): no nonlinearity between them.
    w_fold = params["head_w"] @ params["fc1_w"]                     # [48, 1]
    b_fold = params["head_b"] @ params["fc1_w"] + params["fc1_b"]   # [1]
    consts = jnp.stack([
        jnp.pad(params["stem_b"], (0, cp - cout)),
        jnp.pad(w_fold[:, 0], (0, cp - cout)),
    ]).astype(jnp.float32)                                          # [2, Cp]
    b_fold = b_fold.reshape(1, 1).astype(jnp.float32)

    # GAP weights: 1/HW on valid conv-slab rows, 0 on the wrap-around column.
    col = jnp.arange(lp, dtype=jnp.int32) % wpp
    gap_w = jnp.where(col < ow, 1.0 / (oh * ow), 0.0)
    gap_w = gap_w.reshape(lp, 1).astype(jnp.float32)

    # static (parity plane, row offset) per conv tap (i, j).
    taps = tuple(((i % 2) * 2 + (j % 2), (i // 2) * wpp + (j // 2))
                 for i in range(3) for j in range(3))

    return fused_cnn(planes, w_taps, consts, gap_w, b_fold, taps=taps, lp=lp)


def cnn_forward_ref(params, x_nchw):
    """Pure-JAX f32 reference (on bf16-quantized conv operands, like the kernel)."""
    x = jnp.transpose(x_nchw, (0, 2, 3, 1)).astype(jnp.float32)
    xq = x.astype(jnp.bfloat16).astype(jnp.float32)
    xp = jnp.pad(xq, ((0, 0), (1, 1), (1, 1), (0, 0)))
    B, Hp, Wp, C = xp.shape
    oh, ow = (Hp - 3) // 2 + 1, (Wp - 3) // 2 + 1
    w3 = params["stem_w"].astype(jnp.bfloat16).astype(jnp.float32)
    w3 = w3.reshape(3, 3, C, -1)
    conv = None
    for i in range(3):
        for j in range(3):
            tap = xp[:, i:i + 2 * oh:2, j:j + 2 * ow:2, :]
            term = jnp.einsum("bhwc,cd->bhwd", tap, w3[i, j])
            conv = term if conv is None else conv + term
    conv = conv + params["stem_b"]
    act = conv * jax.nn.sigmoid(conv)
    feats = act.mean(axis=(1, 2))                                  # GAP
    logits = feats @ params["head_w"] + params["head_b"]
    return logits @ params["fc1_w"] + params["fc1_b"]


if __name__ == "__main__":
    key = jax.random.PRNGKey(0)
    pkey, xkey = jax.random.split(key)
    params = init_params(pkey)

    # small, forward-consistent input: batch=2, 3 channels, 32x32 image
    img = jax.random.normal(xkey, (2, 3, 32, 32), jnp.float32)
    batch = {"img": img}

    fwd = jax.jit(cnn_forward)
    out = jax.block_until_ready(fwd(params, batch["img"]))
    assert out.shape == (2, 1), out.shape
    assert out.dtype == jnp.float32

    ref = cnn_forward_ref(params, batch["img"])
    err = float(jnp.max(jnp.abs(out - ref)))
    assert jnp.allclose(out, ref, atol=5e-4, rtol=1e-3), (out, ref, err)
    print("KERNEL_OK")
</pallas_src>

<mosaic_0001>
module attributes {stable_mosaic.version = 11 : i64} {
  func.func @_fused_cnn_kernel(%arg0: i32, %arg1: memref<1x4x296x8xbf16, #tpu.memory_space<vmem>>, %arg2: memref<9x8x128xbf16, #tpu.memory_space<vmem>>, %arg3: memref<2x128xf32, #tpu.memory_space<vmem>>, %arg4: memref<272x1xf32, #tpu.memory_space<vmem>>, %arg5: memref<1x1xf32, #tpu.memory_space<smem>>, %arg6: memref<1x1x128xf32, #tpu.memory_space<vmem>>) attributes {dimension_semantics = [#tpu.dimension_semantics<parallel>], iteration_bounds = array<i64: 2>, scalar_prefetch = 0 : i64, scratch_operands = 0 : i64, tpu.core_type = #tpu.core_type<tc>, window_params = [{transform_indices = @transform_0, window_bounds = array<i64: 1, 4, 296, 8>}, {pipeline_mode = #tpu.pipeline_mode<synchronous>, transform_indices = @transform_1, window_bounds = array<i64: 9, 8, 128>}, {pipeline_mode = #tpu.pipeline_mode<synchronous>, transform_indices = @transform_2, window_bounds = array<i64: 2, 128>}, {pipeline_mode = #tpu.pipeline_mode<synchronous>, transform_indices = @transform_3, window_bounds = array<i64: 272, 1>}, {transform_indices = @transform_4, window_bounds = array<i64: 1, 1>}, {transform_indices = @transform_5, window_bounds = array<i64: 1, 1, 128>}]} {
    %cst = arith.constant 0.000000e+00 : f32
    %0 = vector.broadcast %cst : f32 to vector<272x128xf32>
    %c0 = arith.constant 0 : index
    %c0_0 = arith.constant 0 : index
    %c0_1 = arith.constant 0 : index
    %c0_2 = arith.constant 0 : index
    %1 = vector.load %arg1[%c0, %c0_0, %c0_1, %c0_2] : memref<1x4x296x8xbf16, #tpu.memory_space<vmem>>, vector<1x1x272x8xbf16>
    %2 = vector.shape_cast %1 : vector<1x1x272x8xbf16> to vector<272x8xbf16>
    %c0_3 = arith.constant 0 : index
    %c0_4 = arith.constant 0 : index
    %c0_5 = arith.constant 0 : index
    %3 = vector.load %arg2[%c0_3, %c0_4, %c0_5] : memref<9x8x128xbf16, #tpu.memory_space<vmem>>, vector<1x8x128xbf16>
    %4 = vector.shape_cast %3 : vector<1x8x128xbf16> to vector<8x128xbf16>
    %cst_6 = arith.constant dense<0.000000e+00> : vector<272x128xf32>
    %5 = tpu.matmul %2, %4, %cst_6 {dimension_numbers = #tpu.dot_dimension_numbers<[1], [0], [0], [1], [0, 0, 1, 1], [], []>} : vector<272x8xbf16>, vector<8x128xbf16>, vector<272x128xf32> -> vector<272x128xf32>
    %6 = arith.addf %0, %5 : vector<272x128xf32>
    %c0_7 = arith.constant 0 : index
    %c1 = arith.constant 1 : index
    %c0_8 = arith.constant 0 : index
    %c0_9 = arith.constant 0 : index
    %7 = vector.load %arg1[%c0_7, %c1, %c0_8, %c0_9] : memref<1x4x296x8xbf16, #tpu.memory_space<vmem>>, vector<1x1x272x8xbf16>
    %8 = vector.shape_cast %7 : vector<1x1x272x8xbf16> to vector<272x8xbf16>
    %c1_10 = arith.constant 1 : index
    %c0_11 = arith.constant 0 : index
    %c0_12 = arith.constant 0 : index
    %9 = vector.load %arg2[%c1_10, %c0_11, %c0_12] : memref<9x8x128xbf16, #tpu.memory_space<vmem>>, vector<1x8x128xbf16>
    %10 = vector.shape_cast %9 : vector<1x8x128xbf16> to vector<8x128xbf16>
    %cst_13 = arith.constant dense<0.000000e+00> : vector<272x128xf32>
    %11 = tpu.matmul %8, %10, %cst_13 {dimension_numbers = #tpu.dot_dimension_numbers<[1], [0], [0], [1], [0, 0, 1, 1], [], []>} : vector<272x8xbf16>, vector<8x128xbf16>, vector<272x128xf32> -> vector<272x128xf32>
    %12 = arith.addf %6, %11 : vector<272x128xf32>
    %c0_14 = arith.constant 0 : index
    %c0_15 = arith.constant 0 : index
    %c1_16 = arith.constant 1 : index
    %c0_17 = arith.constant 0 : index
    %13 = vector.load %arg1[%c0_14, %c0_15, %c1_16, %c0_17] : memref<1x4x296x8xbf16, #tpu.memory_space<vmem>>, vector<1x1x272x8xbf16>
    %14 = vector.shape_cast %13 : vector<1x1x272x8xbf16> to vector<272x8xbf16>
    %c2 = arith.constant 2 : index
    %c0_18 = arith.constant 0 : index
    %c0_19 = arith.constant 0 : index
    %15 = vector.load %arg2[%c2, %c0_18, %c0_19] : memref<9x8x128xbf16, #tpu.memory_space<vmem>>, vector<1x8x128xbf16>
    %16 = vector.shape_cast %15 : vector<1x8x128xbf16> to vector<8x128xbf16>
    %cst_20 = arith.constant dense<0.000000e+00> : vector<272x128xf32>
    %17 = tpu.matmul %14, %16, %cst_20 {dimension_numbers = #tpu.dot_dimension_numbers<[1], [0], [0], [1], [0, 0, 1, 1], [], []>} : vector<272x8xbf16>, vector<8x128xbf16>, vector<272x128xf32> -> vector<272x128xf32>
    %18 = arith.addf %12, %17 : vector<272x128xf32>
    %c0_21 = arith.constant 0 : index
    %c2_22 = arith.constant 2 : index
    %c0_23 = arith.constant 0 : index
    %c0_24 = arith.constant 0 : index
    %19 = vector.load %arg1[%c0_21, %c2_22, %c0_23, %c0_24] : memref<1x4x296x8xbf16, #tpu.memory_space<vmem>>, vector<1x1x272x8xbf16>
    %20 = vector.shape_cast %19 : vector<1x1x272x8xbf16> to vector<272x8xbf16>
    %c3 = arith.constant 3 : index
    %c0_25 = arith.constant 0 : index
    %c0_26 = arith.constant 0 : index
    %21 = vector.load %arg2[%c3, %c0_25, %c0_26] : memref<9x8x128xbf16, #tpu.memory_space<vmem>>, vector<1x8x128xbf16>
    %22 = vector.shape_cast %21 : vector<1x8x128xbf16> to vector<8x128xbf16>
    %cst_27 = arith.constant dense<0.000000e+00> : vector<272x128xf32>
    %23 = tpu.matmul %20, %22, %cst_27 {dimension_numbers = #tpu.dot_dimension_numbers<[1], [0], [0], [1], [0, 0, 1, 1], [], []>} : vector<272x8xbf16>, vector<8x128xbf16>, vector<272x128xf32> -> vector<272x128xf32>
    %24 = arith.addf %18, %23 : vector<272x128xf32>
    %c0_28 = arith.constant 0 : index
    %c3_29 = arith.constant 3 : index
    %c0_30 = arith.constant 0 : index
    %c0_31 = arith.constant 0 : index
    %25 = vector.load %arg1[%c0_28, %c3_29, %c0_30, %c0_31] : memref<1x4x296x8xbf16, #tpu.memory_space<vmem>>, vector<1x1x272x8xbf16>
    %26 = vector.shape_cast %25 : vector<1x1x272x8xbf16> to vector<272x8xbf16>
    %c4 = arith.constant 4 : index
    %c0_32 = arith.constant 0 : index
    %c0_33 = arith.constant 0 : index
    %27 = vector.load %arg2[%c4, %c0_32, %c0_33] : memref<9x8x128xbf16, #tpu.memory_space<vmem>>, vector<1x8x128xbf16>
    %28 = vector.shape_cast %27 : vector<1x8x128xbf16> to vector<8x128xbf16>
    %cst_34 = arith.constant dense<0.000000e+00> : vector<272x128xf32>
    %29 = tpu.matmul %26, %28, %cst_34 {dimension_numbers = #tpu.dot_dimension_numbers<[1], [0], [0], [1], [0, 0, 1, 1], [], []>} : vector<272x8xbf16>, vector<8x128xbf16>, vector<272x128xf32> -> vector<272x128xf32>
    %30 = arith.addf %24, %29 : vector<272x128xf32>
    %c0_35 = arith.constant 0 : index
    %c2_36 = arith.constant 2 : index
    %c1_37 = arith.constant 1 : index
    %c0_38 = arith.constant 0 : index
    %31 = vector.load %arg1[%c0_35, %c2_36, %c1_37, %c0_38] : memref<1x4x296x8xbf16, #tpu.memory_space<vmem>>, vector<1x1x272x8xbf16>
    %32 = vector.shape_cast %31 : vector<1x1x272x8xbf16> to vector<272x8xbf16>
    %c5 = arith.constant 5 : index
    %c0_39 = arith.constant 0 : index
    %c0_40 = arith.constant 0 : index
    %33 = vector.load %arg2[%c5, %c0_39, %c0_40] : memref<9x8x128xbf16, #tpu.memory_space<vmem>>, vector<1x8x128xbf16>
    %34 = vector.shape_cast %33 : vector<1x8x128xbf16> to vector<8x128xbf16>
    %cst_41 = arith.constant dense<0.000000e+00> : vector<272x128xf32>
    %35 = tpu.matmul %32, %34, %cst_41 {dimension_numbers = #tpu.dot_dimension_numbers<[1], [0], [0], [1], [0, 0, 1, 1], [], []>} : vector<272x8xbf16>, vector<8x128xbf16>, vector<272x128xf32> -> vector<272x128xf32>
    %36 = arith.addf %30, %35 : vector<272x128xf32>
    %c0_42 = arith.constant 0 : index
    %c0_43 = arith.constant 0 : index
    %c17 = arith.constant 17 : index
    %c0_44 = arith.constant 0 : index
    %37 = vector.load %arg1[%c0_42, %c0_43, %c17, %c0_44] : memref<1x4x296x8xbf16, #tpu.memory_space<vmem>>, vector<1x1x272x8xbf16>
    %38 = vector.shape_cast %37 : vector<1x1x272x8xbf16> to vector<272x8xbf16>
    %c6 = arith.constant 6 : index
    %c0_45 = arith.constant 0 : index
    %c0_46 = arith.constant 0 : index
    %39 = vector.load %arg2[%c6, %c0_45, %c0_46] : memref<9x8x128xbf16, #tpu.memory_space<vmem>>, vector<1x8x128xbf16>
    %40 = vector.shape_cast %39 : vector<1x8x128xbf16> to vector<8x128xbf16>
    %cst_47 = arith.constant dense<0.000000e+00> : vector<272x128xf32>
    %41 = tpu.matmul %38, %40, %cst_47 {dimension_numbers = #tpu.dot_dimension_numbers<[1], [0], [0], [1], [0, 0, 1, 1], [], []>} : vector<272x8xbf16>, vector<8x128xbf16>, vector<272x128xf32> -> vector<272x128xf32>
    %42 = arith.addf %36, %41 : vector<272x128xf32>
    %c0_48 = arith.constant 0 : index
    %c1_49 = arith.constant 1 : index
    %c17_50 = arith.constant 17 : index
    %c0_51 = arith.constant 0 : index
    %43 = vector.load %arg1[%c0_48, %c1_49, %c17_50, %c0_51] : memref<1x4x296x8xbf16, #tpu.memory_space<vmem>>, vector<1x1x272x8xbf16>
    %44 = vector.shape_cast %43 : vector<1x1x272x8xbf16> to vector<272x8xbf16>
    %c7 = arith.constant 7 : index
    %c0_52 = arith.constant 0 : index
    %c0_53 = arith.constant 0 : index
    %45 = vector.load %arg2[%c7, %c0_52, %c0_53] : memref<9x8x128xbf16, #tpu.memory_space<vmem>>, vector<1x8x128xbf16>
    %46 = vector.shape_cast %45 : vector<1x8x128xbf16> to vector<8x128xbf16>
    %cst_54 = arith.constant dense<0.000000e+00> : vector<272x128xf32>
    %47 = tpu.matmul %44, %46, %cst_54 {dimension_numbers = #tpu.dot_dimension_numbers<[1], [0], [0], [1], [0, 0, 1, 1], [], []>} : vector<272x8xbf16>, vector<8x128xbf16>, vector<272x128xf32> -> vector<272x128xf32>
    %48 = arith.addf %42, %47 : vector<272x128xf32>
    %c0_55 = arith.constant 0 : index
    %c0_56 = arith.constant 0 : index
    %c18 = arith.constant 18 : index
    %c0_57 = arith.constant 0 : index
    %49 = vector.load %arg1[%c0_55, %c0_56, %c18, %c0_57] : memref<1x4x296x8xbf16, #tpu.memory_space<vmem>>, vector<1x1x272x8xbf16>
    %50 = vector.shape_cast %49 : vector<1x1x272x8xbf16> to vector<272x8xbf16>
    %c8 = arith.constant 8 : index
    %c0_58 = arith.constant 0 : index
    %c0_59 = arith.constant 0 : index
    %51 = vector.load %arg2[%c8, %c0_58, %c0_59] : memref<9x8x128xbf16, #tpu.memory_space<vmem>>, vector<1x8x128xbf16>
    %52 = vector.shape_cast %51 : vector<1x8x128xbf16> to vector<8x128xbf16>
    %cst_60 = arith.constant dense<0.000000e+00> : vector<272x128xf32>
    %53 = tpu.matmul %50, %52, %cst_60 {dimension_numbers = #tpu.dot_dimension_numbers<[1], [0], [0], [1], [0, 0, 1, 1], [], []>} : vector<272x8xbf16>, vector<8x128xbf16>, vector<272x128xf32> -> vector<272x128xf32>
    %54 = arith.addf %48, %53 : vector<272x128xf32>
    %c0_61 = arith.constant 0 : index
    %c0_62 = arith.constant 0 : index
    %55 = vector.load %arg3[%c0_61, %c0_62] : memref<2x128xf32, #tpu.memory_space<vmem>>, vector<1x128xf32>
    %56 = vector.broadcast %55 : vector<1x128xf32> to vector<272x128xf32>
    %57 = arith.addf %54, %56 : vector<272x128xf32>
    %58 = arith.negf %57 : vector<272x128xf32>
    %59 = math.exp %58 : vector<272x128xf32>
    %cst_63 = arith.constant 1.000000e+00 : f32
    %60 = vector.broadcast %cst_63 : f32 to vector<272x128xf32>
    %61 = arith.addf %60, %59 : vector<272x128xf32>
    %62 = arith.divf %60, %61 : vector<272x128xf32>
    %63 = arith.mulf %57, %62 : vector<272x128xf32>
    %c0_64 = arith.constant 0 : index
    %c0_65 = arith.constant 0 : index
    %64 = vector.load %arg4[%c0_64, %c0_65] : memref<272x1xf32, #tpu.memory_space<vmem>>, vector<272x1xf32>
    %65 = vector.broadcast %64 : vector<272x1xf32> to vector<272x128xf32>
    %66 = arith.mulf %63, %65 : vector<272x128xf32>
    %cst_66 = arith.constant dense<0.000000e+00> : vector<128xf32>
    %67 = vector.multi_reduction <add>, %66, %cst_66 [0] : vector<272x128xf32> to vector<128xf32>
    %68 = vector.shape_cast %67 : vector<128xf32> to vector<1x128xf32>
    %c1_67 = arith.constant 1 : index
    %c0_68 = arith.constant 0 : index
    %69 = vector.load %arg3[%c1_67, %c0_68] : memref<2x128xf32, #tpu.memory_space<vmem>>, vector<1x128xf32>
    %70 = arith.mulf %68, %69 : vector<1x128xf32>
    %71 = vector.shape_cast %70 : vector<1x128xf32> to vector<1x1x128xf32>
    %cst_69 = arith.constant dense<0.000000e+00> : vector<1xf32>
    %72 = vector.multi_reduction <add>, %71, %cst_69 [1, 2] : vector<1x1x128xf32> to vector<1xf32>
    %73 = vector.shape_cast %72 : vector<1xf32> to vector<1x1x1xf32>
    %74 = vector.extract %73[0, 0, 0] : f32 from vector<1x1x1xf32>
    %c0_70 = arith.constant 0 : index
    %c0_71 = arith.constant 0 : index
    %75 = memref.load %arg5[%c0_70, %c0_71] : memref<1x1xf32, #tpu.memory_space<smem>>
    %76 = arith.addf %74, %75 : f32
    %77 = vector.broadcast %76 : f32 to vector<1x1x128xf32>
    %c0_72 = arith.constant 0 : index
    %c0_73 = arith.constant 0 : index
    %c0_74 = arith.constant 0 : index
    %78 = vector.load %arg6[%c0_72, %c0_73, %c0_74] : memref<1x1x128xf32, #tpu.memory_space<vmem>>, vector<1x1x128xf32>
    tpu.vector_store %arg6[%c0_72, %c0_73, %c0_74], %77 {strides = array<i32>} : memref<1x1x128xf32, #tpu.memory_space<vmem>>, vector<1x1x128xf32>,
    return
  }
  func.func @transform_0(%arg0: i32) -> (i32, i32, i32, i32) {
    %c0_i32 = arith.constant 0 : i32
    %c0_i32_0 = arith.constant 0 : i32
    %c0_i32_1 = arith.constant 0 : i32
    %c0_i32_2 = arith.constant 0 : i32
    return %arg0, %c0_i32, %c0_i32_0, %c0_i32_1 : i32, i32, i32, i32
  }
  func.func @transform_1(%arg0: i32) -> (i32, i32, i32) {
    %c0_i32 = arith.constant 0 : i32
    %c0_i32_0 = arith.constant 0 : i32
    %c0_i32_1 = arith.constant 0 : i32
    %c0_i32_2 = arith.constant 0 : i32
    return %c0_i32, %c0_i32_0, %c0_i32_1 : i32, i32, i32
  }
  func.func @transform_2(%arg0: i32) -> (i32, i32) {
    %c0_i32 = arith.constant 0 : i32
    %c0_i32_0 = arith.constant 0 : i32
    %c0_i32_1 = arith.constant 0 : i32
    return %c0_i32, %c0_i32_0 : i32, i32
  }
  func.func @transform_3(%arg0: i32) -> (i32, i32) {
    %c0_i32 = arith.constant 0 : i32
    %c0_i32_0 = arith.constant 0 : i32
    %c0_i32_1 = arith.constant 0 : i32
    return %c0_i32, %c0_i32_0 : i32, i32
  }
  func.func @transform_4(%arg0: i32) -> (i32, i32) {
    %c0_i32 = arith.constant 0 : i32
    %c0_i32_0 = arith.constant 0 : i32
    %c0_i32_1 = arith.constant 0 : i32
    return %c0_i32, %c0_i32_0 : i32, i32
  }
  func.func @transform_5(%arg0: i32) -> (i32, i32, i32) {
    %c0_i32 = arith.constant 0 : i32
    %c0_i32_0 = arith.constant 0 : i32
    %c0_i32_1 = arith.constant 0 : i32
    return %arg0, %c0_i32, %c0_i32_0 : i32, i32, i32
  }
}

</mosaic_0001>

<bundles_post_ra>
// kernel: cnn_forward.1
= control target key start
LH: loop header
LB: loop body
LE: loop exit
PB: predicated region body
PF: predicated region fallthrough
CT: control target
= control target key end

     0   :  { %s6332_s20 = smov 0   ;;  %s7899_s0 = inlined_call_operand.vmem [shape: bf16[2,4,296,8], index: 0, kind: input, shape index: {}]   ;;  %s7900_s1 = inlined_call_operand.vmem [shape: bf16[9,8,128], index: 1, kind: input, shape index: {}]   ;;  %s7901_s2 = inlined_call_operand.vmem [shape: f32[2,128], index: 2, kind: input, shape index: {}]   ;;  %s7902_s3 = inlined_call_operand.vmem [shape: f32[272,1], index: 3, kind: input, shape index: {}]   ;;  %s7903_s4 = inlined_call_operand.<no memory space> [shape: f32[1,1], index: 4, kind: input, shape index: {}]   ;;  %s7904_s5 = inlined_call_operand.vmem [shape: f32[2,1,128], index: 5, kind: output, shape index: {}]  }
   0x1   :  { %10 = sst [smem:[#allocation2]] %s7903_s4 }
   0x2 LB: > { %s4677_s21 = sadd.s32 4294967295, %s6294_s20   ;;  %p4681_p0 = scmp.ge.s32.totalorder %s6294_s20, 1  ;;  %s6294_s20 = sphi %s6332_s20, %s16_s20  }
   0x3   : > { %p188_p1 = scmp.lt.s32.totalorder %s6294_s20, 3 }
   0x5   : > { %p189_p2 = pnand %p4681_p0, %p188_p1 }
   0x7   : > { %192 = sbr.rel (%p189_p2) target bundleno = 1103 (0x44f), region = 40 }
   0xe   : > { %v4717_v0 = vld [vmem:[%s7900_s1 + $0x4] sm:$0xf]  ;;  %vm432_vm0 = vcmask 1043456   ;;  %p214_p3 = scmp.lt.s32.totalorder %s4677_s21, 1  ;;  %v7906_v1 = vmov 0.0   ;;  %vm6297_vm1 = vmmov 0  }
   0xf   : > { %5356 = vmatprep.subr.bf16.mxu0 %v7906_v1  ;;  %5986 = vmatprep.subr.bf16.mxu1 %v7906_v1  ;;  %v434_v2 = vsel %vm432_vm0, %v4717_v0, 0  ;;  %v4786_v3 = vld [vmem:[%s7900_s1 + $0x8] sm:$0xf]  ;;  %v257_v4 = vld [vmem:[%s7900_s1] sm:$0xf]  ;;  %vm380_vm2 = vcmask 64512  }
  0x10   : > { %5357 = vmatpush3.bf16.msra.mxu0 %v434_v2  ;;  %5987 = vmatpush3.bf16.msra.mxu1 %v434_v2  ;;  %s7923_s21 = smov (!%p214_p3, %s4677_s21), 1  ;;  %v1231_v6 = vsel %vm432_vm0, %v4786_v3, 0  ;;  %v742_v8 = vsel %vm432_vm0, %v257_v4, 0  ;;  %v4856_v24 = vld [vmem:[%s7900_s1 + $0xc] sm:$0xf]  ;;  %vm3766_vm4 = vcmask 1046528  }
  0x11   : > { %5358 = vmatprep.mubr.msk.bf16.mxu0 %vm6297_vm1, %v7906_v1  ;;  %5394 = vmatprep.mubr.msk.bf16.mxu1 %vm6297_vm1, %v7906_v1  ;;  %s5988_s4 = smul.u32 592, %s7923_s21  ;;  %v1610_v28 = vsel %vm432_vm0, %v4856_v24, 0  ;;  %vm1038_vm3 = vsmask.f32 7424  ;;  %v4925_v36 = vld [vmem:[%s7900_s1 + $0x10] sm:$0xf]  ;;  %s221_s27 = scalar_lea.vmem %s7904_s5, %s7923_s21 }
  0x12   : > { %5496 = vmatprep.subr.bf16.mxu0 %v7906_v1  ;;  %5426 = vmatprep.subr.bf16.mxu1 %v7906_v1  ;;  %v1989_v41 = vsel %vm432_vm0, %v4925_v36, 0  ;;  %vm4615_vm5 = vcmask 1040384  }
  0x13   : > { %s6364_s30 = scalar_lea.vmem %s7899_s0, %s5988_s4  ;;  %s4626_s4 = sld [smem:[#allocation2]] }
  0x14   : > { %v6004_v5 = vld [vmem:[%s6364_s30 + $0x94] sm:$0xff]   ;;  %v6005_v7 = vld [vmem:[%s6364_s30 + $0xdc] sm:$0xff]   ;;  %v6007_v10 = vld [vmem:[%s6364_s30 + $0xe4] sm:$0xff]  }
  0x15   : > { %5359 = vmatmul.mubr.msk.bf16.vlgmr.msra.gmra.mrb[0].mxu0 %vm380_vm2, %v6004_v5  ;;  %5395 = vmatmul.mubr.msk.bf16.vlgmr.msra.gmra.mrb[0].mxu1 %vm380_vm2, %v6005_v7  ;;  %v6006_v9 = vld [vmem:[%s6364_s30 + $0x9c] sm:$0xff]   ;;  %v6008_v11 = vld [vmem:[%s6364_s30 + $0xa4] sm:$0xff]   ;;  %v6009_v12 = vld [vmem:[%s6364_s30 + $0xec] sm:$0xff]  }
  0x16   : > { %5497 = vmatpush3.bf16.msra.mxu0 %v1231_v6  ;;  %5427 = vmatpush3.bf16.msra.mxu1 %v742_v8  ;;  %v6010_v13 = vld [vmem:[%s6364_s30 + $0xac] sm:$0xff]   ;;  %v6011_v14 = vld [vmem:[%s6364_s30 + $0xf4] sm:$0xff]   ;;  %v6013_v16 = vld [vmem:[%s6364_s30 + $0xfc] sm:$0xff]  }
  0x17   : > { %5362 = vmatprep.mubr.msk.bf16.mxu0 %vm6297_vm1, %v7906_v1  ;;  %5398 = vmatprep.mubr.msk.bf16.mxu1 %vm6297_vm1, %v7906_v1  ;;  %v6012_v15 = vld [vmem:[%s6364_s30 + $0xb4] sm:$0xff]   ;;  %v6014_v17 = vld [vmem:[%s6364_s30 + $0xbc] sm:$0xff]   ;;  %v6015_v18 = vld [vmem:[%s6364_s30 + $0x104] sm:$0xff]  }
  0x18   : > { %5566 = vmatprep.subr.bf16.mxu1 %v7906_v1  ;;  %5636 = vmatprep.subr.bf16.mxu0 %v7906_v1  ;;  %v6016_v19 = vld [vmem:[%s6364_s30 + $0xc4] sm:$0xff]   ;;  %v6017_v20 = vld [vmem:[%s6364_s30 + $0x10c] sm:$0xff]   ;;  %v6019_v23 = vld [vmem:[%s6364_s30 + $0x114] sm:$0xff]  }
  0x19   : > { %v6023_v21 = vld [vmem:[%s6364_s30] sm:$0xff]   ;;  %v6018_v22 = vld [vmem:[%s6364_s30 + $0xcc] sm:$0xff]   ;;  %v6020_v27 = vld [vmem:[%s6364_s30 + $0xd4] sm:$0xff]  }
  0x1a   : > { %v6024_v25 = vld [vmem:[%s6364_s30 + $0x8] sm:$0xff]   ;;  %v1042_v26 = vshll.u32 %v6023_v21, 16  ;;  %v6021_v30 = vld [vmem:[%s6364_s30] sm:$0xff]   ;;  %v1040_v31 = vshrl.u32 %v6023_v21, 16  ;;  %v6026_v34 = vld [vmem:[%s6364_s30 + $0x10] sm:$0xff]  }
  0x1b   : > { %v1047_v29 = vshll.u32 %v6024_v25, 16  ;;  %v6022_v37 = vld [vmem:[%s6364_s30 + $0x8] sm:$0xff]   ;;  %v1051_v38 = vshrl.u32 %v6024_v25, 16  ;;  %v1055_v39 = vshll.u32 %v6026_v34, 16  ;;  %v6028_v42 = vld [vmem:[%s6364_s30 + $0x18] sm:$0xff]   ;;  %v1059_v45 = vshrl.u32 %v6026_v34, 16 }
  0x1c   : > { %v1044_v32 = vrot.slane %v1042_v26, 1  ;;  %v1063_v46 = vshll.u32 %v6028_v42, 16  ;;  %v6025_v47 = vld [vmem:[%s6364_s30 + $0x10] sm:$0xff]   ;;  %v6030_v48 = vld [vmem:[%s6364_s30 + $0x20] sm:$0xff]   ;;  %v1067_v52 = vshrl.u32 %v6028_v42, 16  ;;  %v6032_v54 = vld [vmem:[%s6364_s30 + $0x28] sm:$0xff]  }
  0x1d   : > { %5363 = vmatmul.mubr.msk.bf16.gmra.mrb[4].mxu0 %vm380_vm2, %v6006_v9  ;;  %5399 = vmatmul.mubr.msk.bf16.gmra.mrb[4].mxu1 %vm380_vm2, %v6007_v10  ;;  %v1049_v33 = vrot.slane %v1047_v29, 1  ;;  %v1057_v44 = vrot.slane %v1055_v39, 1  ;;  %v1071_v53 = vshll.u32 %v6030_v48, 16  ;;  %v6027_v55 = vld [vmem:[%s6364_s30 + $0x18] sm:$0xff]   ;;  %v1075_v57 = vshrl.u32 %v6030_v48, 16  ;;  %v6034_v61 = vld [vmem:[%s6364_s30 + $0x30] sm:$0xff]  }
  0x1e   : > { %5366 = vmatprep.mubr.msk.bf16.mxu0 %vm6297_vm1, %v7906_v1  ;;  %5402 = vmatprep.mubr.msk.bf16.mxu1 %vm6297_vm1, %v7906_v1  ;;  %v1045_v35 = vor.u32 %v1044_v32, %v1040_v31  ;;  %v1065_v51 = vrot.slane %v1063_v46, 1  ;;  %v1079_v59 = vshll.u32 %v6032_v54, 16  ;;  %v6029_v62 = vld [vmem:[%s6364_s30 + $0x20] sm:$0xff]   ;;  %v1083_v0 = vshrl.u32 %v6032_v54, 16  ;;  %v6036_v5 = vld [vmem:[%s6364_s30 + $0x38] sm:$0xff]   ;;  %v6031_v6 = vld [vmem:[%s6364_s30 + $0x28] sm:$0xff]  }
  0x1f   : > { %v1053_v43 = vor.u32 %v1051_v38, %v1049_v33  ;;  %v1061_v50 = vor.u32 %v1059_v45, %v1057_v44  ;;  %v1073_v58 = vrot.slane %v1071_v53, 1  ;;  %v1087_v3 = vshll.u32 %v6034_v61, 16  ;;  %v6037_v24 = vld [vmem:[%s6364_s30 + $0x40] sm:$0xff]   ;;  %v6039_v31 = vld [vmem:[%s6364_s30 + $0x48] sm:$0xff]   ;;  %v6041_v38 = vld [vmem:[%s6364_s30 + $0x50] sm:$0xff]  }
  0x20   : > { %v1050_v40 = vsel %vm1038_vm3, %v1045_v35, %v1049_v33  ;;  %v1069_v60 = vor.u32 %v1067_v52, %v1065_v51  ;;  %v1081_v2 = vrot.slane %v1079_v59, 1  ;;  %v1091_v8 = vshrl.u32 %v6034_v61, 16  ;;  %v6043_v45 = vld [vmem:[%s6364_s30 + $0x58] sm:$0xff]   ;;  %v6045_v52 = vld [vmem:[%s6364_s30 + $0x60] sm:$0xff]   ;;  %v6047_v59 = vld [vmem:[%s6364_s30 + $0x68] sm:$0xff]  }
  0x21   : > { %v1058_v49 = vsel %vm1038_vm3, %v1053_v43, %v1057_v44  ;;  %v1066_v56 = vsel %vm1038_vm3, %v1061_v50, %v1065_v51  ;;  %v1077_v4 = vor.u32 %v1075_v57, %v1073_v58  ;;  %v1089_v9 = vrot.slane %v1087_v3, 1  ;;  %v6046_v44 = vld [vmem:[%s6364_s30 + $0x60] sm:$0xff]   ;;  %v6048_v51 = vld [vmem:[%s6364_s30 + $0x68] sm:$0xff]   ;;  %v6049_v3 = vld [vmem:[%s6364_s30 + $0x70] sm:$0xff]  }
  0x22   : > { %v1074_v63 = vsel %vm1038_vm3, %v1069_v60, %v1073_v58  ;;  %v1095_v10 = vshll.u32 %v6036_v5, 16  ;;  %v1135_v48 = vshll.u32 %v6046_v44, 16  ;;  %v1139_v54 = vshrl.u32 %v6046_v44, 16  ;;  %v6050_v58 = vld [vmem:[%s6364_s30 + $0x70] sm:$0xff]  }
  0x23   : > { %v1082_v7 = vsel %vm1038_vm3, %v1077_v4, %v1081_v2  ;;  %v1147_v61 = vshrl.u32 %v6048_v51, 16  ;;  %v6062_v44 = vld [vmem:[%s6364_s30 + $0x1cc] sm:$0xff]  }
  0x24   : > { %v1137_v50 = vrot.slane %v1135_v48, 1 }
  0x25   : > { %5367 = vmatmul.mubr.msk.bf16.gmra.mrb[8].mxu0 %vm380_vm2, %v6008_v11  ;;  %5403 = vmatmul.mubr.msk.bf16.gmra.mrb[8].mxu1 %vm380_vm2, %v6009_v12  ;;  %v1085_v11 = vor.u32 %v1083_v0, %v1081_v2  ;;  %v6033_v12 = vld [vmem:[%s6364_s30 + $0x30] sm:$0xff]   ;;  %v6052_v2 = vld [vmem:[%s6364_s30 + $0x78] sm:$0xff]  }
  0x26   : > { %5370 = vmatprep.mubr.msk.bf16.mxu0 %vm6297_vm1, %v7906_v1  ;;  %5406 = vmatprep.mubr.msk.bf16.mxu1 %vm6297_vm1, %v7906_v1 }
  0x2d   : > { %5371 = vmatmul.mubr.msk.bf16.gmra.mrb[12].mxu0 %vm380_vm2, %v6010_v13  ;;  %5407 = vmatmul.mubr.msk.bf16.gmra.mrb[12].mxu1 %vm380_vm2, %v6011_v14  ;;  %v1090_v13 = vsel %vm1038_vm3, %v1085_v11, %v1089_v9  ;;  %v1097_v14 = vrot.slane %v1095_v10, 1  ;;  %v6051_v10 = vld [vmem:[%s6364_s30 + $0x78] sm:$0xff]  }
  0x2e   : > { %5374 = vmatprep.mubr.msk.bf16.mxu0 %vm6297_vm1, %v7906_v1  ;;  %5410 = vmatprep.mubr.msk.bf16.mxu1 %vm6297_vm1, %v7906_v1 }
  0x35   : > { %5375 = vmatmul.mubr.msk.bf16.gmra.mrb[16].mxu0 %vm380_vm2, %v6012_v15  ;;  %5411 = vmatmul.mubr.msk.bf16.gmra.mrb[16].mxu1 %vm380_vm2, %v6013_v16  ;;  %v6038_v15 = vld [vmem:[%s6364_s30 + $0x40] sm:$0xff]   ;;  %v1093_v16 = vor.u32 %v1091_v8, %v1089_v9 }
  0x36   : > { %5378 = vmatprep.mubr.msk.bf16.mxu0 %vm6297_vm1, %v7906_v1  ;;  %5414 = vmatprep.mubr.msk.bf16.mxu1 %vm6297_vm1, %v7906_v1  ;;  %v1107_v26 = vshrl.u32 %v6038_v15, 16  ;;  %v6054_v9 = vld [vmem:[%s6364_s30 + $0x80] sm:$0xff]  }
  0x3d   : > { %5379 = vmatmul.mubr.msk.bf16.gmra.mrb[20].mxu0 %vm380_vm2, %v6014_v17  ;;  %5415 = vmatmul.mubr.msk.bf16.gmra.mrb[20].mxu1 %vm380_vm2, %v6015_v18  ;;  %v6035_v17 = vld [vmem:[%s6364_s30 + $0x38] sm:$0xff]   ;;  %v1098_v18 = vsel %vm1038_vm3, %v1093_v16, %v1097_v14  ;;  %v6055_v16 = vld [vmem:[%s6364_s30 + $0x88] ss:$0 sps:$4 sm:$0x11]  }
  0x3e   : > { %5382 = vmatprep.mubr.msk.bf16.mxu0 %vm6297_vm1, %v7906_v1  ;;  %5418 = vmatprep.mubr.msk.bf16.mxu1 %vm6297_vm1, %v7906_v1 }
  0x45   : > { %5383 = vmatmul.mubr.msk.bf16.gmra.mrb[24].mxu0 %vm380_vm2, %v6016_v19  ;;  %5419 = vmatmul.mubr.msk.bf16.gmra.mrb[24].mxu1 %vm380_vm2, %v6017_v20  ;;  %v1099_v19 = vshrl.u32 %v6036_v5, 16  ;;  %v1103_v20 = vshll.u32 %v6038_v15, 16  ;;  %v1155_v5 = vshrl.u32 %v6050_v58, 16 }
  0x46   : > { %5386 = vmatprep.mubr.msk.bf16.mxu0 %vm6297_vm1, %v7906_v1  ;;  %5422 = vmatprep.mubr.msk.bf16.mxu1 %vm6297_vm1, %v7906_v1 }
  0x47   : > { %v1101_v21 = vor.u32 %v1099_v19, %v1097_v14  ;;  %v1171_v19 = vshrl.u32 %v6054_v9, 16 }
  0x4d   : > { %5387 = vmatmul.mubr.msk.bf16.gmra.mrb[28].mxu0 %vm380_vm2, %v6018_v22  ;;  %5423 = vmatmul.mubr.msk.bf16.gmra.mrb[28].mxu1 %vm380_vm2, %v6019_v23  ;;  %v1105_v22 = vrot.slane %v1103_v20, 1  ;;  %v6040_v23 = vld [vmem:[%s6364_s30 + $0x48] sm:$0xff]   ;;  %v1175_v20 = vshll.u32 %v6055_v16, 16 }
  0x4e   : > { %5390 = vmatprep.mubr.msk.bf16.mxu0 %vm6297_vm1, %v7906_v1  ;;  %5428 = vmatprep.mubr.msk.bf16.mxu1 %vm6297_vm1, %v7906_v1  ;;  %v1115_v33 = vshrl.u32 %v6040_v23, 16 }
  0x4f   : > { %v1106_v25 = vsel %vm1038_vm3, %v1101_v21, %v1105_v22 }
  0x55   : > { %5391 = vmatmul.mubr.msk.bf16.gmra.mrb[32].mxu0 %vm380_vm2, %v6020_v27  ;;  %5429 = vmatmul.mubr.msk.bf16.vlgmr.msra.gmra.mrb[32].mxu1 %vm380_vm2, %v6021_v30  ;;  %v1111_v27 = vshll.u32 %v6040_v23, 16  ;;  %v6042_v30 = vld [vmem:[%s6364_s30 + $0x50] sm:$0xff]  }
  0x56   : > { %5498 = vmatprep.mubr.msk.bf16.mxu0 %vm6297_vm1, %v7906_v1  ;;  %5567 = vmatpush3.bf16.msra.mxu1 %v1610_v28  ;;  %v1109_v28 = vor.u32 %v1107_v26, %v1105_v22  ;;  %v1119_v34 = vshll.u32 %v6042_v30, 16  ;;  %v1177_v22 = vrot.slane %v1175_v20, 1  ;;  %v4995_v23 = vld [vmem:[%s7900_s1 + $0x14] sm:$0xf] }
  0x57   : > { %5432 = vmatprep.mubr.msk.bf16.mxu1 %vm6297_vm1, %v7906_v1  ;;  %5706 = vmatprep.subr.bf16.mxu1 %v7906_v1  ;;  %v1113_v29 = vrot.slane %v1111_v27, 1  ;;  %v2511_v26 = vsel %vm432_vm0, %v4995_v23, 0  ;;  %v5031_v27 = vld [vmem:[%s7900_s1 + $0x18] sm:$0xf] }
  0x58   : > { %v1121_v36 = vrot.slane %v1119_v34, 1  ;;  %v6060_v34 = vld [vmem:[%s6364_s30 + $0x1c4] sm:$0xff]  }
  0x59   : > { %v1114_v32 = vsel %vm1038_vm3, %v1109_v28, %v1113_v29  ;;  %v1117_v35 = vor.u32 %v1115_v33, %v1113_v29  ;;  %v6058_v28 = vld [vmem:[%s6364_s30 + $0x1bc] sm:$0xff]   ;;  %v6057_v29 = vld [vmem:[%s6364_s30 + $0x130] sm:$0xff]  }
  0x5b   : > { %v1122_v39 = vsel %vm1038_vm3, %v1117_v35, %v1121_v36 }
  0x5d   : > { %5499 = vmatmul.mubr.msk.bf16.vlgmr.msra.gmra.mrb[36].mxu0 %vm380_vm2, %v1050_v40  ;;  %5433 = vmatmul.mubr.msk.bf16.gmra.mrb[36].mxu1 %vm380_vm2, %v6022_v37  ;;  %v6044_v37 = vld [vmem:[%s6364_s30 + $0x58] sm:$0xff]   ;;  %v1123_v40 = vshrl.u32 %v6042_v30, 16  ;;  %v3033_v30 = vsel %vm432_vm0, %v5031_v27, 0 }
  0x5e   : > { %5637 = vmatpush3.bf16.msra.mxu0 %v1989_v41  ;;  %5436 = vmatprep.mubr.msk.bf16.mxu1 %vm6297_vm1, %v7906_v1  ;;  %v1127_v41 = vshll.u32 %v6044_v37, 16 }
  0x5f   : > { %5502 = vmatprep.mubr.msk.bf16.mxu0 %vm6297_vm1, %v7906_v1  ;;  %5776 = vmatprep.subr.bf16.mxu0 %v7906_v1  ;;  %v1125_v42 = vor.u32 %v1123_v40, %v1121_v36 }
  0x60   : > { %v1129_v43 = vrot.slane %v1127_v41, 1 }
  0x62   : > { %v1130_v46 = vsel %vm1038_vm3, %v1125_v42, %v1129_v43 }
  0x65   : > { %5503 = vmatmul.mubr.msk.bf16.gmra.mrb[40].mxu0 %vm380_vm2, %v1058_v49  ;;  %5437 = vmatmul.mubr.msk.bf16.gmra.mrb[40].mxu1 %vm380_vm2, %v6025_v47  ;;  %v1131_v47 = vshrl.u32 %v6044_v37, 16  ;;  %v6059_v37 = vld [vmem:[%s6364_s30 + $0x138] sm:$0xff]  }
  0x66   : > { %5506 = vmatprep.mubr.msk.bf16.mxu0 %vm6297_vm1, %v7906_v1  ;;  %5440 = vmatprep.mubr.msk.bf16.mxu1 %vm6297_vm1, %v7906_v1 }
  0x67   : > { %v1133_v49 = vor.u32 %v1131_v47, %v1129_v43  ;;  %v6061_v47 = vld [vmem:[%s6364_s30 + $0x140] sm:$0xff]  }
  0x69   : > { %v1138_v53 = vsel %vm1038_vm3, %v1133_v49, %v1137_v50 }
  0x6d   : > { %5507 = vmatmul.mubr.msk.bf16.gmra.mrb[44].mxu0 %vm380_vm2, %v1066_v56  ;;  %5441 = vmatmul.mubr.msk.bf16.gmra.mrb[44].mxu1 %vm380_vm2, %v6027_v55  ;;  %v1143_v55 = vshll.u32 %v6048_v51, 16  ;;  %v1141_v56 = vor.u32 %v1139_v54, %v1137_v50  ;;  %v6064_v54 = vld [vmem:[%s6364_s30 + $0x1d4] sm:$0xff]  }
  0x6e   : > { %5510 = vmatprep.mubr.msk.bf16.mxu0 %vm6297_vm1, %v7906_v1  ;;  %5444 = vmatprep.mubr.msk.bf16.mxu1 %vm6297_vm1, %v7906_v1 }
  0x6f   : > { %v1145_v57 = vrot.slane %v1143_v55, 1 }
  0x71   : > { %v1146_v60 = vsel %vm1038_vm3, %v1141_v56, %v1145_v57 }
  0x75   : > { %5511 = vmatmul.mubr.msk.bf16.gmra.mrb[48].mxu0 %vm380_vm2, %v1074_v63  ;;  %5445 = vmatmul.mubr.msk.bf16.gmra.mrb[48].mxu1 %vm380_vm2, %v6029_v62  ;;  %v1151_v62 = vshll.u32 %v6050_v58, 16  ;;  %v1149_v63 = vor.u32 %v1147_v61, %v1145_v57  ;;  %v6063_v57 = vld [vmem:[%s6364_s30 + $0x148] sm:$0xff]  }
  0x76   : > { %5514 = vmatprep.mubr.msk.bf16.mxu0 %vm6297_vm1, %v7906_v1  ;;  %5448 = vmatprep.mubr.msk.bf16.mxu1 %vm6297_vm1, %v7906_v1 }
  0x77   : > { %v1153_v0 = vrot.slane %v1151_v62, 1 }
  0x79   : > { %v1154_v4 = vsel %vm1038_vm3, %v1149_v63, %v1153_v0 }
  0x7d   : > { %5515 = vmatmul.mubr.msk.bf16.gmra.mrb[52].mxu0 %vm380_vm2, %v1082_v7  ;;  %5449 = vmatmul.mubr.msk.bf16.gmra.mrb[52].mxu1 %vm380_vm2, %v6031_v6  ;;  %v1159_v6 = vshll.u32 %v6052_v2, 16  ;;  %v1157_v7 = vor.u32 %v1155_v5, %v1153_v0  ;;  %v6066_v0 = vld [vmem:[%s6364_s30 + $0x1dc] sm:$0xff]  }
  0x7e   : > { %5518 = vmatprep.mubr.msk.bf16.mxu0 %vm6297_vm1, %v7906_v1  ;;  %5452 = vmatprep.mubr.msk.bf16.mxu1 %vm6297_vm1, %v7906_v1 }
  0x7f   : > { %v1161_v8 = vrot.slane %v1159_v6, 1 }
  0x81   : > { %v1162_v11 = vsel %vm1038_vm3, %v1157_v7, %v1161_v8 }
  0x85   : > { %5519 = vmatmul.mubr.msk.bf16.gmra.mrb[56].mxu0 %vm380_vm2, %v1090_v13  ;;  %5453 = vmatmul.mubr.msk.bf16.gmra.mrb[56].mxu1 %vm380_vm2, %v6033_v12  ;;  %v1163_v12 = vshrl.u32 %v6052_v2, 16  ;;  %v1167_v13 = vshll.u32 %v6054_v9, 16 }
  0x86   : > { %5522 = vmatprep.mubr.msk.bf16.mxu0 %vm6297_vm1, %v7906_v1  ;;  %5456 = vmatprep.mubr.msk.bf16.mxu1 %vm6297_vm1, %v7906_v1 }
  0x87   : > { %v1165_v14 = vor.u32 %v1163_v12, %v1161_v8  ;;  %v1169_v15 = vrot.slane %v1167_v13, 1 }
  0x89   : > { %v1173_v21 = vor.u32 %v1171_v19, %v1169_v15 }
  0x8d   : > { %5523 = vmatmul.mubr.msk.bf16.gmra.mrb[60].mxu0 %vm380_vm2, %v1098_v18  ;;  %5457 = vmatmul.mubr.msk.bf16.gmra.mrb[60].mxu1 %vm380_vm2, %v6035_v17  ;;  %v6053_v17 = vld [vmem:[%s6364_s30 + $0x80] sm:$0xff]   ;;  %v1170_v18 = vsel %vm1038_vm3, %v1165_v14, %v1169_v15  ;;  %v6067_v14 = vld [vmem:[%s6364_s30 + $0x158] sm:$0xff]  }
  0x8e   : > { %5526 = vmatprep.mubr.msk.bf16.mxu0 %vm6297_vm1, %v7906_v1  ;;  %5460 = vmatprep.mubr.msk.bf16.mxu1 %vm6297_vm1, %v7906_v1 }
  0x95   : > { %5527 = vmatmul.mubr.msk.bf16.gmra.mrb[64].mxu0 %vm380_vm2, %v1106_v25  ;;  %5461 = vmatmul.mubr.msk.bf16.gmra.mrb[64].mxu1 %vm380_vm2, %v6037_v24  ;;  %v1178_v24 = vsel %vm1038_vm3, %v1173_v21, %v1177_v22  ;;  %v6056_v25 = vld [vmem:[%s6364_s30 + $0x128] sm:$0xff]  }
  0x96   : > { %5530 = vmatprep.mubr.msk.bf16.mxu0 %vm6297_vm1, %v7906_v1  ;;  %5464 = vmatprep.mubr.msk.bf16.mxu1 %vm6297_vm1, %v7906_v1  ;;  %v6070_v21 = vld [vmem:[%s6364_s30 + $0x1ec] sm:$0xff]  }
  0x9d   : > { %5531 = vmatmul.mubr.msk.bf16.gmra.mrb[68].mxu0 %vm380_vm2, %v1114_v32  ;;  %5465 = vmatmul.mubr.msk.bf16.gmra.mrb[68].mxu1 %vm380_vm2, %v6039_v31 }
  0x9e   : > { %5534 = vmatprep.mubr.msk.bf16.mxu0 %vm6297_vm1, %v7906_v1  ;;  %5468 = vmatprep.mubr.msk.bf16.mxu1 %vm6297_vm1, %v7906_v1 }
  0xa5   : > { %5535 = vmatmul.mubr.msk.bf16.gmra.mrb[72].mxu0 %vm380_vm2, %v1122_v39  ;;  %5469 = vmatmul.mubr.msk.bf16.gmra.mrb[72].mxu1 %vm380_vm2, %v6041_v38 }
  0xa6   : > { %5538 = vmatprep.mubr.msk.bf16.mxu0 %vm6297_vm1, %v7906_v1  ;;  %5472 = vmatprep.mubr.msk.bf16.mxu1 %vm6297_vm1, %v7906_v1 }
  0xad   : > { %5539 = vmatmul.mubr.msk.bf16.gmra.mrb[76].mxu0 %vm380_vm2, %v1130_v46  ;;  %5473 = vmatmul.mubr.msk.bf16.gmra.mrb[76].mxu1 %vm380_vm2, %v6043_v45 }
  0xae   : > { %5542 = vmatprep.mubr.msk.bf16.mxu0 %vm6297_vm1, %v7906_v1  ;;  %5476 = vmatprep.mubr.msk.bf16.mxu1 %vm6297_vm1, %v7906_v1 }
  0xb5   : > { %5543 = vmatmul.mubr.msk.bf16.gmra.mrb[80].mxu0 %vm380_vm2, %v1138_v53  ;;  %5477 = vmatmul.mubr.msk.bf16.gmra.mrb[80].mxu1 %vm380_vm2, %v6045_v52 }
  0xb6   : > { %5546 = vmatprep.mubr.msk.bf16.mxu0 %vm6297_vm1, %v7906_v1  ;;  %5480 = vmatprep.mubr.msk.bf16.mxu1 %vm6297_vm1, %v7906_v1 }
  0xbd   : > { %5547 = vmatmul.mubr.msk.bf16.gmra.mrb[84].mxu0 %vm380_vm2, %v1146_v60  ;;  %5481 = vmatmul.mubr.msk.bf16.gmra.mrb[84].mxu1 %vm380_vm2, %v6047_v59 }
  0xbe   : > { %5550 = vmatprep.mubr.msk.bf16.mxu0 %vm6297_vm1, %v7906_v1  ;;  %5484 = vmatprep.mubr.msk.bf16.mxu1 %vm6297_vm1, %v7906_v1 }
  0xc5   : > { %5551 = vmatmul.mubr.msk.bf16.gmra.mrb[88].mxu0 %vm380_vm2, %v1154_v4  ;;  %5485 = vmatmul.mubr.msk.bf16.gmra.mrb[88].mxu1 %vm380_vm2, %v6049_v3  ;;  %v6065_v4 = vld [vmem:[%s6364_s30 + $0x150] sm:$0xff]  }
  0xc6   : > { %5554 = vmatprep.mubr.msk.bf16.mxu0 %vm6297_vm1, %v7906_v1  ;;  %5488 = vmatprep.mubr.msk.bf16.mxu1 %vm6297_vm1, %v7906_v1 }
  0xcd   : > { %5555 = vmatmul.mubr.msk.bf16.gmra.mrb[92].mxu0 %vm380_vm2, %v1162_v11  ;;  %5489 = vmatmul.mubr.msk.bf16.gmra.mrb[92].mxu1 %vm380_vm2, %v6051_v10  ;;  %v6068_v11 = vld [vmem:[%s6364_s30 + $0x1e4] sm:$0xff]  }
  0xce   : > { %5558 = vmatprep.mubr.msk.bf16.mxu0 %vm6297_vm1, %v7906_v1  ;;  %5492 = vmatprep.mubr.msk.bf16.mxu1 %vm6297_vm1, %v7906_v1 }
  0xd5   : > { %5559 = vmatmul.mubr.msk.bf16.gmra.mrb[96].mxu0 %vm380_vm2, %v1170_v18  ;;  %5493 = vmatmul.mubr.msk.bf16.gmra.mrb[96].mxu1 %vm380_vm2, %v6053_v17 }
  0xd6   : > { %5562 = vmatprep.mubr.msk.bf16.mxu0 %vm6297_vm1, %v7906_v1  ;;  %5568 = vmatprep.mubr.msk.bf16.mxu1 %vm6297_vm1, %v7906_v1 }
  0xdd   : > { %5563 = vmatmul.mubr.msk.bf16.gmra.mrb[100].mxu0 %vm380_vm2, %v1178_v24  ;;  %5569 = vmatmul.mubr.msk.bf16.vlgmr.msra.gmra.mrb[100].mxu1 %vm380_vm2, %v6056_v25  ;;  %v6069_v24 = vld [vmem:[%s6364_s30 + $0x160] sm:$0xff]  }
  0xde   : > { %5638 = vmatprep.mubr.msk.bf16.mxu0 %vm6297_vm1, %v7906_v1  ;;  %5707 = vmatpush3.bf16.msra.mxu1 %v2511_v26 }
  0xdf   : > { %5572 = vmatprep.mubr.msk.bf16.mxu1 %vm6297_vm1, %v7906_v1  ;;  %5846 = vmatprep.subr.bf16.mxu1 %v7906_v1 }
  0xe5   : > { %5639 = vmatmul.mubr.msk.bf16.vlgmr.msra.gmra.mrb[104].mxu0 %vm380_vm2, %v6058_v28  ;;  %5573 = vmatmul.mubr.msk.bf16.gmra.mrb[104].mxu1 %vm380_vm2, %v6057_v29 }
  0xe6   : > { %5777 = vmatpush3.bf16.msra.mxu0 %v3033_v30  ;;  %5576 = vmatprep.mubr.msk.bf16.mxu1 %vm6297_vm1, %v7906_v1 }
  0xe7   : > { %5642 = vmatprep.mubr.msk.bf16.mxu0 %vm6297_vm1, %v7906_v1  ;;  %5916 = vmatprep.subr.bf16.mxu0 %v7906_v1 }
  0xe8   : > { %v6623_v31 = vpop.f32.mrb[0].mxu0  ;;  %v6626_v33 = vpop.f32.mrb[0].mxu1 }
  0xe9   : > { %v5360_v32 = vpop.f32.mrb[1].mxu0  ;;  %v5396_v36 = vpop.f32.mrb[1].mxu1 }
  0xea   : > { %v6629_v35 = vpop.f32.mrb[2].mxu0  ;;  %v6632_v39 = vpop.f32.mrb[2].mxu1  ;;  %v6072_v32 = vld [vmem:[%s6364_s30 + $0x1f4] sm:$0xff]  }
  0xeb   : > { %v5361_v38 = vpop.f32.mrb[3].mxu0  ;;  %v5397_v40 = vpop.f32.mrb[3].mxu1 }
  0xed   : > { %5643 = vmatmul.mubr.msk.bf16.gmra.mrb[108].mxu0 %vm380_vm2, %v6060_v34  ;;  %5577 = vmatmul.mubr.msk.bf16.gmra.mrb[108].mxu1 %vm380_vm2, %v6059_v37  ;;  %v6071_v37 = vld [vmem:[%s6364_s30 + $0x168] sm:$0xff]  }
  0xee   : > { %5646 = vmatprep.mubr.msk.bf16.mxu0 %vm6297_vm1, %v7906_v1  ;;  %5580 = vmatprep.mubr.msk.bf16.mxu1 %vm6297_vm1, %v7906_v1 }
  0xf0   : > { %v6640_v41 = vpop.f32.mrb[4].mxu0  ;;  %v6642_v43 = vpop.f32.mrb[4].mxu1 }
  0xf1   : > { %v5364_v42 = vpop.f32.mrb[5].mxu0  ;;  %v5400_v46 = vpop.f32.mrb[5].mxu1 }
  0xf2   : > { %v6645_v45 = vpop.f32.mrb[6].mxu0  ;;  %v6648_v49 = vpop.f32.mrb[6].mxu1 }
  0xf3   : > { %v5365_v48 = vpop.f32.mrb[7].mxu0  ;;  %v5401_v50 = vpop.f32.mrb[7].mxu1 }
  0xf4   : > { %v6074_v48 = vld [vmem:[%s6364_s30 + $0x1fc] sm:$0xff]  }
  0xf5   : > { %5647 = vmatmul.mubr.msk.bf16.gmra.mrb[112].mxu0 %vm380_vm2, %v6062_v44  ;;  %5581 = vmatmul.mubr.msk.bf16.gmra.mrb[112].mxu1 %vm380_vm2, %v6061_v47 }
  0xf6   : > { %5650 = vmatprep.mubr.msk.bf16.mxu0 %vm6297_vm1, %v7906_v1  ;;  %5584 = vmatprep.mubr.msk.bf16.mxu1 %vm6297_vm1, %v7906_v1 }
  0xf8   : > { %v6656_v51 = vpop.f32.mrb[8].mxu0  ;;  %v6658_v53 = vpop.f32.mrb[8].mxu1 }
  0xf9   : > { %v5368_v52 = vpop.f32.mrb[9].mxu0  ;;  %v5404_v56 = vpop.f32.mrb[9].mxu1 }
  0xfa   : > { %v6661_v55 = vpop.f32.mrb[10].mxu0  ;;  %v6664_v59 = vpop.f32.mrb[10].mxu1 }
  0xfb   : > { %v5369_v58 = vpop.f32.mrb[11].mxu0  ;;  %v5405_v60 = vpop.f32.mrb[11].mxu1 }
  0xfd   : > { %5651 = vmatmul.mubr.msk.bf16.gmra.mrb[116].mxu0 %vm380_vm2, %v6064_v54  ;;  %5585 = vmatmul.mubr.msk.bf16.gmra.mrb[116].mxu1 %vm380_vm2, %v6063_v57  ;;  %v6073_v54 = vld [vmem:[%s6364_s30 + $0x170] sm:$0xff]  }
  0xfe   : > { %5654 = vmatprep.mubr.msk.bf16.mxu0 %vm6297_vm1, %v7906_v1  ;;  %5588 = vmatprep.mubr.msk.bf16.mxu1 %vm6297_vm1, %v7906_v1 }
 0x100   : > { %v6672_v61 = vpop.f32.mrb[12].mxu0  ;;  %v6674_v63 = vpop.f32.mrb[12].mxu1 }
 0x101   : > { %v5372_v62 = vpop.f32.mrb[13].mxu0  ;;  %v5408_v3 = vpop.f32.mrb[13].mxu1 }
 0x102   : > { %v6677_v2 = vpop.f32.mrb[14].mxu0  ;;  %v6680_v6 = vpop.f32.mrb[14].mxu1  ;;  %v6076_v3 = vld [vmem:[%s6364_s30 + $0x204] sm:$0xff]  }
 0x103   : > { %v5373_v5 = vpop.f32.mrb[15].mxu0  ;;  %v5409_v7 = vpop.f32.mrb[15].mxu1 }
 0x105   : > { %5655 = vmatmul.mubr.msk.bf16.gmra.mrb[120].mxu0 %vm380_vm2, %v6066_v0  ;;  %5589 = vmatmul.mubr.msk.bf16.gmra.mrb[120].mxu1 %vm380_vm2, %v6065_v4 }
 0x106   : > { %5658 = vmatprep.mubr.msk.bf16.mxu0 %vm6297_vm1, %v7906_v1  ;;  %5592 = vmatprep.mubr.msk.bf16.mxu1 %vm6297_vm1, %v7906_v1 }
 0x108   : > { %v6688_v8 = vpop.f32.mrb[16].mxu0  ;;  %v6690_v10 = vpop.f32.mrb[16].mxu1 }
 0x109   : > { %v5376_v9 = vpop.f32.mrb[17].mxu0  ;;  %v5412_v13 = vpop.f32.mrb[17].mxu1 }
 0x10a   : > { %v6693_v12 = vpop.f32.mrb[18].mxu0  ;;  %v6696_v16 = vpop.f32.mrb[18].mxu1  ;;  %v6075_v9 = vld [vmem:[%s6364_s30 + $0x178] sm:$0xff]  }
 0x10b   : > { %v5377_v15 = vpop.f32.mrb[19].mxu0  ;;  %v5413_v17 = vpop.f32.mrb[19].mxu1 }
 0x10d   : > { %5659 = vmatmul.mubr.msk.bf16.gmra.mrb[124].mxu0 %vm380_vm2, %v6068_v11  ;;  %5593 = vmatmul.mubr.msk.bf16.gmra.mrb[124].mxu1 %vm380_vm2, %v6067_v14 }
 0x10e   : > { %5662 = vmatprep.mubr.msk.bf16.mxu0 %vm6297_vm1, %v7906_v1  ;;  %5596 = vmatprep.mubr.msk.bf16.mxu1 %vm6297_vm1, %v7906_v1 }
 0x110   : > { %v6704_v18 = vpop.f32.mrb[20].mxu0  ;;  %v6706_v20 = vpop.f32.mrb[20].mxu1 }
 0x111   : > { %v5380_v19 = vpop.f32.mrb[21].mxu0  ;;  %v5416_v23 = vpop.f32.mrb[21].mxu1 }
 0x112   : > { %v6709_v22 = vpop.f32.mrb[22].mxu0  ;;  %v6712_v26 = vpop.f32.mrb[22].mxu1 }
 0x113   : > { %v5381_v25 = vpop.f32.mrb[23].mxu0  ;;  %v5417_v27 = vpop.f32.mrb[23].mxu1 }
 0x114   : > { %v6077_v27 = vld [vmem:[%s6364_s30 + $0x180] sm:$0xff]  }
 0x115   : > { %5663 = vmatmul.mubr.msk.bf16.gmra.mrb[128].mxu0 %vm380_vm2, %v6070_v21  ;;  %5597 = vmatmul.mubr.msk.bf16.gmra.mrb[128].mxu1 %vm380_vm2, %v6069_v24  ;;  %v6078_v21 = vld [vmem:[%s6364_s30 + $0x20c] sm:$0xff]  }
 0x116   : > { %5666 = vmatprep.mubr.msk.bf16.mxu0 %vm6297_vm1, %v7906_v1  ;;  %5600 = vmatprep.mubr.msk.bf16.mxu1 %vm6297_vm1, %v7906_v1 }
 0x118   : > { %v6720_v28 = vpop.f32.mrb[24].mxu0  ;;  %v6722_v30 = vpop.f32.mrb[24].mxu1 }
 0x119   : > { %v5384_v29 = vpop.f32.mrb[25].mxu0  ;;  %v5420_v36 = vpop.f32.mrb[25].mxu1 }
 0x11a   : > { %v6725_v34 = vpop.f32.mrb[26].mxu0  ;;  %v6728_v40 = vpop.f32.mrb[26].mxu1 }
 0x11b   : > { %v5385_v38 = vpop.f32.mrb[27].mxu0  ;;  %v5421_v42 = vpop.f32.mrb[27].mxu1 }
 0x11d   : > { %5667 = vmatmul.mubr.msk.bf16.gmra.mrb[132].mxu0 %vm380_vm2, %v6072_v32  ;;  %5601 = vmatmul.mubr.msk.bf16.gmra.mrb[132].mxu1 %vm380_vm2, %v6071_v37 }
 0x11e   : > { %5670 = vmatprep.mubr.msk.bf16.mxu0 %vm6297_vm1, %v7906_v1  ;;  %5604 = vmatprep.mubr.msk.bf16.mxu1 %vm6297_vm1, %v7906_v1 }
 0x120   : > { %v6736_v44 = vpop.f32.mrb[28].mxu0  ;;  %v6738_v47 = vpop.f32.mrb[28].mxu1 }
 0x121   : > { %v5388_v46 = vpop.f32.mrb[29].mxu0  ;;  %v5424_v52 = vpop.f32.mrb[29].mxu1 }
 0x122   : > { %v6741_v50 = vpop.f32.mrb[30].mxu0  ;;  %v6744_v57 = vpop.f32.mrb[30].mxu1 }
 0x123   : > { %v5389_v56 = vpop.f32.mrb[31].mxu0  ;;  %v5425_v58 = vpop.f32.mrb[31].mxu1 }
 0x124   : > { %v6079_v58 = vld [vmem:[%s6364_s30 + $0x188] sm:$0xff]  }
 0x125   : > { %5671 = vmatmul.mubr.msk.bf16.gmra.mrb[136].mxu0 %vm380_vm2, %v6074_v48  ;;  %5605 = vmatmul.mubr.msk.bf16.gmra.mrb[136].mxu1 %vm380_vm2, %v6073_v54  ;;  %v6080_v48 = vld [vmem:[%s6364_s30 + $0x214] sm:$0xff]  }
 0x126   : > { %5674 = vmatprep.mubr.msk.bf16.mxu0 %vm6297_vm1, %v7906_v1  ;;  %5608 = vmatprep.mubr.msk.bf16.mxu1 %vm6297_vm1, %v7906_v1 }
 0x128   : > { %v6752_v60 = vpop.f32.mrb[32].mxu0  ;;  %v778_v62 = vpop.f32.mrb[32].mxu1 }
 0x129   : > { %v5392_v0 = vpop.f32.mrb[33].mxu0  ;;  %v779_v4 = vadd.f32 %v778_v62, %v6623_v31  ;;  %v5430_v5 = vpop.f32.mrb[33].mxu1 }
 0x12a   : > { %v6756_v7 = vpop.f32.mrb[34].mxu0  ;;  %v781_v11 = vpop.f32.mrb[34].mxu1 }
 0x12b   : > { %v5393_v13 = vpop.f32.mrb[35].mxu0  ;;  %v782_v14 = vadd.f32 %v781_v11, %v6629_v35  ;;  %v5431_v15 = vpop.f32.mrb[35].mxu1 }
 0x12c   : > { %v6082_v13 = vld [vmem:[%s6364_s30 + $0x21c] sm:$0xff]  }
 0x12d   : > { %5675 = vmatmul.mubr.msk.bf16.gmra.mrb[140].mxu0 %vm380_vm2, %v6076_v3  ;;  %5609 = vmatmul.mubr.msk.bf16.gmra.mrb[140].mxu1 %vm380_vm2, %v6075_v9 }
 0x12e   : > { %5678 = vmatprep.mubr.msk.bf16.mxu0 %vm6297_vm1, %v7906_v1  ;;  %5612 = vmatprep.mubr.msk.bf16.mxu1 %vm6297_vm1, %v7906_v1 }
 0x130   : > { %v1267_v31 = vpop.f32.mrb[36].mxu0  ;;  %v786_v17 = vpop.f32.mrb[36].mxu1 }
 0x131   : > { %v5500_v19 = vpop.f32.mrb[37].mxu0  ;;  %v6767_v23 = vadd.f32 %v1267_v31, %v779_v4  ;;  %v787_v24 = vadd.f32 %v786_v17, %v6640_v41  ;;  %v5434_v35 = vpop.f32.mrb[37].mxu1  ;;  %v6081_v17 = vld [vmem:[%s6364_s30 + $0x190] sm:$0xff]  }
 0x132   : > { %v1270_v25 = vpop.f32.mrb[38].mxu0  ;;  %v789_v29 = vpop.f32.mrb[38].mxu1 }
 0x133   : > { %v5501_v32 = vpop.f32.mrb[39].mxu0  ;;  %v6771_v36 = vadd.f32 %v1270_v25, %v782_v14  ;;  %v790_v37 = vadd.f32 %v789_v29, %v6645_v45  ;;  %v5435_v38 = vpop.f32.mrb[39].mxu1 }
 0x134   : > { %v6084_v32 = vld [vmem:[%s6364_s30 + $0x224] sm:$0xff]  }
 0x135   : > { %5679 = vmatmul.mubr.msk.bf16.gmra.mrb[144].mxu0 %vm380_vm2, %v6078_v21  ;;  %5613 = vmatmul.mubr.msk.bf16.gmra.mrb[144].mxu1 %vm380_vm2, %v6077_v27 }
 0x136   : > { %5682 = vmatprep.mubr.msk.bf16.mxu0 %vm6297_vm1, %v7906_v1  ;;  %5616 = vmatprep.mubr.msk.bf16.mxu1 %vm6297_vm1, %v7906_v1 }
 0x138   : > { %v1275_v41 = vpop.f32.mrb[40].mxu0  ;;  %v794_v42 = vpop.f32.mrb[40].mxu1 }
 0x139   : > { %v5504_v46 = vpop.f32.mrb[41].mxu0  ;;  %v6781_v52 = vadd.f32 %v1275_v41, %v787_v24  ;;  %v795_v54 = vadd.f32 %v794_v42, %v6656_v51  ;;  %v5438_v45 = vpop.f32.mrb[41].mxu1  ;;  %v6083_v42 = vld [vmem:[%s6364_s30 + $0x198] sm:$0xff]  }
 0x13a   : > { %v1278_v56 = vpop.f32.mrb[42].mxu0  ;;  %v797_v62 = vpop.f32.mrb[42].mxu1 }
 0x13b   : > { %v5505_v0 = vpop.f32.mrb[43].mxu0  ;;  %v6785_v3 = vadd.f32 %v1278_v56, %v790_v37  ;;  %v798_v4 = vadd.f32 %v797_v62, %v6661_v55  ;;  %v5439_v5 = vpop.f32.mrb[43].mxu1 }
 0x13d   : > { %5683 = vmatmul.mubr.msk.bf16.gmra.mrb[148].mxu0 %vm380_vm2, %v6080_v48  ;;  %5617 = vmatmul.mubr.msk.bf16.gmra.mrb[148].mxu1 %vm380_vm2, %v6079_v58 }
 0x13e   : > { %5686 = vmatprep.mubr.msk.bf16.mxu0 %vm6297_vm1, %v7906_v1  ;;  %5620 = vmatprep.mubr.msk.bf16.mxu1 %vm6297_vm1, %v7906_v1 }
 0x140   : > { %v1283_v51 = vpop.f32.mrb[44].mxu0  ;;  %v802_v9 = vpop.f32.mrb[44].mxu1 }
 0x141   : > { %v5508_v11 = vpop.f32.mrb[45].mxu0  ;;  %v6795_v14 = vadd.f32 %v1283_v51, %v795_v54  ;;  %v803_v15 = vadd.f32 %v802_v9, %v6672_v61  ;;  %v5442_v55 = vpop.f32.mrb[45].mxu1  ;;  %v6085_v9 = vld [vmem:[%s6364_s30 + $0x1a0] sm:$0xff]  }
 0x142   : > { %v1286_v31 = vpop.f32.mrb[46].mxu0  ;;  %v805_v19 = vpop.f32.mrb[46].mxu1  ;;  %v6090_v55 = vld [vmem:[%s6364_s30 + $0x128] sm:$0xff]  }
 0x143   : > { %v5509_v21 = vpop.f32.mrb[47].mxu0  ;;  %v6799_v24 = vadd.f32 %v1286_v31, %v798_v4  ;;  %v806_v35 = vadd.f32 %v805_v19, %v6677_v2  ;;  %v5443_v25 = vpop.f32.mrb[47].mxu1  ;;  %v6086_v4 = vld [vmem:[%s6364_s30 + $0x22c] sm:$0xff]   ;;  %v2322_v19 = vshll.u32 %v6090_v55, 16 }
 0x144   : > { %v2716_v21 = vld [vmem:[%s6364_s30 + $0x8] sm:$0xf] }
 0x145   : > { %5687 = vmatmul.mubr.msk.bf16.gmra.mrb[152].mxu0 %vm380_vm2, %v6082_v13  ;;  %5621 = vmatmul.mubr.msk.bf16.gmra.mrb[152].mxu1 %vm380_vm2, %v6081_v17 }
 0x146   : > { %5690 = vmatprep.mubr.msk.bf16.mxu0 %vm6297_vm1, %v7906_v1  ;;  %5624 = vmatprep.mubr.msk.bf16.mxu1 %vm6297_vm1, %v7906_v1 }
 0x148   : > { %v1291_v61 = vpop.f32.mrb[48].mxu0  ;;  %v810_v27 = vpop.f32.mrb[48].mxu1 }
 0x149   : > { %v5512_v29 = vpop.f32.mrb[49].mxu0  ;;  %v6809_v37 = vadd.f32 %v1291_v61, %v803_v15  ;;  %v811_v38 = vadd.f32 %v810_v27, %v6688_v8  ;;  %v5446_v2 = vpop.f32.mrb[49].mxu1 }
 0x14a   : > { %v1294_v41 = vpop.f32.mrb[50].mxu0  ;;  %v813_v46 = vpop.f32.mrb[50].mxu1  ;;  %v6088_v29 = vld [vmem:[%s6364_s30 + $0x234] sm:$0xff]  }
 0x14b   : > { %v5513_v48 = vpop.f32.mrb[51].mxu0  ;;  %v6813_v54 = vadd.f32 %v1294_v41, %v806_v35  ;;  %v814_v45 = vadd.f32 %v813_v46, %v6693_v12  ;;  %v5447_v56 = vpop.f32.mrb[51].mxu1  ;;  %v2717_v35 = vld [vmem:[%s6364_s30 + $0xc] sm:$0xf] }
 0x14c   : > { %v6087_v41 = vld [vmem:[%s6364_s30 + $0x1a8] sm:$0xff]   ;;  %v2320_v56 = vshrl.u32 %v6090_v55, 16 }
 0x14d   : > { %5691 = vmatmul.mubr.msk.bf16.gmra.mrb[156].mxu0 %vm380_vm2, %v6084_v32  ;;  %5625 = vmatmul.mubr.msk.bf16.gmra.mrb[156].mxu1 %vm380_vm2, %v6083_v42  ;;  %v5032_v42 = vcombine.low %v2716_v21, %v2717_v35 }
 0x14e   : > { %5694 = vmatprep.mubr.msk.bf16.mxu0 %vm6297_vm1, %v7906_v1  ;;  %5628 = vmatprep.mubr.msk.bf16.mxu1 %vm6297_vm1, %v7906_v1 }
 0x150   : > { %v1299_v8 = vpop.f32.mrb[52].mxu0  ;;  %v818_v58 = vpop.f32.mrb[52].mxu1 }
 0x151   : > { %v6822_v62 = vadd.f32 %v1299_v8, %v811_v38  ;;  %v5516_v0 = vpop.f32.mrb[53].mxu0  ;;  %v819_v12 = vadd.f32 %v818_v58, %v6704_v18  ;;  %v5450_v5 = vpop.f32.mrb[53].mxu1  ;;  %v6091_v18 = vld [vmem:[%s6364_s30 + $0x130] sm:$0xff]   ;;  %v2324_v8 = vrot.slane %v2322_v19, 1 }
 0x152   : > { %v1302_v51 = vpop.f32.mrb[54].mxu0  ;;  %v821_v11 = vpop.f32.mrb[54].mxu1  ;;  %v2327_v58 = vshll.u32 %v6091_v18, 16  ;;  %v2844_v5 = vshll.u32 %v5032_v42, 16  ;;  %v2331_v19 = vshrl.u32 %v6091_v18, 16 }
 0x153   : > { %v6827_v13 = vadd.f32 %v1302_v51, %v814_v45  ;;  %v5517_v15 = vpop.f32.mrb[55].mxu0  ;;  %v822_v31 = vadd.f32 %v821_v11, %v6709_v22  ;;  %v5451_v17 = vpop.f32.mrb[55].mxu1  ;;  %v2325_v51 = vor.u32 %v2324_v8, %v2320_v56 }
 0x154   : > { %v6089_v15 = vld [vmem:[%s6364_s30 + $0x23c] sm:$0xff]  }
 0x155   : > { %5695 = vmatmul.mubr.msk.bf16.gmra.mrb[160].mxu0 %vm380_vm2, %v6086_v4  ;;  %5629 = vmatmul.mubr.msk.bf16.gmra.mrb[160].mxu1 %vm380_vm2, %v6085_v9  ;;  %v2329_v9 = vrot.slane %v2327_v58, 1  ;;  %v5102_v17 = vld [vmem:[%s7900_s1 + $0x1c] sm:$0xf] }
 0x156   : > { %5698 = vmatprep.mubr.msk.bf16.mxu0 %vm6297_vm1, %v7906_v1  ;;  %5632 = vmatprep.mubr.msk.bf16.mxu1 %vm6297_vm1, %v7906_v1  ;;  %v3555_v56 = vsel %vm432_vm0, %v5102_v17, 0 }
 0x158   : > { %v1307_v25 = vpop.f32.mrb[56].mxu0  ;;  %v826_v61 = vpop.f32.mrb[56].mxu1 }
 0x159   : > { %v6840_v27 = vadd.f32 %v1307_v25, %v819_v12  ;;  %v5520_v22 = vpop.f32.mrb[57].mxu0  ;;  %v827_v32 = vadd.f32 %v826_v61, %v6720_v28  ;;  %v5454_v38 = vpop.f32.mrb[57].mxu1  ;;  %v6850_v12 = vld [vmem:[%s6364_s30 + $0x138] sm:$0xff]   ;;  %v6094_v28 = vld [vmem:[%s6364_s30 + $0x10] sm:$0xff]  }
 0x15a   : > { %v1310_v2 = vpop.f32.mrb[58].mxu0  ;;  %v829_v46 = vpop.f32.mrb[58].mxu1  ;;  %v2335_v21 = vshll.u32 %v6850_v12, 16  ;;  %v2842_v22 = vshrl.u32 %v5032_v42, 16  ;;  %v2849_v38 = vshll.u32 %v6094_v28, 16 }
 0x15b   : > { %v6845_v48 = vadd.f32 %v1310_v2, %v822_v31  ;;  %v5521_v45 = vpop.f32.mrb[59].mxu0  ;;  %v830_v0 = vadd.f32 %v829_v46, %v6725_v34  ;;  %v5455_v4 = vpop.f32.mrb[59].mxu1  ;;  %v2330_v46 = vsel %vm1038_vm3, %v2325_v51, %v2329_v9 }
 0x15c   : > { %v2337_v8 = vrot.slane %v2335_v21, 1  ;;  %v2851_v58 = vrot.slane %v2849_v38, 1  ;;  %v2853_v21 = vshrl.u32 %v6094_v28, 16  ;;  %v2339_v38 = vshrl.u32 %v6850_v12, 16 }
 0x15d   : > { %5699 = vmatmul.mubr.msk.bf16.gmra.mrb[164].mxu0 %vm380_vm2, %v6088_v29  ;;  %5633 = vmatmul.mubr.msk.bf16.gmra.mrb[164].mxu1 %vm380_vm2, %v6087_v41  ;;  %v2846_v29 = vrot.slane %v2844_v5, 1  ;;  %v5138_v5 = vld [vmem:[%s7900_s1 + $0x20] sm:$0xf] }
 0x15e   : > { %5702 = vmatprep.mubr.msk.bf16.mxu0 %vm6297_vm1, %v7906_v1  ;;  %5708 = vmatprep.mubr.msk.bf16.mxu1 %vm6297_vm1, %v7906_v1  ;;  %v2855_v28 = vor.u32 %v2853_v21, %v2851_v58 }
 0x15f   : > { %v2847_v42 = vor.u32 %v2846_v29, %v2842_v22 }
 0x160   : > { %v1315_v11 = vpop.f32.mrb[60].mxu0  ;;  %v834_v34 = vpop.f32.mrb[60].mxu1 }
 0x161   : > { %v6859_v55 = vadd.f32 %v1315_v11, %v827_v32  ;;  %v5524_v31 = vpop.f32.mrb[61].mxu0  ;;  %v835_v35 = vadd.f32 %v834_v34, %v6736_v44  ;;  %v5458_v25 = vpop.f32.mrb[61].mxu1  ;;  %v2333_v44 = vor.u32 %v2331_v19, %v2329_v9  ;;  %v2852_v19 = vsel %vm1038_vm3, %v2847_v42, %v2851_v58 }
 0x162   : > { %v1318_v61 = vpop.f32.mrb[62].mxu0  ;;  %v837_v2 = vpop.f32.mrb[62].mxu1 }
 0x163   : > { %v6866_v41 = vadd.f32 %v1318_v61, %v830_v0  ;;  %v5525_v32 = vpop.f32.mrb[63].mxu0  ;;  %v838_v45 = vadd.f32 %v837_v2, %v6741_v50  ;;  %v5459_v18 = vpop.f32.mrb[63].mxu1  ;;  %v6096_v0 = vld [vmem:[%s6364_s30 + $0x18] sm:$0xff]   ;;  %v6095_v50 = vld [vmem:[%s6364_s30 + $0x140] sm:$0xff]  }
 0x164   : > { %v2857_v25 = vshll.u32 %v6096_v0, 16  ;;  %v2343_v2 = vshll.u32 %v6095_v50, 16  ;;  %v6098_v18 = vld [vmem:[%s6364_s30 + $0x20] sm:$0xff]  }
 0x165   : > { %5703 = vmatmul.mubr.msk.bf16.gmra.mrb[168].mxu0 %vm380_vm2, %v6089_v15  ;;  %5709 = vmatmul.mubr.msk.bf16.vlgmr.msra.gmra.mrb[168].mxu1 %vm380_vm2, %v2330_v46  ;;  %v2338_v15 = vsel %vm1038_vm3, %v2333_v44, %v2337_v8 }
 0x166   : > { %5778 = vmatprep.mubr.msk.bf16.mxu0 %vm6297_vm1, %v7906_v1  ;;  %5847 = vmatpush3.bf16.msra.mxu1 %v3555_v56  ;;  %v2859_v46 = vrot.slane %v2857_v25, 1  ;;  %v2345_v12 = vrot.slane %v2343_v2, 1  ;;  %v6097_v56 = vld [vmem:[%s6364_s30 + $0x148] sm:$0xff]   ;;  %v2347_v25 = vshrl.u32 %v6095_v50, 16  ;;  %v6099_v50 = vld [vmem:[%s6364_s30 + $0x150] sm:$0xff]  }
 0x167   : > { %5712 = vmatprep.mubr.msk.bf16.mxu1 %vm6297_vm1, %v7906_v1 }
 0x168   : > { %v1323_v4 = vpop.f32.mrb[64].mxu0  ;;  %v842_v51 = vpop.f32.mrb[64].mxu1 }
 0x169   : > { %v6882_v9 = vadd.f32 %v1323_v4, %v835_v35  ;;  %v5528_v11 = vpop.f32.mrb[65].mxu0  ;;  %v843_v34 = vadd.f32 %v842_v51, %v6752_v60  ;;  %v5462_v31 = vpop.f32.mrb[65].mxu1  ;;  %v3854_v35 = vsel %vm432_vm0, %v5138_v5, 0 }
 0x16a   : > { %v1326_v17 = vpop.f32.mrb[66].mxu0  ;;  %v845_v61 = vpop.f32.mrb[66].mxu1  ;;  %v2860_v11 = vsel %vm1038_vm3, %v2855_v28, %v2859_v46  ;;  %v2865_v31 = vshll.u32 %v6098_v18, 16 }
 0x16b   : > { %v6887_v22 = vadd.f32 %v1326_v17, %v838_v45  ;;  %v5529_v29 = vpop.f32.mrb[67].mxu0  ;;  %v846_v32 = vadd.f32 %v845_v61, %v6756_v7  ;;  %v5463_v60 = vpop.f32.mrb[67].mxu1  ;;  %v2341_v45 = vor.u32 %v2339_v38, %v2337_v8  ;;  %v2349_v38 = vor.u32 %v2347_v25, %v2345_v12 }
 0x16d   : > { %5779 = vmatmul.mubr.msk.bf16.vlgmr.msra.gmra.mrb[172].mxu0 %vm380_vm2, %v2852_v19  ;;  %5713 = vmatmul.mubr.msk.bf16.gmra.mrb[172].mxu1 %vm380_vm2, %v2338_v15  ;;  %v2861_v15 = vshrl.u32 %v6096_v0, 16  ;;  %v2346_v21 = vsel %vm1038_vm3, %v2341_v45, %v2345_v12  ;;  %v2867_v0 = vrot.slane %v2865_v31, 1  ;;  %v2355_v31 = vshrl.u32 %v6097_v56, 16 }
 0x16e   : > { %5917 = vmatpush3.bf16.msra.mxu0 %v3854_v35  ;;  %5716 = vmatprep.mubr.msk.bf16.mxu1 %vm6297_vm1, %v7906_v1  ;;  %v6100_v35 = vld [vmem:[%s6364_s30 + $0x28] sm:$0xff]  }
 0x16f   : > { %5782 = vmatprep.mubr.msk.bf16.mxu0 %vm6297_vm1, %v7906_v1 }
 0x170   : > { %v1331_v44 = vpop.f32.mrb[68].mxu0  ;;  %v850_v7 = vpop.f32.mrb[68].mxu1 }
 0x171   : > { %v6900_v42 = vadd.f32 %v1331_v44, %v843_v34  ;;  %v5532_v4 = vpop.f32.mrb[69].mxu0  ;;  %v851_v5 = vadd.f32 %v850_v7, %v6626_v33  ;;  %v5466_v51 = vpop.f32.mrb[69].mxu1  ;;  %v2351_v34 = vshll.u32 %v6097_v56, 16  ;;  %v2863_v33 = vor.u32 %v2861_v15, %v2859_v46  ;;  %v6101_v56 = vld [vmem:[%s6364_s30 + $0x158] sm:$0xff]  }
 0x172   : > { %v1334_v58 = vpop.f32.mrb[70].mxu0  ;;  %v853_v17 = vpop.f32.mrb[70].mxu1  ;;  %v2869_v46 = vshrl.u32 %v6098_v18, 16  ;;  %v2873_v51 = vshll.u32 %v6100_v35, 16 }
 0x173   : > { %v6904_v19 = vadd.f32 %v1334_v58, %v846_v32  ;;  %v5533_v8 = vpop.f32.mrb[71].mxu0  ;;  %v854_v61 = vadd.f32 %v853_v17, %v6632_v39  ;;  %v5467_v29 = vpop.f32.mrb[71].mxu1  ;;  %v2353_v2 = vrot.slane %v2351_v34, 1  ;;  %v2868_v4 = vsel %vm1038_vm3, %v2863_v33, %v2867_v0 }
 0x174   : > { %v2875_v18 = vrot.slane %v2873_v51, 1  ;;  %v2363_v51 = vshrl.u32 %v6099_v50, 16 }
 0x175   : > { %5783 = vmatmul.mubr.msk.bf16.gmra.mrb[176].mxu0 %vm380_vm2, %v2860_v11  ;;  %5717 = vmatmul.mubr.msk.bf16.gmra.mrb[176].mxu1 %vm380_vm2, %v2346_v21  ;;  %v2354_v15 = vsel %vm1038_vm3, %v2349_v38, %v2353_v2  ;;  %v6102_v21 = vld [vmem:[%s6364_s30 + $0x30] sm:$0xff]   ;;  %v2357_v25 = vor.u32 %v2355_v31, %v2353_v2 }
 0x176   : > { %5786 = vmatprep.mubr.msk.bf16.mxu0 %vm6297_vm1, %v7906_v1  ;;  %5720 = vmatprep.mubr.msk.bf16.mxu1 %vm6297_vm1, %v7906_v1 }
 0x178   : > { %v1339_v32 = vpop.f32.mrb[72].mxu0  ;;  %v858_v60 = vpop.f32.mrb[72].mxu1 }
 0x179   : > { %v6916_v39 = vadd.f32 %v1339_v32, %v851_v5  ;;  %v5536_v28 = vpop.f32.mrb[73].mxu0  ;;  %v859_v45 = vadd.f32 %v858_v60, %v6642_v43  ;;  %v5470_v44 = vpop.f32.mrb[73].mxu1  ;;  %v2359_v5 = vshll.u32 %v6099_v50, 16  ;;  %v2871_v43 = vor.u32 %v2869_v46, %v2867_v0 }
 0x17a   : > { %v1342_v7 = vpop.f32.mrb[74].mxu0  ;;  %v861_v58 = vpop.f32.mrb[74].mxu1  ;;  %v2877_v0 = vshrl.u32 %v6100_v35, 16  ;;  %v2881_v44 = vshll.u32 %v6102_v21, 16 }
 0x17b   : > { %v6920_v11 = vadd.f32 %v1342_v7, %v854_v61  ;;  %v5537_v12 = vpop.f32.mrb[75].mxu0  ;;  %v862_v17 = vadd.f32 %v861_v58, %v6648_v49  ;;  %v5471_v8 = vpop.f32.mrb[75].mxu1  ;;  %v2361_v34 = vrot.slane %v2359_v5, 1  ;;  %v2876_v28 = vsel %vm1038_vm3, %v2871_v43, %v2875_v18  ;;  %v6103_v5 = vld [vmem:[%s6364_s30 + $0x160] sm:$0xff]  }
 0x17c   : > { %v2883_v35 = vrot.slane %v2881_v44, 1  ;;  %v2375_v44 = vshll.u32 %v6103_v5, 16 }
 0x17d   : > { %5787 = vmatmul.mubr.msk.bf16.gmra.mrb[180].mxu0 %vm380_vm2, %v2868_v4  ;;  %5721 = vmatmul.mubr.msk.bf16.gmra.mrb[180].mxu1 %vm380_vm2, %v2354_v15  ;;  %v2362_v46 = vsel %vm1038_vm3, %v2357_v25, %v2361_v34  ;;  %v6945_v15 = vld [vmem:[%s6364_s30 + $0x38] sm:$0xff]   ;;  %v2365_v31 = vor.u32 %v2363_v51, %v2361_v34 }
 0x17e   : > { %5790 = vmatprep.mubr.msk.bf16.mxu0 %vm6297_vm1, %v7906_v1  ;;  %5724 = vmatprep.mubr.msk.bf16.mxu1 %vm6297_vm1, %v7906_v1 }
 0x180   : > { %v1347_v61 = vpop.f32.mrb[76].mxu0  ;;  %v866_v29 = vpop.f32.mrb[76].mxu1 }
 0x181   : > { %v6932_v49 = vadd.f32 %v1347_v61, %v859_v45  ;;  %v5540_v33 = vpop.f32.mrb[77].mxu0  ;;  %v867_v38 = vadd.f32 %v866_v29, %v6658_v53  ;;  %v5474_v32 = vpop.f32.mrb[77].mxu1  ;;  %v2367_v45 = vshll.u32 %v6101_v56, 16  ;;  %v2879_v53 = vor.u32 %v2877_v0, %v2875_v18 }
 0x182   : > { %v1350_v60 = vpop.f32.mrb[78].mxu0  ;;  %v869_v7 = vpop.f32.mrb[78].mxu1  ;;  %v2885_v33 = vshrl.u32 %v6102_v21, 16  ;;  %v2889_v32 = vshll.u32 %v6945_v15, 16 }
 0x183   : > { %v6936_v4 = vadd.f32 %v1350_v60, %v862_v17  ;;  %v5541_v2 = vpop.f32.mrb[79].mxu0  ;;  %v870_v58 = vadd.f32 %v869_v7, %v6664_v59  ;;  %v5475_v12 = vpop.f32.mrb[79].mxu1  ;;  %v2369_v50 = vrot.slane %v2367_v45, 1  ;;  %v2884_v18 = vsel %vm1038_vm3, %v2879_v53, %v2883_v35  ;;  %v6105_v45 = vld [vmem:[%s6364_s30 + $0x168] sm:$0xff]  }
 0x184   : > { %v2887_v21 = vor.u32 %v2885_v33, %v2883_v35  ;;  %v2891_v2 = vrot.slane %v2889_v32, 1  ;;  %v2379_v33 = vshrl.u32 %v6103_v5, 16  ;;  %v2383_v32 = vshll.u32 %v6105_v45, 16 }
 0x185   : > { %5791 = vmatmul.mubr.msk.bf16.gmra.mrb[184].mxu0 %vm380_vm2, %v2876_v28  ;;  %5725 = vmatmul.mubr.msk.bf16.gmra.mrb[184].mxu1 %vm380_vm2, %v2362_v46  ;;  %v2370_v0 = vsel %vm1038_vm3, %v2365_v31, %v2369_v50  ;;  %v6964_v46 = vld [vmem:[%s6364_s30 + $0x40] sm:$0xff]  }
 0x186   : > { %5794 = vmatprep.mubr.msk.bf16.mxu0 %vm6297_vm1, %v7906_v1  ;;  %5728 = vmatprep.mubr.msk.bf16.mxu1 %vm6297_vm1, %v7906_v1  ;;  %v2892_v35 = vsel %vm1038_vm3, %v2887_v21, %v2891_v2  ;;  %v2385_v5 = vrot.slane %v2383_v32, 1  ;;  %v7004_v32 = vld [vmem:[%s6364_s30 + $0x50] sm:$0xff]  }
 0x188   : > { %v1355_v17 = vpop.f32.mrb[80].mxu0  ;;  %v874_v59 = vpop.f32.mrb[80].mxu1 }
 0x189   : > { %v6950_v8 = vadd.f32 %v1355_v17, %v867_v38  ;;  %v5544_v43 = vpop.f32.mrb[81].mxu0  ;;  %v875_v25 = vadd.f32 %v874_v59, %v6674_v63  ;;  %v5478_v61 = vpop.f32.mrb[81].mxu1  ;;  %v2371_v38 = vshrl.u32 %v6101_v56, 16  ;;  %v2377_v56 = vrot.slane %v2375_v44, 1 }
 0x18a   : > { %v1358_v29 = vpop.f32.mrb[82].mxu0  ;;  %v877_v60 = vpop.f32.mrb[82].mxu1  ;;  %v2893_v43 = vshrl.u32 %v6945_v15, 16  ;;  %v2897_v61 = vshll.u32 %v6964_v46, 16 }
 0x18b   : > { %v6955_v28 = vadd.f32 %v1358_v29, %v870_v58  ;;  %v5545_v34 = vpop.f32.mrb[83].mxu0  ;;  %v878_v7 = vadd.f32 %v877_v60, %v6680_v6  ;;  %v5479_v63 = vpop.f32.mrb[83].mxu1  ;;  %v2373_v51 = vor.u32 %v2371_v38, %v2369_v50  ;;  %v6984_v38 = vld [vmem:[%s6364_s30 + $0x48] sm:$0xff]   ;;  %v2381_v44 = vor.u32 %v2379_v33, %v2377_v56 }
 0x18c   : > { %v2895_v34 = vor.u32 %v2893_v43, %v2891_v2 }
 0x18d   : > { %5795 = vmatmul.mubr.msk.bf16.gmra.mrb[188].mxu0 %vm380_vm2, %v2884_v18  ;;  %5729 = vmatmul.mubr.msk.bf16.gmra.mrb[188].mxu1 %vm380_vm2, %v2370_v0  ;;  %v2899_v0 = vrot.slane %v2897_v61, 1  ;;  %v2387_v61 = vshrl.u32 %v6105_v45, 16 }
 0x18e   : > { %5798 = vmatprep.mubr.msk.bf16.mxu0 %vm6297_vm1, %v7906_v1  ;;  %5732 = vmatprep.mubr.msk.bf16.mxu1 %vm6297_vm1, %v7906_v1 }
 0x18f   : > { %v2900_v2 = vsel %vm1038_vm3, %v2895_v34, %v2899_v0 }
 0x190   : > { %v1363_v58 = vpop.f32.mrb[84].mxu0  ;;  %v882_v6 = vpop.f32.mrb[84].mxu1 }
 0x191   : > { %v6969_v12 = vadd.f32 %v1363_v58, %v875_v25  ;;  %v5548_v53 = vpop.f32.mrb[85].mxu0  ;;  %v883_v31 = vadd.f32 %v882_v6, %v6690_v10  ;;  %v5482_v17 = vpop.f32.mrb[85].mxu1  ;;  %v2378_v25 = vsel %vm1038_vm3, %v2373_v51, %v2377_v56 }
 0x192   : > { %v1366_v59 = vpop.f32.mrb[86].mxu0  ;;  %v885_v29 = vpop.f32.mrb[86].mxu1  ;;  %v2901_v17 = vshrl.u32 %v6964_v46, 16 }
 0x193   : > { %v6975_v50 = vadd.f32 %v1366_v59, %v878_v7  ;;  %v5549_v18 = vpop.f32.mrb[87].mxu0  ;;  %v886_v10 = vadd.f32 %v885_v29, %v6696_v16  ;;  %v5483_v60 = vpop.f32.mrb[87].mxu1  ;;  %v6107_v7 = vld [vmem:[%s6364_s30 + $0x170] sm:$0xff]   ;;  %v2905_v59 = vshll.u32 %v6984_v38, 16 }
 0x194   : > { %v2391_v29 = vshll.u32 %v6107_v7, 16  ;;  %v6109_v60 = vld [vmem:[%s6364_s30 + $0x178] sm:$0xff]  }
 0x195   : > { %5799 = vmatmul.mubr.msk.bf16.gmra.mrb[192].mxu0 %vm380_vm2, %v2892_v35  ;;  %5733 = vmatmul.mubr.msk.bf16.gmra.mrb[192].mxu1 %vm380_vm2, %v2378_v25  ;;  %v2903_v25 = vor.u32 %v2901_v17, %v2899_v0  ;;  %v2907_v33 = vrot.slane %v2905_v59, 1  ;;  %v2909_v17 = vshrl.u32 %v6984_v38, 16 }
 0x196   : > { %5802 = vmatprep.mubr.msk.bf16.mxu0 %vm6297_vm1, %v7906_v1  ;;  %5736 = vmatprep.mubr.msk.bf16.mxu1 %vm6297_vm1, %v7906_v1  ;;  %v2393_v45 = vrot.slane %v2391_v29, 1 }
 0x198   : > { %v1371_v63 = vpop.f32.mrb[88].mxu0  ;;  %v890_v16 = vpop.f32.mrb[88].mxu1 }
 0x199   : > { %v6989_v21 = vadd.f32 %v1371_v63, %v883_v31  ;;  %v5552_v51 = vpop.f32.mrb[89].mxu0  ;;  %v891_v58 = vadd.f32 %v890_v16, %v6706_v20  ;;  %v5486_v6 = vpop.f32.mrb[89].mxu1  ;;  %v2386_v31 = vsel %vm1038_vm3, %v2381_v44, %v2385_v5  ;;  %v3780_v44 = vrot.slane %v6964_v46, 1 }
 0x19a   : > { %v1374_v53 = vpop.f32.mrb[90].mxu0  ;;  %v893_v35 = vpop.f32.mrb[90].mxu1 }
 0x19b   : > { %v6995_v56 = vadd.f32 %v1374_v53, %v886_v10  ;;  %v5553_v43 = vpop.f32.mrb[91].mxu0  ;;  %v894_v20 = vadd.f32 %v893_v35, %v6712_v26  ;;  %v5487_v18 = vpop.f32.mrb[91].mxu1  ;;  %v2389_v10 = vor.u32 %v2387_v61, %v2385_v5  ;;  %v7905_v26 = vrot.slane %v6945_v15, 1 }
 0x19c   : > { %v2913_v5 = vshll.u32 %v7004_v32, 16 }
 0x19d   : > { %5803 = vmatmul.mubr.msk.bf16.gmra.mrb[196].mxu0 %vm380_vm2, %v2900_v2  ;;  %5737 = vmatmul.mubr.msk.bf16.gmra.mrb[196].mxu1 %vm380_vm2, %v2386_v31  ;;  %v2908_v2 = vsel %vm1038_vm3, %v2903_v25, %v2907_v33  ;;  %v2394_v46 = vsel %vm1038_vm3, %v2389_v10, %v2393_v45  ;;  %v2399_v31 = vshll.u32 %v6109_v60, 16  ;;  %v7025_v29 = vsel %vm3766_vm4, %v7905_v26, %v3780_v44  ;;  %v6111_v10 = vld [vmem:[%s6364_s30 + $0x180] sm:$0xff]  }
 0x19e   : > { %5806 = vmatprep.mubr.msk.bf16.mxu0 %vm6297_vm1, %v7906_v1  ;;  %5740 = vmatprep.mubr.msk.bf16.mxu1 %vm6297_vm1, %v7906_v1  ;;  %v2915_v18 = vrot.slane %v2913_v5, 1  ;;  %v2917_v5 = vshrl.u32 %v7004_v32, 16 }
 0x19f   : > { %v2401_v25 = vrot.slane %v2399_v31, 1  ;;  %v2407_v31 = vshll.u32 %v6111_v10, 16 }
 0x1a0   : > { %v1379_v34 = vpop.f32.mrb[92].mxu0  ;;  %v898_v63 = vpop.f32.mrb[92].mxu1 }
 0x1a1   : > { %v7011_v16 = vadd.f32 %v1379_v34, %v891_v58  ;;  %v5556_v51 = vpop.f32.mrb[93].mxu0  ;;  %v899_v0 = vadd.f32 %v898_v63, %v6722_v30  ;;  %v5490_v6 = vpop.f32.mrb[93].mxu1  ;;  %v2395_v58 = vshrl.u32 %v6107_v7, 16  ;;  %v7031_v7 = vld [vmem:[%s6364_s30 + $0x58] sm:$0xff]   ;;  %v3782_v63 = vrot.slane %v6984_v38, 1 }
 0x1a2   : > { %v1382_v53 = vpop.f32.mrb[94].mxu0  ;;  %v901_v59 = vpop.f32.mrb[94].mxu1 }
 0x1a3   : > { %v7017_v35 = vadd.f32 %v1382_v53, %v894_v20  ;;  %v5557_v43 = vpop.f32.mrb[95].mxu0  ;;  %v902_v30 = vadd.f32 %v901_v59, %v6728_v40  ;;  %v5491_v61 = vpop.f32.mrb[95].mxu1  ;;  %v2911_v20 = vor.u32 %v2909_v17, %v2907_v33  ;;  %v2397_v40 = vor.u32 %v2395_v58, %v2393_v45 }
 0x1a4   : > { %v2921_v45 = vshll.u32 %v7031_v7, 16 }
 0x1a5   : > { %5807 = vmatmul.mubr.msk.bf16.gmra.mrb[200].mxu0 %vm380_vm2, %v2908_v2  ;;  %5741 = vmatmul.mubr.msk.bf16.gmra.mrb[200].mxu1 %vm380_vm2, %v2394_v46  ;;  %v2916_v17 = vsel %vm1038_vm3, %v2911_v20, %v2915_v18  ;;  %v2402_v38 = vsel %vm1038_vm3, %v2397_v40, %v2401_v25  ;;  %v7049_v20 = vsel %vm3766_vm4, %v3780_v44, %v3782_v63  ;;  %v6113_v40 = vld [vmem:[%s6364_s30 + $0x188] sm:$0xff]  }
 0x1a6   : > { %5810 = vmatprep.mubr.msk.bf16.mxu0 %vm6297_vm1, %v7906_v1  ;;  %5744 = vmatprep.mubr.msk.bf16.mxu1 %vm6297_vm1, %v7906_v1 }
 0x1a8   : > { %v1387_v34 = vpop.f32.mrb[96].mxu0  ;;  %v906_v51 = vpop.f32.mrb[96].mxu1 }
 0x1a9   : > { %v7037_v6 = vadd.f32 %v1387_v34, %v899_v0  ;;  %v5560_v53 = vpop.f32.mrb[97].mxu0  ;;  %v907_v2 = vadd.f32 %v906_v51, %v6738_v47  ;;  %v5494_v59 = vpop.f32.mrb[97].mxu1  ;;  %v2403_v0 = vshrl.u32 %v6109_v60, 16  ;;  %v2923_v34 = vrot.slane %v2921_v45, 1  ;;  %v7055_v51 = vld [vmem:[%s6364_s30 + $0x60] sm:$0xff]  }
 0x1aa   : > { %v1390_v33 = vpop.f32.mrb[98].mxu0  ;;  %v909_v43 = vpop.f32.mrb[98].mxu1  ;;  %v3784_v59 = vrot.slane %v7004_v32, 1  ;;  %v2925_v45 = vshrl.u32 %v7031_v7, 16 }
 0x1ab   : > { %v7043_v46 = vadd.f32 %v1390_v33, %v902_v30  ;;  %v5561_v58 = vpop.f32.mrb[99].mxu0  ;;  %v910_v47 = vadd.f32 %v909_v43, %v6744_v57  ;;  %v5495_v61 = vpop.f32.mrb[99].mxu1  ;;  %v2919_v30 = vor.u32 %v2917_v5, %v2915_v18  ;;  %v2405_v60 = vor.u32 %v2403_v0, %v2401_v25 }
 0x1ac   : > { %v2409_v57 = vrot.slane %v2407_v31, 1  ;;  %v2929_v25 = vshll.u32 %v7055_v51, 16  ;;  %v2415_v61 = vshll.u32 %v6113_v40, 16 }
 0x1ad   : > { %5811 = vmatmul.mubr.msk.bf16.gmra.mrb[204].mxu0 %vm380_vm2, %v2916_v17  ;;  %5745 = vmatmul.mubr.msk.bf16.gmra.mrb[204].mxu1 %vm380_vm2, %v2402_v38  ;;  %v2924_v5 = vsel %vm1038_vm3, %v2919_v30, %v2923_v34  ;;  %v7073_v30 = vsel %vm3766_vm4, %v3782_v63, %v3784_v59 }
 0x1ae   : > { %5814 = vmatprep.mubr.msk.bf16.mxu0 %vm6297_vm1, %v7906_v1  ;;  %5748 = vmatprep.mubr.msk.bf16.mxu1 %vm6297_vm1, %v7906_v1  ;;  %v2410_v32 = vsel %vm1038_vm3, %v2405_v60, %v2409_v57  ;;  %v6115_v60 = vld [vmem:[%s6364_s30 + $0x190] sm:$0xff]  }
 0x1b0   : > { %v1395_v53 = vpop.f32.mrb[100].mxu0  ;;  %v1646_v33 = vpop.f32.mrb[100].mxu1 }
 0x1b1   : > { %v7061_v44 = vadd.f32 %v1395_v53, %v907_v2  ;;  %v5564_v17 = vpop.f32.mrb[101].mxu0  ;;  %v1781_v43 = vadd.f32 %v1646_v33, %v6767_v23  ;;  %v5570_v58 = vpop.f32.mrb[101].mxu1  ;;  %v2411_v2 = vshrl.u32 %v6111_v10, 16  ;;  %v2931_v33 = vrot.slane %v2929_v25, 1 }
 0x1b2   : > { %v1398_v18 = vpop.f32.mrb[102].mxu0  ;;  %v1649_v0 = vpop.f32.mrb[102].mxu1  ;;  %v7079_v17 = vld [vmem:[%s6364_s30 + $0x68] sm:$0xff]   ;;  %v2933_v25 = vshrl.u32 %v7055_v51, 16 }
 0x1b3   : > { %v7067_v38 = vadd.f32 %v1398_v18, %v910_v47  ;;  %v5565_v31 = vpop.f32.mrb[103].mxu0  ;;  %v1782_v23 = vadd.f32 %v1649_v0, %v6771_v36  ;;  %v5571_v53 = vpop.f32.mrb[103].mxu1  ;;  %v2927_v47 = vor.u32 %v2925_v45, %v2923_v34  ;;  %v2413_v10 = vor.u32 %v2411_v2, %v2409_v57 }
 0x1b4   : > { %v2417_v36 = vrot.slane %v2415_v61, 1  ;;  %v3786_v18 = vrot.slane %v7031_v7, 1  ;;  %v2937_v57 = vshll.u32 %v7079_v17, 16 }
 0x1b5   : > { %5815 = vmatmul.mubr.msk.bf16.gmra.mrb[208].mxu0 %vm380_vm2, %v2924_v5  ;;  %5749 = vmatmul.mubr.msk.bf16.gmra.mrb[208].mxu1 %vm380_vm2, %v2410_v32  ;;  %v2932_v45 = vsel %vm1038_vm3, %v2927_v47, %v2931_v33 }
 0x1b6   : > { %5818 = vmatprep.mubr.msk.bf16.mxu0 %vm6297_vm1, %v7906_v1  ;;  %5752 = vmatprep.mubr.msk.bf16.mxu1 %vm6297_vm1, %v7906_v1  ;;  %v2418_v7 = vsel %vm1038_vm3, %v2413_v10, %v2417_v36  ;;  %v7097_v47 = vsel %vm3766_vm4, %v3784_v59, %v3786_v18  ;;  %v6117_v10 = vld [vmem:[%s6364_s30 + $0x198] sm:$0xff]  }
 0x1b8   : > { %v2025_v58 = vpop.f32.mrb[104].mxu0  ;;  %v1654_v63 = vpop.f32.mrb[104].mxu1 }
 0x1b9   : > { %v7085_v5 = vadd.f32 %v2025_v58, %v1781_v43  ;;  %v5640_v0 = vpop.f32.mrb[105].mxu0  ;;  %v1783_v31 = vadd.f32 %v1654_v63, %v6781_v52  ;;  %v5574_v32 = vpop.f32.mrb[105].mxu1  ;;  %v2419_v43 = vshrl.u32 %v6113_v40, 16  ;;  %v2423_v58 = vshll.u32 %v6115_v60, 16 }
 0x1ba   : > { %v2028_v34 = vpop.f32.mrb[106].mxu0  ;;  %v1657_v2 = vpop.f32.mrb[106].mxu1  ;;  %v2939_v0 = vrot.slane %v2937_v57, 1  ;;  %v7103_v32 = vld [vmem:[%s6364_s30 + $0x70] sm:$0xff]   ;;  %v2941_v57 = vshrl.u32 %v7079_v17, 16 }
 0x1bb   : > { %v7091_v61 = vadd.f32 %v2028_v34, %v1782_v23  ;;  %v5641_v53 = vpop.f32.mrb[107].mxu0  ;;  %v1784_v52 = vadd.f32 %v1657_v2, %v6785_v3  ;;  %v5575_v63 = vpop.f32.mrb[107].mxu1  ;;  %v2935_v23 = vor.u32 %v2933_v25, %v2931_v33  ;;  %v2421_v40 = vor.u32 %v2419_v43, %v2417_v36 }
 0x1bc   : > { %v2425_v3 = vrot.slane %v2423_v58, 1  ;;  %v2945_v36 = vshll.u32 %v7103_v32, 16 }
 0x1bd   : > { %5819 = vmatmul.mubr.msk.bf16.gmra.mrb[212].mxu0 %vm380_vm2, %v2932_v45  ;;  %5753 = vmatmul.mubr.msk.bf16.gmra.mrb[212].mxu1 %vm380_vm2, %v2418_v7  ;;  %v3788_v45 = vrot.slane %v7055_v51, 1  ;;  %v2940_v25 = vsel %vm1038_vm3, %v2935_v23, %v2939_v0 }
 0x1be   : > { %5822 = vmatprep.mubr.msk.bf16.mxu0 %vm6297_vm1, %v7906_v1  ;;  %5756 = vmatprep.mubr.msk.bf16.mxu1 %vm6297_vm1, %v7906_v1  ;;  %v2426_v51 = vsel %vm1038_vm3, %v2421_v40, %v2425_v3  ;;  %v6119_v40 = vld [vmem:[%s6364_s30 + $0x1a0] sm:$0xff]  }
 0x1bf   : > { %v7121_v23 = vsel %vm3766_vm4, %v3786_v18, %v3788_v45 }
 0x1c0   : > { %v2033_v34 = vpop.f32.mrb[108].mxu0  ;;  %v1662_v59 = vpop.f32.mrb[108].mxu1 }
 0x1c1   : > { %v7109_v2 = vadd.f32 %v2033_v34, %v1783_v31  ;;  %v5644_v53 = vpop.f32.mrb[109].mxu0  ;;  %v1785_v7 = vadd.f32 %v1662_v59, %v6795_v14  ;;  %v5578_v63 = vpop.f32.mrb[109].mxu1  ;;  %v2427_v31 = vshrl.u32 %v6115_v60, 16  ;;  %v2431_v34 = vshll.u32 %v6117_v10, 16 }
 0x1c2   : > { %v2036_v33 = vpop.f32.mrb[110].mxu0  ;;  %v1665_v43 = vpop.f32.mrb[110].mxu1  ;;  %v7127_v53 = vld [vmem:[%s6364_s30 + $0x78] sm:$0xff]  }
 0x1c3   : > { %v7115_v58 = vadd.f32 %v2036_v33, %v1784_v52  ;;  %v5645_v26 = vpop.f32.mrb[111].mxu0  ;;  %v1786_v14 = vadd.f32 %v1665_v43, %v6799_v24  ;;  %v5579_v59 = vpop.f32.mrb[111].mxu1  ;;  %v2943_v52 = vor.u32 %v2941_v57, %v2939_v0  ;;  %v2429_v60 = vor.u32 %v2427_v31, %v2425_v3 }
 0x1c4   : > { %v2947_v26 = vrot.slane %v2945_v36, 1  ;;  %v2433_v24 = vrot.slane %v2431_v34, 1  ;;  %v3790_v33 = vrot.slane %v7079_v17, 1  ;;  %v2949_v36 = vshrl.u32 %v7103_v32, 16 }
 0x1c5   : > { %5823 = vmatmul.mubr.msk.bf16.gmra.mrb[216].mxu0 %vm380_vm2, %v2940_v25  ;;  %5757 = vmatmul.mubr.msk.bf16.gmra.mrb[216].mxu1 %vm380_vm2, %v2426_v51  ;;  %v2953_v3 = vshll.u32 %v7127_v53, 16 }
 0x1c6   : > { %5826 = vmatprep.mubr.msk.bf16.mxu0 %vm6297_vm1, %v7906_v1  ;;  %5760 = vmatprep.mubr.msk.bf16.mxu1 %vm6297_vm1, %v7906_v1  ;;  %v2948_v57 = vsel %vm1038_vm3, %v2943_v52, %v2947_v26  ;;  %v2434_v17 = vsel %vm1038_vm3, %v2429_v60, %v2433_v24  ;;  %v7145_v52 = vsel %vm3766_vm4, %v3788_v45, %v3790_v33  ;;  %v6121_v60 = vld [vmem:[%s6364_s30 + $0x1a8] sm:$0xff]  }
 0x1c7   : > { %7908 = vst [vmem:[#allocation3_spill] sm:$0xff] %v7145_v52  ;;  %v2957_v52 = vshrl.u32 %v7127_v53, 16 }
 0x1c8   : > { %v2041_v63 = vpop.f32.mrb[112].mxu0  ;;  %v1670_v18 = vpop.f32.mrb[112].mxu1 }
 0x1c9   : > { %v7133_v25 = vadd.f32 %v2041_v63, %v1785_v7  ;;  %v5648_v43 = vpop.f32.mrb[113].mxu0  ;;  %v1787_v51 = vadd.f32 %v1670_v18, %v6809_v37  ;;  %v5582_v59 = vpop.f32.mrb[113].mxu1  ;;  %v2435_v7 = vshrl.u32 %v6117_v10, 16  ;;  %v2439_v63 = vshll.u32 %v6119_v40, 16 }
 0x1ca   : > { %v2044_v0 = vpop.f32.mrb[114].mxu0  ;;  %v1673_v31 = vpop.f32.mrb[114].mxu1  ;;  %v7909_v43 = vmov 0.0   ;;  %v7151_v59 = vld [vmem:[%s6364_s30 + $0x80] sm:$0xff]  }
 0x1cb   : > { %v7139_v34 = vadd.f32 %v2044_v0, %v1786_v14  ;;  %v5649_v1 = vpop.f32.mrb[115].mxu0  ;;  %v1788_v37 = vadd.f32 %v1673_v31, %v6813_v54  ;;  %v5583_v18 = vpop.f32.mrb[115].mxu1  ;;  %v2951_v14 = vor.u32 %v2949_v36, %v2947_v26  ;;  %v2437_v10 = vor.u32 %v2435_v7, %v2433_v24 }
 0x1cc   : > { %v2955_v1 = vrot.slane %v2953_v3, 1  ;;  %v2441_v54 = vrot.slane %v2439_v63, 1  ;;  %v2961_v24 = vshll.u32 %v7151_v59, 16 }
 0x1cd   : > { %5827 = vmatmul.mubr.msk.bf16.gmra.mrb[220].mxu0 %vm380_vm2, %v2948_v57  ;;  %5761 = vmatmul.mubr.msk.bf16.gmra.mrb[220].mxu1 %vm380_vm2, %v2434_v17  ;;  %v3792_v57 = vrot.slane %v7103_v32, 1 }
 0x1ce   : > { %5830 = vmatprep.mubr.msk.bf16.mxu0 %vm6297_vm1, %v7909_v43  ;;  %5764 = vmatprep.mubr.msk.bf16.mxu1 %vm6297_vm1, %v7909_v43  ;;  %v2956_v3 = vsel %vm1038_vm3, %v2951_v14, %v2955_v1 }
 0x1cf   : > { %v7170_v14 = vsel %vm3766_vm4, %v3790_v33, %v3792_v57 }
 0x1d0   : > { %v2049_v0 = vpop.f32.mrb[116].mxu0  ;;  %v1678_v45 = vpop.f32.mrb[116].mxu1  ;;  %7912 = vst [vmem:[#allocation6_spill] sm:$0xff] %v7170_v14 }
 0x1d1   : > { %v7157_v31 = vadd.f32 %v2049_v0, %v1787_v51  ;;  %v5652_v17 = vpop.f32.mrb[117].mxu0  ;;  %v1789_v18 = vadd.f32 %v1678_v45, %v6822_v62  ;;  %v5586_v26 = vpop.f32.mrb[117].mxu1  ;;  %v2442_v51 = vsel %vm1038_vm3, %v2437_v10, %v2441_v54  ;;  %v2443_v0 = vshrl.u32 %v6119_v40, 16  ;;  %v6123_v45 = vld [vmem:[%s6364_s30 + $0x1b0] ss:$0 sps:$4 sm:$0x11]  }
 0x1d2   : > { %v2052_v36 = vpop.f32.mrb[118].mxu0  ;;  %v1681_v7 = vpop.f32.mrb[118].mxu1  ;;  %v2447_v17 = vshll.u32 %v6121_v60, 16  ;;  %v2963_v26 = vrot.slane %v2961_v24, 1 }
 0x1d3   : > { %7910 = vst [vmem:[#allocation4_spill] sm:$0xff] %v7157_v31  ;;  %v7163_v63 = vadd.f32 %v2052_v36, %v1788_v37  ;;  %v5653_v32 = vpop.f32.mrb[119].mxu0  ;;  %v1790_v31 = vadd.f32 %v1681_v7, %v6827_v13  ;;  %v5587_v62 = vpop.f32.mrb[119].mxu1  ;;  %v2959_v37 = vor.u32 %v2957_v52, %v2955_v1  ;;  %v7176_v36 = vld [vmem:[%s6364_s30 + $0x88] sm:$0xff]   ;;  %v2445_v13 = vor.u32 %v2443_v0, %v2441_v54 }
 0x1d4   : > { %v2449_v40 = vrot.slane %v2447_v17, 1  ;;  %v2455_v62 = vshll.u32 %v6123_v45, 16  ;;  %v2969_v54 = vshll.u32 %v7176_v36, 16 }
 0x1d5   : > { %7911 = vst [vmem:[#allocation5_spill] sm:$0xff] %v7163_v63  ;;  %5831 = vmatmul.mubr.msk.bf16.gmra.mrb[224].mxu0 %vm380_vm2, %v2956_v3  ;;  %5765 = vmatmul.mubr.msk.bf16.gmra.mrb[224].mxu1 %vm380_vm2, %v2442_v51  ;;  %v3794_v3 = vrot.slane %v7127_v53, 1  ;;  %v2451_v51 = vshrl.u32 %v6121_v60, 16  ;;  %v2964_v14 = vsel %vm1038_vm3, %v2959_v37, %v2963_v26  ;;  %v2965_v63 = vshrl.u32 %v7151_v59, 16  ;;  %v6126_v60 = vld [vmem:[%s6364_s30 + $0x9c] sm:$0xff]  }
 0x1d6   : > { %5834 = vmatprep.mubr.msk.bf16.mxu0 %vm6297_vm1, %v7909_v43  ;;  %5768 = vmatprep.mubr.msk.bf16.mxu1 %vm6297_vm1, %v7909_v43  ;;  %v2450_v17 = vsel %vm1038_vm3, %v2445_v13, %v2449_v40  ;;  %v2457_v37 = vrot.slane %v2455_v62, 1 }
 0x1d8   : > { %v2057_v10 = vpop.f32.mrb[120].mxu0  ;;  %v1686_v33 = vpop.f32.mrb[120].mxu1 }
 0x1d9   : > { %v7181_v7 = vadd.f32 %v2057_v10, %v1789_v18  ;;  %v5656_v32 = vpop.f32.mrb[121].mxu0  ;;  %v1791_v52 = vadd.f32 %v1686_v33, %v6840_v27  ;;  %v5590_v1 = vpop.f32.mrb[121].mxu1  ;;  %v2453_v10 = vor.u32 %v2451_v51, %v2449_v40  ;;  %v7194_v33 = vsel %vm3766_vm4, %v3792_v57, %v3794_v3 }
 0x1da   : > { %v2060_v24 = vpop.f32.mrb[122].mxu0  ;;  %v1689_v0 = vpop.f32.mrb[122].mxu1  ;;  %7913 = vst [vmem:[#allocation7_spill] sm:$0xff] %v7194_v33  ;;  %v2971_v32 = vrot.slane %v2969_v54, 1  ;;  %v3796_v40 = vrot.slane %v7151_v59, 1 }
 0x1db   : > { %v7187_v53 = vadd.f32 %v2060_v24, %v1790_v31  ;;  %v5657_v18 = vpop.f32.mrb[123].mxu0  ;;  %v1792_v45 = vadd.f32 %v1689_v0, %v6845_v48  ;;  %v5591_v27 = vpop.f32.mrb[123].mxu1  ;;  %v2967_v31 = vor.u32 %v2965_v63, %v2963_v26  ;;  %v7200_v1 = vld [vmem:[%s6364_s30 + $0x90] ss:$0 sps:$4 sm:$0x11]   ;;  %v7205_v48 = vld [vmem:[%s6364_s30 + $0xa4] sm:$0xff]   ;;  %v2458_v24 = vsel %vm1038_vm3, %v2453_v10, %v2457_v37 }
 0x1dc   : > { %v2973_v18 = vshrl.u32 %v7176_v36, 16  ;;  %v3371_v10 = vshll.u32 %v7205_v48, 16 }
 0x1dd   : > { %5835 = vmatmul.mubr.msk.bf16.gmra.mrb[228].mxu0 %vm380_vm2, %v2964_v14  ;;  %5769 = vmatmul.mubr.msk.bf16.gmra.mrb[228].mxu1 %vm380_vm2, %v2450_v17  ;;  %v3366_v14 = vshll.u32 %v6126_v60, 16  ;;  %v2972_v0 = vsel %vm1038_vm3, %v2967_v31, %v2971_v32  ;;  %v2977_v17 = vshll.u32 %v7200_v1, 16  ;;  %v7221_v31 = vsel %vm3766_vm4, %v3794_v3, %v3796_v40  ;;  %v3760_v3 = vld [vmem:[%s6364_s30 + $0x8] sm:$0xe] }
 0x1de   : > { %5838 = vmatprep.mubr.msk.bf16.mxu0 %vm6297_vm1, %v7909_v43  ;;  %5772 = vmatprep.mubr.msk.bf16.mxu1 %vm6297_vm1, %v7909_v43  ;;  %7914 = vst [vmem:[#allocation8_spill] sm:$0xff] %v7221_v31 }
 0x1e0   : > { %v2065_v13 = vpop.f32.mrb[124].mxu0  ;;  %v1694_v57 = vpop.f32.mrb[124].mxu1 }
 0x1e1   : > { %v7208_v51 = vadd.f32 %v2065_v13, %v1791_v52  ;;  %v5660_v62 = vpop.f32.mrb[125].mxu0  ;;  %v1793_v63 = vadd.f32 %v1694_v57, %v6859_v55  ;;  %v5594_v26 = vpop.f32.mrb[125].mxu1  ;;  %v3364_v52 = vshrl.u32 %v6126_v60, 16  ;;  %v3368_v13 = vrot.slane %v3366_v14, 1  ;;  %v4336_v60 = vld [vmem:[%s7902_s3] sm:$0xff] }
 0x1e2   : > { %v2068_v54 = vpop.f32.mrb[126].mxu0  ;;  %v1697_v27 = vpop.f32.mrb[126].mxu1  ;;  %v2979_v57 = vrot.slane %v2977_v17, 1  ;;  %v3373_v14 = vrot.slane %v3371_v10, 1  ;;  %v7232_v62 = vld [vmem:[%s6364_s30 + $0xac] sm:$0xff]   ;;  %v6298_v26 = vmov 0  }
 0x1e3   : > { %v7215_v33 = vadd.f32 %v2068_v54, %v1792_v45  ;;  %v5661_v59 = vpop.f32.mrb[127].mxu0  ;;  %v1794_v55 = vadd.f32 %v1697_v27, %v6866_v41  ;;  %v5595_v37 = vpop.f32.mrb[127].mxu1  ;;  %v2975_v45 = vor.u32 %v2973_v18, %v2971_v32  ;;  %v3369_v41 = vor.u32 %v3368_v13, %v3364_v52  ;;  %6002 = vset.pattern.permute.xlu0 %v6298_v26  ;;  %v6281_v13 = vld [vmem:[%s6364_s30 + $0xc] sm:$0xf] }
 0x1e4   : > { %4372 = vperm.xlu0 %6002, %v4336_v60   ;;  %6003 = vset.pattern.permute.xlu1 %v6298_v26  ;;  %v3798_v32 = vrot.slane %v7176_v36, 1  ;;  %v5139_v10 = vcombine.low %v3760_v3, %v6281_v13  ;;  %v3375_v36 = vshrl.u32 %v7205_v48, 16  ;;  %v6282_v3 = vld [vmem:[%s6364_s30 + $0x10] sm:$0xff]  }
 0x1e5   : > { %5839 = vmatmul.mubr.msk.bf16.gmra.mrb[232].mxu0 %vm380_vm2, %v2972_v0  ;;  %5773 = vmatmul.mubr.msk.bf16.gmra.mrb[232].mxu1 %vm380_vm2, %v2458_v24  ;;  %v2980_v52 = vsel %vm1038_vm3, %v2975_v45, %v2979_v57  ;;  %v3374_v26 = vsel %vm1038_vm3, %v3369_v41, %v3373_v14  ;;  %v4337_v45 = vld [vmem:[%s7902_s3 + $0x8] sm:$0xff] }
 0x1e6   : > { %5842 = vmatprep.mubr.msk.bf16.mxu0 %vm6297_vm1, %v7909_v43  ;;  %5848 = vmatprep.mubr.msk.bf16.mxu1 %vm6297_vm1, %v7909_v43  ;;  %v7255_v48 = vsel %vm3766_vm4, %v3796_v40, %v3798_v32  ;;  %v3767_v41 = vrot.slane %v5139_v10, 1  ;;  %v3377_v40 = vor.u32 %v3375_v36, %v3373_v14 }
 0x1e8   : > { %v2073_v24 = vpop.f32.mrb[128].mxu0  ;;  %v1702_v54 = vpop.f32.mrb[128].mxu1  ;;  %4377 = vperm.xlu0 %6002, %v4337_v45  }
 0x1e9   : > { %v7236_v0 = vadd.f32 %v2073_v24, %v1793_v63  ;;  %v5664_v18 = vpop.f32.mrb[129].mxu0  ;;  %v1795_v17 = vadd.f32 %v1702_v54, %v6882_v9  ;;  %v5598_v27 = vpop.f32.mrb[129].mxu1  ;;  %v3379_v63 = vshll.u32 %v7232_v62, 16  ;;  %v4338_v9 = vld [vmem:[%s7902_s3 + $0x10] sm:$0xff]  ;;  %v3768_v24 = vrot.slane %v6282_v3, 1  ;;  %v4340_v54 = vld [vmem:[%s7902_s3 + $0x20] sm:$0xff] }
 0x1ea   : > { %v2076_v59 = vpop.f32.mrb[130].mxu0  ;;  %v1705_v37 = vpop.f32.mrb[130].mxu1  ;;  %4382 = vperm.xlu1 %6003, %v4338_v9   ;;  %v7270_v27 = vld [vmem:[%s6364_s30 + $0xb4] sm:$0xff]  }
 0x1eb   : > { %v7241_v31 = vadd.f32 %v2076_v59, %v1794_v55  ;;  %v5665_v60 = vpop.f32.mrb[131].mxu0  ;;  %v1796_v57 = vadd.f32 %v1705_v37, %v6887_v22  ;;  %v5599_v55 = vpop.f32.mrb[131].mxu1  ;;  %v4339_v22 = vld [vmem:[%s7902_s3 + $0x18] sm:$0xff]  ;;  %v3381_v18 = vrot.slane %v3379_v63, 1  ;;  %v3800_v59 = vrot.slane %v7200_v1, 1 }
 0x1ec   : > { %4392 = vperm.xlu0 %6002, %v4340_v54   ;;  %v3769_v45 = vsel %vm3766_vm4, %v3767_v41, %v3768_v24  ;;  %v3383_v63 = vshrl.u32 %v7232_v62, 16  ;;  %v3387_v3 = vshll.u32 %v7270_v27, 16  ;;  %v4343_v62 = vld [vmem:[%s7902_s3 + $0x38] sm:$0xff]  ;;  %v4344_v54 = vld [vmem:[%s7902_s3 + $0x40] sm:$0xff] }
 0x1ed   : > { %5843 = vmatmul.mubr.msk.bf16.gmra.mrb[236].mxu0 %vm380_vm2, %v2980_v52  ;;  %5849 = vmatmul.mubr.msk.bf16.vlgmr.msra.gmra.mrb[236].mxu1 %vm380_vm2, %v3374_v26  ;;  %v3382_v1 = vsel %vm1038_vm3, %v3377_v40, %v3381_v18 }
 0x1ee   : > { %5918 = vmatprep.mubr.msk.bf16.mxu0 %vm6297_vm1, %v7909_v43  ;;  %5852 = vmatprep.mubr.msk.bf16.mxu1 %vm6297_vm1, %v7909_v43 }
 0x1ef   : > { %4387 = vperm.xlu1 %6003, %v4339_v22   ;;  %v7290_v22 = vsel %vm3766_vm4, %v3798_v32, %v3800_v59  ;;  %v3385_v32 = vor.u32 %v3383_v63, %v3381_v18  ;;  %v3389_v59 = vrot.slane %v3387_v3, 1  ;;  %v3391_v3 = vshrl.u32 %v7270_v27, 16  ;;  %v4347_v27 = vld [vmem:[%s7902_s3 + $0x58] sm:$0xff] }
 0x1f0   : > { %v2081_v52 = vpop.f32.mrb[132].mxu0  ;;  %v1710_v13 = vpop.f32.mrb[132].mxu1 }
 0x1f1   : > { %v7273_v10 = vadd.f32 %v2081_v52, %v1795_v17  ;;  %v5668_v37 = vpop.f32.mrb[133].mxu0  ;;  %v1797_v60 = vadd.f32 %v1710_v13, %v6900_v42  ;;  %v5602_v26 = vpop.f32.mrb[133].mxu1  ;;  %v4341_v17 = vld [vmem:[%s7902_s3 + $0x28] sm:$0xff]  ;;  %v4342_v42 = vld [vmem:[%s7902_s3 + $0x30] sm:$0xff]  ;;  %v7306_v52 = vld [vmem:[%s6364_s30 + $0xbc] sm:$0xff]   ;;  %v3390_v63 = vsel %vm1038_vm3, %v3385_v32, %v3389_v59 }
 0x1f2   : > { %v2084_v9 = vpop.f32.mrb[134].mxu0  ;;  %v1713_v55 = vpop.f32.mrb[134].mxu1  ;;  %4402 = vperm.xlu0 %6002, %v4342_v42  }
 0x1f3   : > { %v7277_v14 = vadd.f32 %v2084_v9, %v1796_v57  ;;  %v5669_v36 = vpop.f32.mrb[135].mxu0  ;;  %v1798_v57 = vadd.f32 %v1713_v55, %v6904_v19  ;;  %v5603_v41 = vpop.f32.mrb[135].mxu1  ;;  %4397 = vperm.xlu1 %6003, %v4341_v17   ;;  %v6283_v19 = vld [vmem:[%s6364_s30 + $0x18] sm:$0xff]  }
 0x1f4   : > { %v3770_v40 = vrot.slane %v6283_v19, 1  ;;  %v3395_v41 = vshll.u32 %v7306_v52, 16  ;;  %v3393_v19 = vor.u32 %v3391_v3, %v3389_v59 }
 0x1f5   : > { %5919 = vmatmul.mubr.msk.bf16.vlgmr.msra.gmra.mrb[240].mxu0 %vm380_vm2, %v3769_v45  ;;  %5853 = vmatmul.mubr.msk.bf16.gmra.mrb[240].mxu1 %vm380_vm2, %v3382_v1 }
 0x1f6   : > { %5922 = vmatprep.mubr.msk.bf16.mxu0 %vm6297_vm1, %v7909_v43  ;;  %5856 = vmatprep.mubr.msk.bf16.mxu1 %vm6297_vm1, %v7909_v43  ;;  %v3771_v1 = vsel %vm3766_vm4, %v3768_v24, %v3770_v40  ;;  %v3397_v32 = vrot.slane %v3395_v41, 1  ;;  %v3399_v41 = vshrl.u32 %v7306_v52, 16  ;;  %v4351_v52 = vld [vmem:[%s7902_s3 + $0x78] sm:$0xff] }
 0x1f7   : > { %4407 = vperm.xlu1 %6003, %v4343_v62   ;;  %4412 = vperm.xlu0 %6002, %v4344_v54   ;;  %v4348_v62 = vld [vmem:[%s7902_s3 + $0x60] sm:$0xff] }
 0x1f8   : > { %v2089_v13 = vpop.f32.mrb[136].mxu0  ;;  %v1718_v37 = vpop.f32.mrb[136].mxu1  ;;  %v6284_v54 = vld [vmem:[%s6364_s30 + $0x20] sm:$0xff]   ;;  %v3398_v3 = vsel %vm1038_vm3, %v3393_v19, %v3397_v32  ;;  %v3401_v19 = vor.u32 %v3399_v41, %v3397_v32 }
 0x1f9   : > { %v7308_v26 = vadd.f32 %v2089_v13, %v1797_v60  ;;  %v5672_v9 = vpop.f32.mrb[137].mxu0  ;;  %v1799_v45 = vadd.f32 %v1718_v37, %v6916_v39  ;;  %v5606_v55 = vpop.f32.mrb[137].mxu1  ;;  %v4345_v60 = vld [vmem:[%s7902_s3 + $0x48] sm:$0xff]  ;;  %v4346_v39 = vld [vmem:[%s7902_s3 + $0x50] sm:$0xff] }
 0x1fa   : > { %v2092_v36 = vpop.f32.mrb[138].mxu0  ;;  %v1721_v17 = vpop.f32.mrb[138].mxu1  ;;  %v7338_v13 = vld [vmem:[%s6364_s30 + $0xc4] sm:$0xff]  }
 0x1fb   : > { %v7312_v42 = vadd.f32 %v2092_v36, %v1798_v57  ;;  %v5673_v18 = vpop.f32.mrb[139].mxu0  ;;  %v1800_v24 = vadd.f32 %v1721_v17, %v6920_v11  ;;  %v5607_v57 = vpop.f32.mrb[139].mxu1  ;;  %4417 = vperm.xlu1 %6003, %v4345_v60   ;;  %4422 = vperm.xlu0 %6002, %v4346_v39   ;;  %v3772_v11 = vrot.slane %v6284_v54, 1  ;;  %v7370_v54 = vld [vmem:[%s6364_s30 + $0xcc] sm:$0xff]   ;;  %v3407_v41 = vshrl.u32 %v7338_v13, 16 }
 0x1fd   : > { %5923 = vmatmul.mubr.msk.bf16.gmra.mrb[244].mxu0 %vm380_vm2, %v3771_v1  ;;  %5857 = vmatmul.mubr.msk.bf16.gmra.mrb[244].mxu1 %vm380_vm2, %v3390_v63  ;;  %v3773_v63 = vsel %vm3766_vm4, %v3770_v40, %v3772_v11  ;;  %v4350_v40 = vld [vmem:[%s7902_s3 + $0x70] sm:$0xff] }
 0x1fe   : > { %5926 = vmatprep.mubr.msk.bf16.mxu0 %vm6297_vm1, %v7909_v43  ;;  %5860 = vmatprep.mubr.msk.bf16.mxu1 %vm6297_vm1, %v7909_v43 }
 0x1ff   : > { %4427 = vperm.xlu1 %6003, %v4347_v27   ;;  %4432 = vperm.xlu0 %6002, %v4348_v62   ;;  %v4352_v27 = vld [vmem:[%s7902_s3 + $0x80] sm:$0xff]  ;;  %v6285_v62 = vld [vmem:[%s6364_s30 + $0x28] sm:$0xff]  }
 0x200   : > { %v2097_v37 = vpop.f32.mrb[140].mxu0  ;;  %v1726_v9 = vpop.f32.mrb[140].mxu1 }
 0x201   : > { %v7340_v55 = vadd.f32 %v2097_v37, %v1799_v45  ;;  %v5676_v36 = vpop.f32.mrb[141].mxu0  ;;  %v1801_v1 = vadd.f32 %v1726_v9, %v6932_v49  ;;  %v5610_v17 = vpop.f32.mrb[141].mxu1  ;;  %v3403_v45 = vshll.u32 %v7338_v13, 16  ;;  %v4349_v49 = vld [vmem:[%s7902_s3 + $0x68] sm:$0xff]  ;;  %v4355_v13 = vld [vmem:[%s7902_s3 + $0x98] sm:$0xff] }
 0x202   : > { %v2100_v18 = vpop.f32.mrb[142].mxu0  ;;  %v1729_v60 = vpop.f32.mrb[142].mxu1 }
 0x203   : > { %v7344_v39 = vadd.f32 %v2100_v18, %v1800_v24  ;;  %v5677_v59 = vpop.f32.mrb[143].mxu0  ;;  %v1802_v24 = vadd.f32 %v1729_v60, %v6936_v4  ;;  %v5611_v57 = vpop.f32.mrb[143].mxu1  ;;  %4437 = vperm.xlu1 %6003, %v4349_v49   ;;  %4442 = vperm.xlu0 %6002, %v4350_v40   ;;  %v3774_v4 = vrot.slane %v6285_v62, 1  ;;  %v3405_v37 = vrot.slane %v3403_v45, 1 }
 0x204   : > { %v3411_v45 = vshll.u32 %v7370_v54, 16 }
 0x205   : > { %5927 = vmatmul.mubr.msk.bf16.gmra.mrb[248].mxu0 %vm380_vm2, %v3773_v63  ;;  %5861 = vmatmul.mubr.msk.bf16.gmra.mrb[248].mxu1 %vm380_vm2, %v3398_v3  ;;  %v3775_v3 = vsel %vm3766_vm4, %v3772_v11, %v3774_v4  ;;  %v3406_v32 = vsel %vm1038_vm3, %v3401_v19, %v3405_v37 }
 0x206   : > { %5930 = vmatprep.mubr.msk.bf16.mxu0 %vm6297_vm1, %v7909_v43  ;;  %5864 = vmatprep.mubr.msk.bf16.mxu1 %vm6297_vm1, %v7909_v43  ;;  %v3413_v19 = vrot.slane %v3411_v45, 1 }
 0x207   : > { %4447 = vperm.xlu1 %6003, %v4351_v52   ;;  %4452 = vperm.xlu0 %6002, %v4352_v27   ;;  %v4356_v52 = vld [vmem:[%s7902_s3 + $0xa0] sm:$0xff]  ;;  %v6286_v27 = vld [vmem:[%s6364_s30 + $0x30] sm:$0xff]  }
 0x208   : > { %v2105_v9 = vpop.f32.mrb[144].mxu0  ;;  %v1734_v36 = vpop.f32.mrb[144].mxu1  ;;  %v3776_v62 = vrot.slane %v6286_v27, 1  ;;  %v6135_v27 = vld [vmem:[%s6364_s30 + $0xdc] sm:$0xff]  }
 0x209   : > { %v7372_v17 = vadd.f32 %v2105_v9, %v1801_v1  ;;  %v5680_v18 = vpop.f32.mrb[145].mxu0  ;;  %v1803_v63 = vadd.f32 %v1734_v36, %v6950_v8  ;;  %v5614_v60 = vpop.f32.mrb[145].mxu1  ;;  %v4353_v1 = vld [vmem:[%s7902_s3 + $0x88] sm:$0xff]  ;;  %v4354_v8 = vld [vmem:[%s7902_s3 + $0x90] sm:$0xff] }
 0x20a   : > { %v2108_v59 = vpop.f32.mrb[146].mxu0  ;;  %v1737_v49 = vpop.f32.mrb[146].mxu1  ;;  %v6134_v9 = vld [vmem:[%s6364_s30 + $0xd4] sm:$0xff]  }
 0x20b   : > { %v7376_v40 = vadd.f32 %v2108_v59, %v1802_v24  ;;  %v5681_v57 = vpop.f32.mrb[147].mxu0  ;;  %v1804_v11 = vadd.f32 %v1737_v49, %v6955_v28  ;;  %v5615_v24 = vpop.f32.mrb[147].mxu1  ;;  %4457 = vperm.xlu1 %6003, %v4353_v1   ;;  %4462 = vperm.xlu0 %6002, %v4354_v8   ;;  %v3409_v28 = vor.u32 %v3407_v41, %v3405_v37  ;;  %v3415_v8 = vshrl.u32 %v7370_v54, 16  ;;  %v4359_v54 = vld [vmem:[%s7902_s3 + $0xb8] sm:$0xff] }
 0x20c   : > { %v3419_v24 = vshll.u32 %v6134_v9, 16 }
 0x20d   : > { %5931 = vmatmul.mubr.msk.bf16.gmra.mrb[252].mxu0 %vm380_vm2, %v3775_v3  ;;  %5865 = vmatmul.mubr.msk.bf16.gmra.mrb[252].mxu1 %vm380_vm2, %v3406_v32  ;;  %v3777_v3 = vsel %vm3766_vm4, %v3774_v4, %v3776_v62  ;;  %v3414_v37 = vsel %vm1038_vm3, %v3409_v28, %v3413_v19 }
 0x20e   : > { %5934 = vmatprep.mubr.msk.bf16.mxu0 %vm6297_vm1, %v7909_v43  ;;  %5868 = vmatprep.mubr.msk.bf16.mxu1 %vm6297_vm1, %v7909_v43 }
 0x20f   : > { %4467 = vperm.xlu1 %6003, %v4355_v13   ;;  %4472 = vperm.xlu0 %6002, %v4356_v52   ;;  %v3421_v52 = vrot.slane %v3419_v24, 1  ;;  %v3423_v24 = vshrl.u32 %v6134_v9, 16  ;;  %v4363_v9 = vld [vmem:[%s7902_s3 + $0xd8] sm:$0xff] }
 0x210   : > { %v2113_v36 = vpop.f32.mrb[148].mxu0  ;;  %v1742_v18 = vpop.f32.mrb[148].mxu1 }
 0x211   : > { %v7402_v60 = vadd.f32 %v2113_v36, %v1803_v63  ;;  %v5684_v59 = vpop.f32.mrb[149].mxu0  ;;  %v1805_v49 = vadd.f32 %v1742_v18, %v6969_v12  ;;  %v5618_v57 = vpop.f32.mrb[149].mxu1  ;;  %v4357_v63 = vld [vmem:[%s7902_s3 + $0xa8] sm:$0xff]  ;;  %v4358_v12 = vld [vmem:[%s7902_s3 + $0xb0] sm:$0xff] }
 0x212   : > { %v2116_v32 = vpop.f32.mrb[150].mxu0  ;;  %v1745_v41 = vpop.f32.mrb[150].mxu1 }
 0x213   : > { %v7407_v45 = vadd.f32 %v2116_v32, %v1804_v11  ;;  %v5685_v1 = vpop.f32.mrb[151].mxu0  ;;  %v1806_v4 = vadd.f32 %v1745_v41, %v6975_v50  ;;  %v5619_v13 = vpop.f32.mrb[151].mxu1  ;;  %4477 = vperm.xlu1 %6003, %v4357_v63   ;;  %4482 = vperm.xlu0 %6002, %v4358_v12   ;;  %v4360_v11 = vld [vmem:[%s7902_s3 + $0xc0] sm:$0xff]  ;;  %v3417_v50 = vor.u32 %v3415_v8, %v3413_v19  ;;  %v3427_v12 = vshll.u32 %v6135_v27, 16 }
 0x215   : > { %5935 = vmatmul.mubr.msk.bf16.gmra.mrb[0].mxu0 %vm380_vm2, %v3777_v3  ;;  %5869 = vmatmul.mubr.msk.bf16.gmra.mrb[0].mxu1 %vm380_vm2, %v3414_v37  ;;  %v7915_v37 = vrot.slane %v6945_v15, 1  ;;  %v3422_v8 = vsel %vm1038_vm3, %v3417_v50, %v3421_v52  ;;  %v3429_v13 = vrot.slane %v3427_v12, 1 }
 0x216   : > { %5938 = vmatprep.mubr.msk.bf16.mxu0 %vm6297_vm1, %v7909_v43  ;;  %5872 = vmatprep.mubr.msk.bf16.mxu1 %vm6297_vm1, %v7909_v43 }
 0x217   : > { %4487 = vperm.xlu1 %6003, %v4359_v54   ;;  %4492 = vperm.xlu0 %6002, %v4360_v11   ;;  %v3779_v41 = vsel %vm3766_vm4, %v3776_v62, %v7915_v37  ;;  %v6136_v54 = vld [vmem:[%s6364_s30 + $0xe4] sm:$0xff]  }
 0x218   : > { %v2121_v28 = vpop.f32.mrb[152].mxu0  ;;  %v1750_v36 = vpop.f32.mrb[152].mxu1 }
 0x219   : > { %v7430_v18 = vadd.f32 %v2121_v28, %v1805_v49  ;;  %v5688_v59 = vpop.f32.mrb[153].mxu0  ;;  %v1807_v3 = vadd.f32 %v1750_v36, %v6989_v21  ;;  %v5622_v57 = vpop.f32.mrb[153].mxu1  ;;  %v4361_v49 = vld [vmem:[%s7902_s3 + $0xc8] sm:$0xff]  ;;  %v4362_v21 = vld [vmem:[%s7902_s3 + $0xd0] sm:$0xff] }
 0x21a   : > { %v2124_v32 = vpop.f32.mrb[154].mxu0  ;;  %v1753_v1 = vpop.f32.mrb[154].mxu1 }
 0x21b   : > { %v7436_v63 = vadd.f32 %v2124_v32, %v1806_v4  ;;  %v5689_v19 = vpop.f32.mrb[155].mxu0  ;;  %v1808_v15 = vadd.f32 %v1753_v1, %v6995_v56  ;;  %v5623_v62 = vpop.f32.mrb[155].mxu1  ;;  %4497 = vperm.xlu1 %6003, %v4361_v49   ;;  %4502 = vperm.xlu0 %6002, %v4362_v21   ;;  %v4364_v4 = vld [vmem:[%s7902_s3 + $0xe0] sm:$0xff]  ;;  %v3425_v56 = vor.u32 %v3423_v24, %v3421_v52  ;;  %v3431_v52 = vshrl.u32 %v6135_v27, 16  ;;  %v4365_v24 = vld [vmem:[%s7902_s3 + $0xe8] sm:$0xff]  ;;  %v4367_v27 = vld [vmem:[%s7902_s3 + $0xf8] sm:$0xff] }
 0x21c   : > { %v4368_v49 = vld [vmem:[%s7902_s3 + $0x100] sm:$0xff] }
 0x21d   : > { %5939 = vmatmul.mubr.msk.bf16.gmra.mrb[4].mxu0 %vm380_vm2, %v3779_v41  ;;  %5873 = vmatmul.mubr.msk.bf16.gmra.mrb[4].mxu1 %vm380_vm2, %v3422_v8  ;;  %v3430_v19 = vsel %vm1038_vm3, %v3425_v56, %v3429_v13  ;;  %v3435_v8 = vshll.u32 %v6136_v54, 16 }
 0x21e   : > { %5942 = vmatprep.mubr.msk.bf16.mxu0 %vm6297_vm1, %v7909_v43  ;;  %5876 = vmatprep.mubr.msk.bf16.mxu1 %vm6297_vm1, %v7909_v43 }
 0x21f   : > { %4507 = vperm.xlu1 %6003, %v4363_v9   ;;  %4512 = vperm.xlu0 %6002, %v4364_v4   ;;  %v3437_v21 = vrot.slane %v3435_v8, 1  ;;  %v6138_v8 = vld [vmem:[%s6364_s30 + $0xf4] sm:$0xff]  }
 0x220   : > { %v2129_v11 = vpop.f32.mrb[156].mxu0  ;;  %v1758_v50 = vpop.f32.mrb[156].mxu1 }
 0x221   : > { %v7459_v28 = vadd.f32 %v2129_v11, %v1807_v3  ;;  %v5692_v36 = vpop.f32.mrb[157].mxu0  ;;  %v1809_v59 = vadd.f32 %v1758_v50, %v7011_v16  ;;  %v5626_v57 = vpop.f32.mrb[157].mxu1  ;;  %v4366_v3 = vld [vmem:[%s7902_s3 + $0xf0] sm:$0xff] }
 0x222   : > { %v2132_v32 = vpop.f32.mrb[158].mxu0  ;;  %v1761_v37 = vpop.f32.mrb[158].mxu1 }
 0x223   : > { %v7462_v41 = vadd.f32 %v2132_v32, %v1808_v15  ;;  %v5693_v1 = vpop.f32.mrb[159].mxu0  ;;  %v1810_v16 = vadd.f32 %v1761_v37, %v7017_v35  ;;  %v5627_v12 = vpop.f32.mrb[159].mxu1  ;;  %4517 = vperm.xlu1 %6003, %v4365_v24   ;;  %4522 = vperm.xlu0 %6002, %v4366_v3   ;;  %v3433_v35 = vor.u32 %v3431_v52, %v3429_v13  ;;  %v6137_v15 = vld [vmem:[%s6364_s30 + $0xec] sm:$0xff]   ;;  %v3439_v37 = vshrl.u32 %v6136_v54, 16 }
 0x224   : > { %v3443_v1 = vshll.u32 %v6137_v15, 16 }
 0x225   : > { %5943 = vmatmul.mubr.msk.bf16.gmra.mrb[8].mxu0 %vm380_vm2, %v7025_v29  ;;  %5877 = vmatmul.mubr.msk.bf16.gmra.mrb[8].mxu1 %vm380_vm2, %v3430_v19  ;;  %v3438_v13 = vsel %vm1038_vm3, %v3433_v35, %v3437_v21  ;;  %v4369_v19 = vld [vmem:[%s7902_s3 + $0x108] sm:$0xff] }
 0x226   : > { %5946 = vmatprep.mubr.msk.bf16.mxu0 %vm6297_vm1, %v7909_v43  ;;  %5880 = vmatprep.mubr.msk.bf16.mxu1 %vm6297_vm1, %v7909_v43  ;;  %v3445_v54 = vrot.slane %v3443_v1, 1 }
 0x227   : > { %4527 = vperm.xlu1 %6003, %v4367_v27   ;;  %4532 = vperm.xlu0 %6002, %v4368_v49  }
 0x228   : > { %v2137_v29 = vpop.f32.mrb[160].mxu0  ;;  %v1766_v62 = vpop.f32.mrb[160].mxu1 }
 0x229   : > { %v7486_v9 = vadd.f32 %v2137_v29, %v1809_v59  ;;  %v5696_v4 = vpop.f32.mrb[161].mxu0  ;;  %v1811_v56 = vadd.f32 %v1766_v62, %v7037_v6  ;;  %v5630_v11 = vpop.f32.mrb[161].mxu1  ;;  %v3441_v6 = vor.u32 %v3439_v37, %v3437_v21  ;;  %v3451_v21 = vshll.u32 %v6138_v8, 16 }
 0x22a   : > { %v2140_v50 = vpop.f32.mrb[162].mxu0  ;;  %v1769_v36 = vpop.f32.mrb[162].mxu1  ;;  %v3447_v4 = vshrl.u32 %v6137_v15, 16 }
 0x22b   : > { %v7489_v57 = vadd.f32 %v2140_v50, %v1810_v16  ;;  %v5697_v32 = vpop.f32.mrb[163].mxu0  ;;  %v1812_v59 = vadd.f32 %v1769_v36, %v7043_v46  ;;  %v5631_v52 = vpop.f32.mrb[163].mxu1  ;;  %4537 = vperm.xlu1 %6003, %v4369_v19   ;;  %v3446_v62 = vsel %vm1038_vm3, %v3441_v6, %v3445_v54  ;;  %v6139_v36 = vld [vmem:[%s6364_s30 + $0xfc] sm:$0xff]  }
 0x22d   : > { %5947 = vmatmul.mubr.msk.bf16.gmra.mrb[12].mxu0 %vm380_vm2, %v7049_v20  ;;  %5881 = vmatmul.mubr.msk.bf16.gmra.mrb[12].mxu1 %vm380_vm2, %v3438_v13 }
 0x22e   : > { %5950 = vmatprep.mubr.msk.bf16.mxu0 %vm6297_vm1, %v7909_v43  ;;  %5884 = vmatprep.mubr.msk.bf16.mxu1 %vm6297_vm1, %v7909_v43 }
 0x230   : > { %v2145_v24 = vpop.f32.mrb[164].mxu0  ;;  %v1774_v3 = vpop.f32.mrb[164].mxu1 }
 0x231   : > { %v7504_v16 = vadd.f32 %v2145_v24, %v1811_v56  ;;  %v5700_v46 = vpop.f32.mrb[165].mxu0  ;;  %v1813_v12 = vadd.f32 %v1774_v3, %v7061_v44  ;;  %v5634_v27 = vpop.f32.mrb[165].mxu1  ;;  %v3449_v44 = vor.u32 %v3447_v4, %v3445_v54  ;;  %v3453_v56 = vrot.slane %v3451_v21, 1 }
 0x232   : > { %v2148_v20 = vpop.f32.mrb[166].mxu0  ;;  %v1777_v49 = vpop.f32.mrb[166].mxu1  ;;  %v3455_v24 = vshrl.u32 %v6138_v8, 16  ;;  %v3459_v54 = vshll.u32 %v6139_v36, 16  ;;  %v6140_v27 = vld [vmem:[%s6364_s30 + $0x104] sm:$0xff]  }
 0x233   : > { %v7507_v35 = vadd.f32 %v2148_v20, %v1812_v59  ;;  %v5701_v29 = vpop.f32.mrb[167].mxu0  ;;  %v1814_v11 = vadd.f32 %v1777_v49, %v7067_v38  ;;  %v5635_v50 = vpop.f32.mrb[167].mxu1  ;;  %v3454_v6 = vsel %vm1038_vm3, %v3449_v44, %v3453_v56  ;;  %v3463_v44 = vshrl.u32 %v6139_v36, 16 }
 0x235   : > { %5951 = vmatmul.mubr.msk.bf16.gmra.mrb[16].mxu0 %vm380_vm2, %v7073_v30  ;;  %5885 = vmatmul.mubr.msk.bf16.gmra.mrb[16].mxu1 %vm380_vm2, %v3446_v62 }
 0x236   : > { %5954 = vmatprep.mubr.msk.bf16.mxu0 %vm6297_vm1, %v7909_v43  ;;  %5888 = vmatprep.mubr.msk.bf16.mxu1 %vm6297_vm1, %v7909_v43 }
 0x238   : > { %v2153_v32 = vpop.f32.mrb[168].mxu0  ;;  %v2547_v13 = vpop.f32.mrb[168].mxu1 }
 0x239   : > { %v7519_v15 = vadd.f32 %v2153_v32, %v1813_v12  ;;  %v5704_v38 = vpop.f32.mrb[169].mxu0  ;;  %v2682_v37 = vadd.f32 %v2547_v13, %v7085_v5  ;;  %v5710_v1 = vpop.f32.mrb[169].mxu1  ;;  %v3457_v5 = vor.u32 %v3455_v24, %v3453_v56  ;;  %v3461_v12 = vrot.slane %v3459_v54, 1 }
 0x23a   : > { %v2156_v30 = vpop.f32.mrb[170].mxu0  ;;  %v2550_v59 = vpop.f32.mrb[170].mxu1  ;;  %v3467_v56 = vshll.u32 %v6140_v27, 16 }
 0x23b   : > { %v7522_v19 = vadd.f32 %v2156_v30, %v1814_v11  ;;  %v5705_v52 = vpop.f32.mrb[171].mxu0  ;;  %v2683_v3 = vadd.f32 %v2550_v59, %v7091_v61  ;;  %v5711_v46 = vpop.f32.mrb[171].mxu1  ;;  %v3462_v50 = vsel %vm1038_vm3, %v3457_v5, %v3461_v12 }
 0x23c   : > { %v3469_v38 = vrot.slane %v3467_v56, 1  ;;  %v3471_v46 = vshrl.u32 %v6140_v27, 16 }
 0x23d   : > { %5955 = vmatmul.mubr.msk.bf16.gmra.mrb[20].mxu0 %vm380_vm2, %v7097_v47  ;;  %5889 = vmatmul.mubr.msk.bf16.gmra.mrb[20].mxu1 %vm380_vm2, %v3454_v6 }
 0x23e   : > { %5958 = vmatprep.mubr.msk.bf16.mxu0 %vm6297_vm1, %v7909_v43  ;;  %5892 = vmatprep.mubr.msk.bf16.mxu1 %vm6297_vm1, %v7909_v43 }
 0x240   : > { %v3069_v20 = vpop.f32.mrb[172].mxu0  ;;  %v2555_v8 = vpop.f32.mrb[172].mxu1 }
 0x241   : > { %v7534_v49 = vadd.f32 %v3069_v20, %v2682_v37  ;;  %v5780_v61 = vpop.f32.mrb[173].mxu0  ;;  %v2684_v29 = vadd.f32 %v2555_v8, %v7109_v2  ;;  %v5714_v62 = vpop.f32.mrb[173].mxu1  ;;  %v3465_v2 = vor.u32 %v3463_v44, %v3461_v12  ;;  %v6141_v37 = vld [vmem:[%s6364_s30 + $0x10c] sm:$0xff]   ;;  %v7916_v8 = vld [vmem:[#allocation3_spill] sm:$0xff] }
 0x242   : > { %v3072_v47 = vpop.f32.mrb[174].mxu0  ;;  %v2558_v4 = vpop.f32.mrb[174].mxu1  ;;  %v3475_v5 = vshll.u32 %v6141_v37, 16 }
 0x243   : > { %v7537_v21 = vadd.f32 %v3072_v47, %v2683_v3  ;;  %v5781_v11 = vpop.f32.mrb[175].mxu0  ;;  %v2685_v32 = vadd.f32 %v2558_v4, %v7115_v58  ;;  %v5715_v13 = vpop.f32.mrb[175].mxu1  ;;  %v3470_v3 = vsel %vm1038_vm3, %v3465_v2, %v3469_v38  ;;  %v7917_v4 = vld [vmem:[#allocation4_spill] sm:$0xff] }
 0x244   : > { %v3477_v61 = vrot.slane %v3475_v5, 1 }
 0x245   : > { %5959 = vmatmul.mubr.msk.bf16.gmra.mrb[24].mxu0 %vm380_vm2, %v7121_v23  ;;  %5893 = vmatmul.mubr.msk.bf16.gmra.mrb[24].mxu1 %vm380_vm2, %v3462_v50 }
 0x246   : > { %5962 = vmatprep.mubr.msk.bf16.mxu0 %vm6297_vm1, %v7909_v43  ;;  %5896 = vmatprep.mubr.msk.bf16.mxu1 %vm6297_vm1, %v7909_v43 }
 0x248   : > { %v3077_v1 = vpop.f32.mrb[176].mxu0  ;;  %v2563_v36 = vpop.f32.mrb[176].mxu1 }
 0x249   : > { %v7549_v30 = vadd.f32 %v3077_v1, %v2684_v29  ;;  %v5784_v58 = vpop.f32.mrb[177].mxu0  ;;  %v2686_v59 = vadd.f32 %v2563_v36, %v7133_v25  ;;  %v5718_v52 = vpop.f32.mrb[177].mxu1  ;;  %v3473_v25 = vor.u32 %v3471_v46, %v3469_v38  ;;  %v6142_v29 = vld [vmem:[%s6364_s30 + $0x114] sm:$0xff]   ;;  %v3479_v1 = vshrl.u32 %v6141_v37, 16 }
 0x24a   : > { %v3080_v23 = vpop.f32.mrb[178].mxu0  ;;  %v2566_v6 = vpop.f32.mrb[178].mxu1  ;;  %v3483_v38 = vshll.u32 %v6142_v29, 16  ;;  %v7918_v36 = vld [vmem:[#allocation5_spill] sm:$0xff] }
 0x24b   : > { %v7552_v24 = vadd.f32 %v3080_v23, %v2685_v32  ;;  %v5785_v54 = vpop.f32.mrb[179].mxu0  ;;  %v2687_v12 = vadd.f32 %v2566_v6, %v7139_v34  ;;  %v5719_v20 = vpop.f32.mrb[179].mxu1  ;;  %v3478_v2 = vsel %vm1038_vm3, %v3473_v25, %v3477_v61  ;;  %v7919_v23 = vld [vmem:[#allocation6_spill] sm:$0xff] }
 0x24c   : > { %v3485_v6 = vrot.slane %v3483_v38, 1  ;;  %v6143_v54 = vld [vmem:[%s6364_s30 + $0x11c] sm:$0xff]  }
 0x24d   : > { %5963 = vmatmul.mubr.msk.bf16.gmra.mrb[28].mxu0 %vm380_vm2, %v7916_v8  ;;  %5897 = vmatmul.mubr.msk.bf16.gmra.mrb[28].mxu1 %vm380_vm2, %v3470_v3 }
 0x24e   : > { %5966 = vmatprep.mubr.msk.bf16.mxu0 %vm6297_vm1, %v7909_v43  ;;  %5900 = vmatprep.mubr.msk.bf16.mxu1 %vm6297_vm1, %v7909_v43 }
 0x250   : > { %v3085_v62 = vpop.f32.mrb[180].mxu0  ;;  %v2571_v27 = vpop.f32.mrb[180].mxu1 }
 0x251   : > { %v7564_v47 = vadd.f32 %v3085_v62, %v2686_v59  ;;  %v5788_v34 = vpop.f32.mrb[181].mxu0  ;;  %v2688_v11 = vadd.f32 %v2571_v27, %v7917_v4  ;;  %v5722_v50 = vpop.f32.mrb[181].mxu1  ;;  %v3481_v59 = vor.u32 %v3479_v1, %v3477_v61  ;;  %v3487_v4 = vshrl.u32 %v6142_v29, 16 }
 0x252   : > { %v3088_v44 = vpop.f32.mrb[182].mxu0  ;;  %v2574_v56 = vpop.f32.mrb[182].mxu1  ;;  %v3491_v61 = vshll.u32 %v6143_v54, 16 }
 0x253   : > { %v7567_v32 = vadd.f32 %v3088_v44, %v2687_v12  ;;  %v5789_v13 = vpop.f32.mrb[183].mxu0  ;;  %v2689_v58 = vadd.f32 %v2574_v56, %v7918_v36  ;;  %v5723_v52 = vpop.f32.mrb[183].mxu1  ;;  %v3486_v34 = vsel %vm1038_vm3, %v3481_v59, %v3485_v6  ;;  %v7920_v56 = vld [vmem:[#allocation7_spill] sm:$0xff] }
 0x254   : > { %v6144_v13 = vld [vmem:[%s6364_s30 + $0x124] ss:$0 sps:$4 sm:$0x11]  }
 0x255   : > { %5967 = vmatmul.mubr.msk.bf16.gmra.mrb[32].mxu0 %vm380_vm2, %v7919_v23  ;;  %5901 = vmatmul.mubr.msk.bf16.gmra.mrb[32].mxu1 %vm380_vm2, %v3478_v2 }
 0x256   : > { %5970 = vmatprep.mubr.msk.bf16.mxu0 %vm6297_vm1, %v7909_v43  ;;  %5904 = vmatprep.mubr.msk.bf16.mxu1 %vm6297_vm1, %v7909_v43 }
 0x258   : > { %v3093_v3 = vpop.f32.mrb[184].mxu0  ;;  %v2579_v37 = vpop.f32.mrb[184].mxu1 }
 0x259   : > { %v7579_v46 = vadd.f32 %v3093_v3, %v2688_v11  ;;  %v5792_v5 = vpop.f32.mrb[185].mxu0  ;;  %v2690_v12 = vadd.f32 %v2579_v37, %v7181_v7  ;;  %v5726_v20 = vpop.f32.mrb[185].mxu1  ;;  %v3489_v7 = vor.u32 %v3487_v4, %v3485_v6  ;;  %v3493_v11 = vrot.slane %v3491_v61, 1 }
 0x25a   : > { %v3096_v8 = vpop.f32.mrb[186].mxu0  ;;  %v2582_v25 = vpop.f32.mrb[186].mxu1  ;;  %v3495_v37 = vshrl.u32 %v6143_v54, 16  ;;  %v3499_v5 = vshll.u32 %v6144_v13, 16 }
 0x25b   : > { %v7582_v62 = vadd.f32 %v3096_v8, %v2689_v58  ;;  %v5793_v27 = vpop.f32.mrb[187].mxu0  ;;  %v2691_v50 = vadd.f32 %v2582_v25, %v7187_v53  ;;  %v5727_v44 = vpop.f32.mrb[187].mxu1  ;;  %v3494_v3 = vsel %vm1038_vm3, %v3489_v7, %v3493_v11  ;;  %v7921_v8 = vld [vmem:[#allocation8_spill] sm:$0xff] }
 0x25d   : > { %5971 = vmatmul.mubr.msk.bf16.gmra.mrb[36].mxu0 %vm380_vm2, %v7920_v56  ;;  %5905 = vmatmul.mubr.msk.bf16.gmra.mrb[36].mxu1 %vm380_vm2, %v3486_v34 }
 0x25e   : > { %5974 = vmatprep.mubr.msk.bf16.mxu0 %vm6297_vm1, %v7909_v43  ;;  %5908 = vmatprep.mubr.msk.bf16.mxu1 %vm6297_vm1, %v7909_v43 }
 0x260   : > { %v3101_v2 = vpop.f32.mrb[188].mxu0  ;;  %v2587_v29 = vpop.f32.mrb[188].mxu1 }
 0x261   : > { %v7594_v1 = vadd.f32 %v3101_v2, %v2690_v12  ;;  %v5796_v53 = vpop.f32.mrb[189].mxu0  ;;  %v2692_v38 = vadd.f32 %v2587_v29, %v7208_v51  ;;  %v5730_v36 = vpop.f32.mrb[189].mxu1  ;;  %v3497_v51 = vor.u32 %v3495_v37, %v3493_v11  ;;  %v3501_v12 = vrot.slane %v3499_v5, 1 }
 0x262   : > { %v3104_v58 = vpop.f32.mrb[190].mxu0  ;;  %v2590_v52 = vpop.f32.mrb[190].mxu1 }
 0x263   : > { %v7597_v23 = vadd.f32 %v3104_v58, %v2691_v50  ;;  %v5797_v59 = vpop.f32.mrb[191].mxu0  ;;  %v2693_v6 = vadd.f32 %v2590_v52, %v7215_v33  ;;  %v5731_v20 = vpop.f32.mrb[191].mxu1  ;;  %v3502_v7 = vsel %vm1038_vm3, %v3497_v51, %v3501_v12 }
 0x265   : > { %5975 = vmatmul.mubr.msk.bf16.gmra.mrb[40].mxu0 %vm380_vm2, %v7921_v8  ;;  %5909 = vmatmul.mubr.msk.bf16.gmra.mrb[40].mxu1 %vm380_vm2, %v3494_v3 }
 0x266   : > { %5978 = vmatprep.mubr.msk.bf16.mxu0 %vm6297_vm1, %v7909_v43  ;;  %5912 = vmatprep.mubr.msk.bf16.mxu1 %vm6297_vm1, %v7909_v43 }
 0x268   : > { %v3109_v25 = vpop.f32.mrb[192].mxu0  ;;  %v2595_v27 = vpop.f32.mrb[192].mxu1 }
 0x269   : > { %v7608_v54 = vadd.f32 %v3109_v25, %v2692_v38  ;;  %v5800_v34 = vpop.f32.mrb[193].mxu0  ;;  %v2694_v33 = vadd.f32 %v2595_v27, %v7236_v0  ;;  %v5734_v4 = vpop.f32.mrb[193].mxu1 }
 0x26a   : > { %v3112_v61 = vpop.f32.mrb[194].mxu0  ;;  %v2598_v50 = vpop.f32.mrb[194].mxu1 }
 0x26b   : > { %v7611_v44 = vadd.f32 %v3112_v61, %v2693_v6  ;;  %v5801_v56 = vpop.f32.mrb[195].mxu0  ;;  %v2695_v13 = vadd.f32 %v2598_v50, %v7241_v31  ;;  %v5735_v2 = vpop.f32.mrb[195].mxu1 }
 0x26d   : > { %5979 = vmatmul.mubr.msk.bf16.gmra.mrb[44].mxu0 %vm380_vm2, %v7255_v48  ;;  %5913 = vmatmul.mubr.msk.bf16.gmra.mrb[44].mxu1 %vm380_vm2, %v3502_v7 }
 0x26e   : > { %5982 = vmatprep.mubr.msk.bf16.mxu0 %vm6297_vm1, %v7909_v43 }
 0x270   : > { %v3117_v0 = vpop.f32.mrb[196].mxu0  ;;  %v2603_v11 = vpop.f32.mrb[196].mxu1 }
 0x271   : > { %v7620_v29 = vadd.f32 %v3117_v0, %v2694_v33  ;;  %v5804_v53 = vpop.f32.mrb[197].mxu0  ;;  %v2696_v38 = vadd.f32 %v2603_v11, %v7273_v10  ;;  %v5738_v36 = vpop.f32.mrb[197].mxu1 }
 0x272   : > { %v3120_v58 = vpop.f32.mrb[198].mxu0  ;;  %v2606_v52 = vpop.f32.mrb[198].mxu1 }
 0x273   : > { %v7623_v31 = vadd.f32 %v3120_v58, %v2695_v13  ;;  %v5805_v59 = vpop.f32.mrb[199].mxu0  ;;  %v2697_v48 = vadd.f32 %v2606_v52, %v7277_v14  ;;  %v5739_v3 = vpop.f32.mrb[199].mxu1 }
 0x275   : > { %5983 = vmatmul.mubr.msk.bf16.gmra.mrb[48].mxu0 %vm380_vm2, %v7290_v22 }
 0x278   : > { %v3125_v43 = vpop.f32.mrb[200].mxu0  ;;  %v2611_v37 = vpop.f32.mrb[200].mxu1 }
 0x279   : > { %v7628_v5 = vadd.f32 %v3125_v43, %v2696_v38  ;;  %v5808_v6 = vpop.f32.mrb[201].mxu0  ;;  %v2698_v20 = vadd.f32 %v2611_v37, %v7308_v26  ;;  %v5742_v10 = vpop.f32.mrb[201].mxu1 }
 0x27a   : > { %v3128_v8 = vpop.f32.mrb[202].mxu0  ;;  %v2614_v51 = vpop.f32.mrb[202].mxu1 }
 0x27b   : > { %v7631_v12 = vadd.f32 %v3128_v8, %v2697_v48  ;;  %v5809_v25 = vpop.f32.mrb[203].mxu0  ;;  %v2699_v27 = vadd.f32 %v2614_v51, %v7312_v42  ;;  %v5743_v14 = vpop.f32.mrb[203].mxu1 }
 0x280   : > { %v3133_v34 = vpop.f32.mrb[204].mxu0  ;;  %v2619_v33 = vpop.f32.mrb[204].mxu1 }
 0x281   : > { %v7634_v4 = vadd.f32 %v3133_v34, %v2698_v20  ;;  %v5812_v22 = vpop.f32.mrb[205].mxu0  ;;  %v2700_v61 = vadd.f32 %v2619_v33, %v7340_v55  ;;  %v5746_v50 = vpop.f32.mrb[205].mxu1 }
 0x282   : > { %v3136_v56 = vpop.f32.mrb[206].mxu0  ;;  %v2622_v7 = vpop.f32.mrb[206].mxu1 }
 0x283   : > { %v7637_v26 = vadd.f32 %v3136_v56, %v2699_v27  ;;  %v5813_v13 = vpop.f32.mrb[207].mxu0  ;;  %v2701_v2 = vadd.f32 %v2622_v7, %v7344_v39  ;;  %v5747_v0 = vpop.f32.mrb[207].mxu1 }
 0x288   : > { %v3141_v11 = vpop.f32.mrb[208].mxu0  ;;  %v2627_v53 = vpop.f32.mrb[208].mxu1 }
 0x289   : > { %v7640_v42 = vadd.f32 %v3141_v11, %v2700_v61  ;;  %v5816_v38 = vpop.f32.mrb[209].mxu0  ;;  %v2702_v36 = vadd.f32 %v2627_v53, %v7372_v17  ;;  %v5750_v58 = vpop.f32.mrb[209].mxu1 }
 0x28a   : > { %v3144_v52 = vpop.f32.mrb[210].mxu0  ;;  %v2630_v59 = vpop.f32.mrb[210].mxu1 }
 0x28b   : > { %v7643_v55 = vadd.f32 %v3144_v52, %v2701_v2  ;;  %v5817_v48 = vpop.f32.mrb[211].mxu0  ;;  %v2703_v3 = vadd.f32 %v2630_v59, %v7376_v40  ;;  %v5751_v43 = vpop.f32.mrb[211].mxu1 }
 0x290   : > { %v3149_v37 = vpop.f32.mrb[212].mxu0  ;;  %v2635_v6 = vpop.f32.mrb[212].mxu1 }
 0x291   : > { %v7646_v39 = vadd.f32 %v3149_v37, %v2702_v36  ;;  %v5820_v20 = vpop.f32.mrb[213].mxu0  ;;  %v2704_v10 = vadd.f32 %v2635_v6, %v7402_v60  ;;  %v5754_v8 = vpop.f32.mrb[213].mxu1 }
 0x292   : > { %v3152_v51 = vpop.f32.mrb[214].mxu0  ;;  %v2638_v25 = vpop.f32.mrb[214].mxu1 }
 0x293   : > { %v7649_v17 = vadd.f32 %v3152_v51, %v2703_v3  ;;  %v5821_v27 = vpop.f32.mrb[215].mxu0  ;;  %v2705_v14 = vadd.f32 %v2638_v25, %v7407_v45  ;;  %v5755_v34 = vpop.f32.mrb[215].mxu1 }
 0x298   : > { %v3157_v33 = vpop.f32.mrb[216].mxu0  ;;  %v2643_v22 = vpop.f32.mrb[216].mxu1 }
 0x299   : > { %v7652_v40 = vadd.f32 %v3157_v33, %v2704_v10  ;;  %v5824_v61 = vpop.f32.mrb[217].mxu0  ;;  %v2706_v50 = vadd.f32 %v2643_v22, %v7430_v18  ;;  %v5758_v56 = vpop.f32.mrb[217].mxu1 }
 0x29a   : > { %v3160_v7 = vpop.f32.mrb[218].mxu0  ;;  %v2646_v13 = vpop.f32.mrb[218].mxu1 }
 0x29b   : > { %v7655_v60 = vadd.f32 %v3160_v7, %v2705_v14  ;;  %v5825_v2 = vpop.f32.mrb[219].mxu0  ;;  %v2707_v0 = vadd.f32 %v2646_v13, %v7436_v63  ;;  %v5759_v11 = vpop.f32.mrb[219].mxu1 }
 0x2a0   : > { %v3165_v53 = vpop.f32.mrb[220].mxu0  ;;  %v2651_v38 = vpop.f32.mrb[220].mxu1 }
 0x2a1   : > { %v7658_v45 = vadd.f32 %v3165_v53, %v2706_v50  ;;  %v5828_v36 = vpop.f32.mrb[221].mxu0  ;;  %v2708_v58 = vadd.f32 %v2651_v38, %v7459_v28  ;;  %v5762_v52 = vpop.f32.mrb[221].mxu1 }
 0x2a2   : > { %v3168_v59 = vpop.f32.mrb[222].mxu0  ;;  %v2654_v48 = vpop.f32.mrb[222].mxu1 }
 0x2a3   : > { %v7661_v18 = vadd.f32 %v3168_v59, %v2707_v0  ;;  %v5829_v3 = vpop.f32.mrb[223].mxu0  ;;  %v2709_v43 = vadd.f32 %v2654_v48, %v7462_v41  ;;  %v5763_v37 = vpop.f32.mrb[223].mxu1 }
 0x2a8   : > { %v3173_v6 = vpop.f32.mrb[224].mxu0  ;;  %v2659_v20 = vpop.f32.mrb[224].mxu1 }
 0x2a9   : > { %v7664_v63 = vadd.f32 %v3173_v6, %v2708_v58  ;;  %v5832_v10 = vpop.f32.mrb[225].mxu0  ;;  %v2710_v8 = vadd.f32 %v2659_v20, %v7486_v9  ;;  %v5766_v51 = vpop.f32.mrb[225].mxu1 }
 0x2aa   : > { %v3176_v25 = vpop.f32.mrb[226].mxu0  ;;  %v2662_v27 = vpop.f32.mrb[226].mxu1 }
 0x2ab   : > { %v7667_v28 = vadd.f32 %v3176_v25, %v2709_v43  ;;  %v5833_v14 = vpop.f32.mrb[227].mxu0  ;;  %v2711_v34 = vadd.f32 %v2662_v27, %v7489_v57  ;;  %v5767_v33 = vpop.f32.mrb[227].mxu1 }
 0x2b0   : > { %v3181_v22 = vpop.f32.mrb[228].mxu0  ;;  %v2667_v61 = vpop.f32.mrb[228].mxu1 }
 0x2b1   : > { %v7670_v41 = vadd.f32 %v3181_v22, %v2710_v8  ;;  %v5836_v50 = vpop.f32.mrb[229].mxu0  ;;  %v2712_v56 = vadd.f32 %v2667_v61, %v7504_v16  ;;  %v5770_v7 = vpop.f32.mrb[229].mxu1 }
 0x2b2   : > { %v3184_v13 = vpop.f32.mrb[230].mxu0  ;;  %v2670_v2 = vpop.f32.mrb[230].mxu1 }
 0x2b3   : > { %v7673_v9 = vadd.f32 %v3184_v13, %v2711_v34  ;;  %v5837_v0 = vpop.f32.mrb[231].mxu0  ;;  %v2713_v11 = vadd.f32 %v2670_v2, %v7507_v35  ;;  %v5771_v53 = vpop.f32.mrb[231].mxu1 }
 0x2b8   : > { %v3189_v38 = vpop.f32.mrb[232].mxu0  ;;  %v2675_v36 = vpop.f32.mrb[232].mxu1 }
 0x2b9   : > { %v7676_v57 = vadd.f32 %v3189_v38, %v2712_v56  ;;  %v5840_v58 = vpop.f32.mrb[233].mxu0  ;;  %v2714_v52 = vadd.f32 %v2675_v36, %v7519_v15  ;;  %v5774_v59 = vpop.f32.mrb[233].mxu1 }
 0x2ba   : > { %v3192_v48 = vpop.f32.mrb[234].mxu0  ;;  %v2678_v3 = vpop.f32.mrb[234].mxu1 }
 0x2bb   : > { %v7679_v16 = vadd.f32 %v3192_v48, %v2713_v11  ;;  %v5841_v43 = vpop.f32.mrb[235].mxu0  ;;  %v2715_v37 = vadd.f32 %v2678_v3, %v7522_v19  ;;  %v5775_v6 = vpop.f32.mrb[235].mxu1  ;;  %v7691_v19 = vld [vmem:[%s7901_s2] ss:$0 sm:$0xff] }
 0x2c0   : > { %v3197_v20 = vpop.f32.mrb[236].mxu0  ;;  %v3591_v35 = vpop.f32.mrb[236].mxu1 }
 0x2c1   : > { %v7682_v10 = vadd.f32 %v3197_v20, %v2714_v52  ;;  %v5844_v8 = vpop.f32.mrb[237].mxu0  ;;  %v3726_v51 = vadd.f32 %v3591_v35, %v7534_v49  ;;  %v5850_v25 = vpop.f32.mrb[237].mxu1 }
 0x2c2   : > { %v3200_v27 = vpop.f32.mrb[238].mxu0  ;;  %v3594_v15 = vpop.f32.mrb[238].mxu1 }
 0x2c3   : > { %v7685_v14 = vadd.f32 %v3200_v27, %v2715_v37  ;;  %v5845_v34 = vpop.f32.mrb[239].mxu0  ;;  %v3727_v33 = vadd.f32 %v3594_v15, %v7537_v21  ;;  %v5851_v22 = vpop.f32.mrb[239].mxu1 }
 0x2c8   : > { %v3890_v61 = vpop.f32.mrb[240].mxu0  ;;  %v3599_v50 = vpop.f32.mrb[240].mxu1 }
 0x2c9   : > { %v4025_v56 = vadd.f32 %v3890_v61, %v3726_v51  ;;  %v5920_v7 = vpop.f32.mrb[241].mxu0  ;;  %v3728_v49 = vadd.f32 %v3599_v50, %v7549_v30  ;;  %v5854_v13 = vpop.f32.mrb[241].mxu1 }
 0x2ca   : > { %v3893_v2 = vpop.f32.mrb[242].mxu0  ;;  %v3602_v11 = vpop.f32.mrb[242].mxu1 }
 0x2cb   : > { %v7695_v0 = vadd.f32 %v7691_v19, %v4025_v56  ;;  %v4026_v53 = vadd.f32 %v3893_v2, %v3727_v33  ;;  %v5921_v21 = vpop.f32.mrb[243].mxu0  ;;  %v3729_v38 = vadd.f32 %v3602_v11, %v7552_v24  ;;  %v5855_v36 = vpop.f32.mrb[243].mxu1 }
 0x2cd   : > { %v5158_v58 = vmul.f32 -1.442695, %v7695_v0  ;;  %v7700_v52 = vadd.f32 %v7691_v19, %v4026_v53 }
 0x2cf   : > { %6145 = vpow2.f32 %v5158_v58  ;;  %v5159_v59 = vmul.f32 -1.442695, %v7700_v52 }
 0x2d0   : > { %v3898_v30 = vpop.f32.mrb[244].mxu0  ;;  %v3607_v48 = vpop.f32.mrb[244].mxu1 }
 0x2d1   : > { %6147 = vpow2.f32 %v5159_v59  ;;  %v4027_v3 = vadd.f32 %v3898_v30, %v3728_v49  ;;  %v5924_v43 = vpop.f32.mrb[245].mxu0  ;;  %v3730_v37 = vadd.f32 %v3607_v48, %v7564_v47  ;;  %v5858_v6 = vpop.f32.mrb[245].mxu1 }
 0x2d2   : > { %v3901_v20 = vpop.f32.mrb[246].mxu0  ;;  %v3610_v35 = vpop.f32.mrb[246].mxu1 }
 0x2d3   : > { %v7705_v24 = vadd.f32 %v7691_v19, %v4027_v3  ;;  %v4028_v8 = vadd.f32 %v3901_v20, %v3729_v38  ;;  %v5925_v51 = vpop.f32.mrb[247].mxu0  ;;  %v3731_v25 = vadd.f32 %v3610_v35, %v7567_v32  ;;  %v5859_v27 = vpop.f32.mrb[247].mxu1 }
 0x2d4   : > { %v4373_v43 = vpop.permute.xlu0 %4372 }
 0x2d5   : > { %v5160_v15 = vmul.f32 -1.442695, %v7705_v24  ;;  %v7710_v34 = vadd.f32 %v7691_v19, %v4028_v8 }
 0x2d7   : > { %6149 = vpow2.f32 %v5160_v15  ;;  %v5161_v33 = vmul.f32 -1.442695, %v7710_v34 }
 0x2d8   : > { %v3906_v47 = vpop.f32.mrb[248].mxu0  ;;  %v3615_v61 = vpop.f32.mrb[248].mxu1 }
 0x2d9   : > { %v6146_v22 = vpop.eup %6145  ;;  %6151 = vpow2.f32 %v5161_v33  ;;  %v4029_v50 = vadd.f32 %v3906_v47, %v3730_v37  ;;  %v5928_v56 = vpop.f32.mrb[249].mxu0  ;;  %v3732_v49 = vadd.f32 %v3615_v61, %v7579_v46 }
 0x2da   : > { %v4200_v7 = vadd.f32 1.0, %v6146_v22  ;;  %v5862_v13 = vpop.f32.mrb[249].mxu1  ;;  %v3909_v32 = vpop.f32.mrb[250].mxu0 }
 0x2db   : > { %v6148_v2 = vpop.eup %6147  ;;  %v7715_v11 = vadd.f32 %v7691_v19, %v4029_v50  ;;  %v3618_v53 = vpop.f32.mrb[250].mxu1  ;;  %v4030_v21 = vadd.f32 %v3909_v32, %v3731_v25 }
 0x2dc   : > { %v5929_v38 = vpop.f32.mrb[251].mxu0  ;;  %6153 = vrcp.f32 %v4200_v7  ;;  %v4201_v36 = vadd.f32 1.0, %v6148_v2  ;;  %v3733_v58 = vadd.f32 %v3618_v53, %v7582_v62  ;;  %v5863_v59 = vpop.f32.mrb[251].mxu1 }
 0x2dd   : > { %v5162_v30 = vmul.f32 -1.442695, %v7715_v11  ;;  %v7720_v48 = vadd.f32 %v7691_v19, %v4030_v21  ;;  %v4383_v2 = vpop.permute.xlu1 %4382  ;;  %v4378_v38 = vpop.permute.xlu0 %4377 }
 0x2de   : > { %6155 = vrcp.f32 %v4201_v36 }
 0x2df   : > { %6157 = vpow2.f32 %v5162_v30  ;;  %v5163_v46 = vmul.f32 -1.442695, %v7720_v48 }
 0x2e0   : > { %v3914_v3 = vpop.f32.mrb[252].mxu0  ;;  %v3623_v6 = vpop.f32.mrb[252].mxu1 }
 0x2e1   : > { %v6150_v37 = vpop.eup %6149  ;;  %6159 = vpow2.f32 %v5163_v46  ;;  %v4031_v20 = vadd.f32 %v3914_v3, %v3732_v49  ;;  %v5932_v35 = vpop.f32.mrb[253].mxu0  ;;  %v3734_v62 = vadd.f32 %v3623_v6, %v7594_v1 }
 0x2e2   : > { %v4202_v8 = vadd.f32 1.0, %v6150_v37  ;;  %v5866_v51 = vpop.f32.mrb[253].mxu1  ;;  %v3917_v25 = vpop.f32.mrb[254].mxu0 }
 0x2e3   : > { %v6152_v27 = vpop.eup %6151  ;;  %v7725_v15 = vadd.f32 %v7691_v19, %v4031_v20  ;;  %v3626_v33 = vpop.f32.mrb[254].mxu1  ;;  %v4032_v47 = vadd.f32 %v3917_v25, %v3733_v58 }
 0x2e4   : > { %v5933_v22 = vpop.f32.mrb[255].mxu0  ;;  %6161 = vrcp.f32 %v4202_v8  ;;  %v4203_v61 = vadd.f32 1.0, %v6152_v27  ;;  %v3735_v50 = vadd.f32 %v3626_v33, %v7597_v23  ;;  %v5867_v56 = vpop.f32.mrb[255].mxu1 }
 0x2e5   : > { %v5164_v7 = vmul.f32 -1.442695, %v7725_v15  ;;  %v7730_v49 = vadd.f32 %v7691_v19, %v4032_v47 }
 0x2e6   : > { %v6154_v1 = vpop.eup %6153  ;;  %6163 = vrcp.f32 %v4203_v61 }
 0x2e7   : > { %6165 = vpow2.f32 %v5164_v7  ;;  %v5165_v13 = vmul.f32 -1.442695, %v7730_v49  ;;  %v4302_v32 = vmul.f32 %v6154_v1, %v7695_v0  ;;  %v4388_v7 = vpop.permute.xlu1 %4387 }
 0x2e8   : > { %v6156_v53 = vpop.eup %6155  ;;  %v3922_v21 = vpop.f32.mrb[0].mxu0 }
 0x2e9   : > { %v6158_v36 = vpop.eup %6157  ;;  %6167 = vpow2.f32 %v5165_v13  ;;  %v3631_v23 = vpop.f32.mrb[0].mxu1  ;;  %v4033_v58 = vadd.f32 %v3922_v21, %v3734_v62  ;;  %v4303_v30 = vmul.f32 %v6156_v53, %v7700_v52  ;;  %v4540_v35 = vmul.f32 %v4373_v43, %v4302_v32 }
 0x2ea   : > { %v5936_v59 = vpop.f32.mrb[1].mxu0  ;;  %v4204_v46 = vadd.f32 1.0, %v6158_v36  ;;  %v3736_v3 = vadd.f32 %v3631_v23, %v7608_v54  ;;  %v5870_v37 = vpop.f32.mrb[1].mxu1 }
 0x2eb   : > { %v3925_v6 = vpop.f32.mrb[2].mxu0  ;;  %v6160_v20 = vpop.eup %6159  ;;  %v7737_v0 = vadd.f32 %v7691_v19, %v4033_v58  ;;  %v4541_v8 = vmul.f32 %v4378_v38, %v4303_v30 }
 0x2ec   : > { %v3634_v51 = vpop.f32.mrb[2].mxu1  ;;  %v4034_v25 = vadd.f32 %v3925_v6, %v3735_v50  ;;  %v5937_v27 = vpop.f32.mrb[3].mxu0  ;;  %6169 = vrcp.f32 %v4204_v46  ;;  %v4205_v33 = vadd.f32 1.0, %v6160_v20 }
 0x2ed   : > { %v3737_v62 = vadd.f32 %v3634_v51, %v7611_v44  ;;  %v5871_v47 = vpop.f32.mrb[3].mxu1  ;;  %v5166_v52 = vmul.f32 -1.442695, %v7737_v0  ;;  %v4574_v22 = vadd.f32 %v4541_v8, %v4540_v35  ;;  %v4393_v27 = vpop.permute.xlu0 %4392 }
 0x2ee   : > { %v7742_v54 = vadd.f32 %v7691_v19, %v4034_v25  ;;  %v6162_v61 = vpop.eup %6161  ;;  %6171 = vrcp.f32 %v4205_v33 }
 0x2ef   : > { %6173 = vpow2.f32 %v5166_v52  ;;  %v4304_v43 = vmul.f32 %v6162_v61, %v7705_v24  ;;  %v4398_v52 = vpop.permute.xlu1 %4397 }
 0x2f0   : > { %v5167_v56 = vmul.f32 -1.442695, %v7742_v54  ;;  %v6164_v50 = vpop.eup %6163  ;;  %v3930_v1 = vpop.f32.mrb[4].mxu0 }
 0x2f1   : > { %v6166_v13 = vpop.eup %6165  ;;  %v4542_v32 = vmul.f32 %v4383_v2, %v4304_v43  ;;  %v4305_v44 = vmul.f32 %v6164_v50, %v7710_v34  ;;  %v3639_v53 = vpop.f32.mrb[4].mxu1  ;;  %v4035_v21 = vadd.f32 %v3930_v1, %v3736_v3 }
 0x2f2   : > { %6175 = vpow2.f32 %v5167_v56  ;;  %v5940_v38 = vpop.f32.mrb[5].mxu0  ;;  %v4206_v36 = vadd.f32 1.0, %v6166_v13  ;;  %v3738_v23 = vadd.f32 %v3639_v53, %v7620_v29  ;;  %v5874_v58 = vpop.f32.mrb[5].mxu1 }
 0x2f3   : > { %v3933_v59 = vpop.f32.mrb[6].mxu0  ;;  %v6168_v30 = vpop.eup %6167  ;;  %v4543_v24 = vmul.f32 %v4388_v7, %v4305_v44  ;;  %v4575_v46 = vadd.f32 %v4574_v22, %v4542_v32  ;;  %v7749_v37 = vadd.f32 %v7691_v19, %v4035_v21 }
 0x2f4   : > { %v3642_v6 = vpop.f32.mrb[6].mxu1  ;;  %v4036_v20 = vadd.f32 %v3933_v59, %v3737_v62  ;;  %v5941_v2 = vpop.f32.mrb[7].mxu0  ;;  %6177 = vrcp.f32 %v4206_v36  ;;  %v4207_v35 = vadd.f32 1.0, %v6168_v30 }
 0x2f5   : > { %v3739_v34 = vadd.f32 %v3642_v6, %v7623_v31  ;;  %v5875_v3 = vpop.f32.mrb[7].mxu1  ;;  %v4576_v8 = vadd.f32 %v4575_v46, %v4543_v24  ;;  %v5168_v51 = vmul.f32 -1.442695, %v7749_v37 }
 0x2f6   : > { %v7754_v29 = vadd.f32 %v7691_v19, %v4036_v20  ;;  %v6170_v25 = vpop.eup %6169  ;;  %6179 = vrcp.f32 %v4207_v35  ;;  %v4403_v20 = vpop.permute.xlu0 %4402 }
 0x2f7   : > { %v4306_v33 = vmul.f32 %v6170_v25, %v7715_v11  ;;  %6181 = vpow2.f32 %v5168_v51  ;;  %v4408_v3 = vpop.permute.xlu1 %4407 }
 0x2f8   : > { %v5169_v62 = vmul.f32 -1.442695, %v7754_v29  ;;  %v6172_v47 = vpop.eup %6171  ;;  %v3938_v22 = vpop.f32.mrb[8].mxu0 }
 0x2f9   : > { %v6174_v61 = vpop.eup %6173  ;;  %v4544_v31 = vmul.f32 %v4393_v27, %v4306_v33  ;;  %v4307_v43 = vmul.f32 %v6172_v47, %v7720_v48  ;;  %v3647_v56 = vpop.f32.mrb[8].mxu1  ;;  %v4037_v50 = vadd.f32 %v3938_v22, %v3738_v23 }
 0x2fa   : > { %6183 = vpow2.f32 %v5169_v62  ;;  %v5944_v7 = vpop.f32.mrb[9].mxu0  ;;  %v4208_v1 = vadd.f32 1.0, %v6174_v61  ;;  %v3740_v13 = vadd.f32 %v3647_v56, %v7628_v5  ;;  %v5878_v32 = vpop.f32.mrb[9].mxu1 }
 0x2fb   : > { %v3941_v44 = vpop.f32.mrb[10].mxu0  ;;  %v4577_v53 = vadd.f32 %v4576_v8, %v4544_v31  ;;  %v4545_v21 = vmul.f32 %v4398_v52, %v4307_v43  ;;  %v7761_v38 = vadd.f32 %v7691_v19, %v4037_v50  ;;  %v3650_v36 = vpop.f32.mrb[10].mxu1 }
 0x2fc   : > { %v6176_v11 = vpop.eup %6175  ;;  %v4038_v58 = vadd.f32 %v3941_v44, %v3739_v34  ;;  %v5945_v59 = vpop.f32.mrb[11].mxu0  ;;  %6185 = vrcp.f32 %v4208_v1  ;;  %v3741_v30 = vadd.f32 %v3650_v36, %v7631_v12 }
 0x2fd   : > { %v4209_v48 = vadd.f32 1.0, %v6176_v11  ;;  %v5879_v23 = vpop.f32.mrb[11].mxu1  ;;  %v4578_v24 = vadd.f32 %v4577_v53, %v4545_v21  ;;  %v5170_v46 = vmul.f32 -1.442695, %v7761_v38  ;;  %v4413_v21 = vpop.permute.xlu0 %4412 }
 0x2fe   : > { %v7766_v5 = vadd.f32 %v7691_v19, %v4038_v58  ;;  %v6178_v6 = vpop.eup %6177 }
 0x2ff   : > { %6187 = vrcp.f32 %v4209_v48  ;;  %v4308_v2 = vmul.f32 %v6178_v6, %v7725_v15  ;;  %v4418_v48 = vpop.permute.xlu1 %4417 }
 0x300   : > { %6189 = vpow2.f32 %v5170_v46  ;;  %v5171_v35 = vmul.f32 -1.442695, %v7766_v5  ;;  %v6180_v34 = vpop.eup %6179  ;;  %v3946_v8 = vpop.f32.mrb[12].mxu0 }
 0x301   : > { %v6182_v51 = vpop.eup %6181  ;;  %v4546_v12 = vmul.f32 %v4403_v20, %v4308_v2  ;;  %v4309_v25 = vmul.f32 %v6180_v34, %v7730_v49  ;;  %v3655_v27 = vpop.f32.mrb[12].mxu1  ;;  %v4039_v33 = vadd.f32 %v3946_v8, %v3740_v13 }
 0x302   : > { %6191 = vpow2.f32 %v5171_v35  ;;  %v5948_v62 = vpop.f32.mrb[13].mxu0  ;;  %v4210_v47 = vadd.f32 1.0, %v6182_v51  ;;  %v3742_v52 = vadd.f32 %v3655_v27, %v7634_v4  ;;  %v5882_v22 = vpop.f32.mrb[13].mxu1 }
 0x303   : > { %v3949_v61 = vpop.f32.mrb[14].mxu0  ;;  %v4579_v31 = vadd.f32 %v4578_v24, %v4546_v12  ;;  %v4547_v43 = vmul.f32 %v4408_v3, %v4309_v25  ;;  %v7773_v56 = vadd.f32 %v7691_v19, %v4039_v33  ;;  %v3658_v50 = vpop.f32.mrb[14].mxu1 }
 0x304   : > { %v6184_v15 = vpop.eup %6183  ;;  %v4040_v7 = vadd.f32 %v3949_v61, %v3741_v30  ;;  %v5949_v1 = vpop.f32.mrb[15].mxu0  ;;  %6193 = vrcp.f32 %v4210_v47  ;;  %v3743_v32 = vadd.f32 %v3658_v50, %v7637_v26 }
 0x305   : > { %v4211_v49 = vadd.f32 1.0, %v6184_v15  ;;  %v5883_v13 = vpop.f32.mrb[15].mxu1  ;;  %v4580_v44 = vadd.f32 %v4579_v31, %v4547_v43  ;;  %v5172_v11 = vmul.f32 -1.442695, %v7773_v56  ;;  %v4423_v15 = vpop.permute.xlu0 %4422 }
 0x306   : > { %v7778_v4 = vadd.f32 %v7691_v19, %v4040_v7  ;;  %v6186_v53 = vpop.eup %6185  ;;  %v4428_v7 = vpop.permute.xlu1 %4427 }
 0x307   : > { %6195 = vrcp.f32 %v4211_v49  ;;  %v4310_v36 = vmul.f32 %v6186_v53, %v7737_v0 }
 0x308   : > { %6197 = vpow2.f32 %v5172_v11  ;;  %v5173_v58 = vmul.f32 -1.442695, %v7778_v4  ;;  %v3954_v30 = vpop.f32.mrb[16].mxu0  ;;  %v3663_v46 = vpop.f32.mrb[16].mxu1 }
 0x309   : > { %v6188_v59 = vpop.eup %6187  ;;  %v4548_v26 = vmul.f32 %v4413_v21, %v4310_v36  ;;  %v4041_v6 = vadd.f32 %v3954_v30, %v3742_v52  ;;  %v5952_v20 = vpop.f32.mrb[17].mxu0  ;;  %v3744_v35 = vadd.f32 %v3663_v46, %v7640_v42 }
 0x30a   : > { %v6190_v23 = vpop.eup %6189  ;;  %v4311_v24 = vmul.f32 %v6188_v59, %v7742_v54  ;;  %6199 = vpow2.f32 %v5173_v58  ;;  %v5886_v34 = vpop.f32.mrb[17].mxu1 }
 0x30b   : > { %v4212_v2 = vadd.f32 1.0, %v6190_v23  ;;  %v3957_v3 = vpop.f32.mrb[18].mxu0  ;;  %v4581_v8 = vadd.f32 %v4580_v44, %v4548_v26  ;;  %v7785_v12 = vadd.f32 %v7691_v19, %v4041_v6  ;;  %v3666_v25 = vpop.f32.mrb[18].mxu1 }
 0x30c   : > { %v6192_v0 = vpop.eup %6191  ;;  %v4549_v51 = vmul.f32 %v4418_v48, %v4311_v24  ;;  %v4042_v27 = vadd.f32 %v3957_v3, %v3743_v32  ;;  %v5953_v33 = vpop.f32.mrb[19].mxu0  ;;  %v3745_v62 = vadd.f32 %v3666_v25, %v7643_v55 }
 0x30d   : > { %6201 = vrcp.f32 %v4212_v2  ;;  %v4213_v54 = vadd.f32 1.0, %v6192_v0  ;;  %v5887_v47 = vpop.f32.mrb[19].mxu1  ;;  %v5174_v22 = vmul.f32 -1.442695, %v7785_v12  ;;  %v4433_v34 = vpop.permute.xlu0 %4432 }
 0x30e   : > { %v4582_v52 = vadd.f32 %v4581_v8, %v4549_v51  ;;  %v7790_v42 = vadd.f32 %v7691_v19, %v4042_v27  ;;  %v6194_v61 = vpop.eup %6193  ;;  %v4438_v51 = vpop.permute.xlu1 %4437 }
 0x30f   : > { %6203 = vrcp.f32 %v4213_v54  ;;  %v4312_v31 = vmul.f32 %v6194_v61, %v7749_v37 }
 0x310   : > { %6205 = vpow2.f32 %v5174_v22  ;;  %v5175_v43 = vmul.f32 -1.442695, %v7790_v42  ;;  %v3962_v1 = vpop.f32.mrb[20].mxu0  ;;  %v3671_v13 = vpop.f32.mrb[20].mxu1 }
 0x311   : > { %v6196_v50 = vpop.eup %6195  ;;  %v4550_v55 = vmul.f32 %v4423_v15, %v4312_v31  ;;  %v4043_v44 = vadd.f32 %v3962_v1, %v3744_v35  ;;  %v5956_v11 = vpop.f32.mrb[21].mxu0  ;;  %v3746_v21 = vadd.f32 %v3671_v13, %v7646_v39 }
 0x312   : > { %v6198_v49 = vpop.eup %6197  ;;  %v4313_v32 = vmul.f32 %v6196_v50, %v7754_v29  ;;  %6207 = vpow2.f32 %v5175_v43  ;;  %v5890_v36 = vpop.f32.mrb[21].mxu1 }
 0x313   : > { %v4214_v53 = vadd.f32 1.0, %v6198_v49  ;;  %v3965_v58 = vpop.f32.mrb[22].mxu0  ;;  %v4583_v59 = vadd.f32 %v4582_v52, %v4550_v55  ;;  %v7797_v30 = vadd.f32 %v7691_v19, %v4043_v44  ;;  %v3674_v23 = vpop.f32.mrb[22].mxu1 }
 0x314   : > { %v6200_v37 = vpop.eup %6199  ;;  %v4551_v48 = vmul.f32 %v4428_v7, %v4313_v32  ;;  %v4044_v26 = vadd.f32 %v3965_v58, %v3745_v62  ;;  %v5957_v24 = vpop.f32.mrb[23].mxu0  ;;  %v3747_v46 = vadd.f32 %v3674_v23, %v7649_v17 }
 0x315   : > { %6209 = vrcp.f32 %v4214_v53  ;;  %v4215_v29 = vadd.f32 1.0, %v6200_v37  ;;  %v5891_v6 = vpop.f32.mrb[23].mxu1  ;;  %v5176_v2 = vmul.f32 -1.442695, %v7797_v30  ;;  %v4443_v53 = vpop.permute.xlu0 %4442 }
 0x316   : > { %v4584_v20 = vadd.f32 %v4583_v59, %v4551_v48  ;;  %v7802_v39 = vadd.f32 %v7691_v19, %v4044_v26  ;;  %v4448_v37 = vpop.permute.xlu1 %4447 }
 0x317   : > { %v6202_v35 = vpop.eup %6201  ;;  %6211 = vrcp.f32 %v4215_v29 }
 0x318   : > { %v4314_v3 = vmul.f32 %v6202_v35, %v7761_v38  ;;  %6213 = vpow2.f32 %v5176_v2  ;;  %v5177_v0 = vmul.f32 -1.442695, %v7802_v39  ;;  %v3970_v25 = vpop.f32.mrb[24].mxu0  ;;  %v3679_v54 = vpop.f32.mrb[24].mxu1 }
 0x319   : > { %v6204_v8 = vpop.eup %6203  ;;  %v4045_v62 = vadd.f32 %v3970_v25, %v3746_v21  ;;  %v5960_v47 = vpop.f32.mrb[25].mxu0  ;;  %v3748_v22 = vadd.f32 %v3679_v54, %v7652_v40 }
 0x31a   : > { %v6206_v27 = vpop.eup %6205  ;;  %v4552_v17 = vmul.f32 %v4433_v34, %v4314_v3  ;;  %v4315_v33 = vmul.f32 %v6204_v8, %v7766_v5  ;;  %6215 = vpow2.f32 %v5177_v0  ;;  %v5894_v61 = vpop.f32.mrb[25].mxu1 }
 0x31b   : > { %v4216_v52 = vadd.f32 1.0, %v6206_v27  ;;  %v3973_v15 = vpop.f32.mrb[26].mxu0  ;;  %v7809_v50 = vadd.f32 %v7691_v19, %v4045_v62  ;;  %v3682_v7 = vpop.f32.mrb[26].mxu1 }
 0x31c   : > { %v6208_v38 = vpop.eup %6207  ;;  %v4585_v31 = vadd.f32 %v4584_v20, %v4552_v17  ;;  %v4553_v43 = vmul.f32 %v4438_v51, %v4315_v33  ;;  %v4046_v1 = vadd.f32 %v3973_v15, %v3747_v46  ;;  %v5961_v49 = vpop.f32.mrb[27].mxu0  ;;  %v3749_v55 = vadd.f32 %v3682_v7, %v7655_v60 }
 0x31d   : > { %6217 = vrcp.f32 %v4216_v52  ;;  %v4217_v5 = vadd.f32 1.0, %v6208_v38  ;;  %v5895_v32 = vpop.f32.mrb[27].mxu1  ;;  %v5178_v44 = vmul.f32 -1.442695, %v7809_v50  ;;  %v4453_v62 = vpop.permute.xlu0 %4452 }
 0x31e   : > { %v4586_v13 = vadd.f32 %v4585_v31, %v4553_v43  ;;  %v7814_v40 = vadd.f32 %v7691_v19, %v4046_v1  ;;  %v4458_v61 = vpop.permute.xlu1 %4457 }
 0x31f   : > { %v6210_v11 = vpop.eup %6209  ;;  %6219 = vrcp.f32 %v4217_v5 }
 0x320   : > { %v4316_v21 = vmul.f32 %v6210_v11, %v7773_v56  ;;  %6221 = vpow2.f32 %v5178_v44  ;;  %v5179_v36 = vmul.f32 -1.442695, %v7814_v40  ;;  %v3978_v59 = vpop.f32.mrb[28].mxu0  ;;  %v3687_v26 = vpop.f32.mrb[28].mxu1 }
 0x321   : > { %v6212_v58 = vpop.eup %6211  ;;  %v4047_v24 = vadd.f32 %v3978_v59, %v3748_v22  ;;  %v5964_v29 = vpop.f32.mrb[29].mxu0  ;;  %v3750_v6 = vadd.f32 %v3687_v26, %v7658_v45 }
 0x322   : > { %v6214_v48 = vpop.eup %6213  ;;  %v4554_v60 = vmul.f32 %v4443_v53, %v4316_v21  ;;  %v4317_v23 = vmul.f32 %v6212_v58, %v7778_v4  ;;  %6223 = vpow2.f32 %v5179_v36  ;;  %v5898_v20 = vpop.f32.mrb[29].mxu1 }
 0x323   : > { %v4218_v46 = vadd.f32 1.0, %v6214_v48  ;;  %v3981_v2 = vpop.f32.mrb[30].mxu0  ;;  %v7821_v3 = vadd.f32 %v7691_v19, %v4047_v24  ;;  %v3690_v0 = vpop.f32.mrb[30].mxu1 }
 0x324   : > { %v6216_v56 = vpop.eup %6215  ;;  %v4587_v35 = vadd.f32 %v4586_v13, %v4554_v60  ;;  %v4555_v34 = vmul.f32 %v4448_v37, %v4317_v23  ;;  %v4048_v8 = vadd.f32 %v3981_v2, %v3749_v55  ;;  %v5965_v51 = vpop.f32.mrb[31].mxu0  ;;  %v3751_v25 = vadd.f32 %v3690_v0, %v7661_v18 }
 0x325   : > { %6225 = vrcp.f32 %v4218_v46  ;;  %v4219_v4 = vadd.f32 1.0, %v6216_v56  ;;  %v5899_v27 = vpop.f32.mrb[31].mxu1  ;;  %v5180_v33 = vmul.f32 -1.442695, %v7821_v3  ;;  %v4463_v23 = vpop.permute.xlu0 %4462 }
 0x326   : > { %v4588_v17 = vadd.f32 %v4587_v35, %v4555_v34  ;;  %v7826_v45 = vadd.f32 %v7691_v19, %v4048_v8  ;;  %v4468_v46 = vpop.permute.xlu1 %4467 }
 0x327   : > { %v6218_v54 = vpop.eup %6217  ;;  %6227 = vrcp.f32 %v4219_v4 }
 0x328   : > { %v4318_v47 = vmul.f32 %v6218_v54, %v7785_v12  ;;  %6229 = vpow2.f32 %v5180_v33  ;;  %v5181_v52 = vmul.f32 -1.442695, %v7826_v45  ;;  %v3986_v15 = vpop.f32.mrb[32].mxu0  ;;  %v3695_v43 = vpop.f32.mrb[32].mxu1 }
 0x329   : > { %v6220_v22 = vpop.eup %6219  ;;  %v4049_v7 = vadd.f32 %v3986_v15, %v3750_v6  ;;  %v5968_v1 = vpop.f32.mrb[33].mxu0  ;;  %v3752_v5 = vadd.f32 %v3695_v43, %v7664_v63 }
 0x32a   : > { %v6222_v38 = vpop.eup %6221  ;;  %v4556_v18 = vmul.f32 %v4453_v62, %v4318_v47  ;;  %v4319_v31 = vmul.f32 %v6220_v22, %v7790_v42  ;;  %6231 = vpow2.f32 %v5181_v52  ;;  %v5902_v55 = vpop.f32.mrb[33].mxu1 }
 0x32b   : > { %v4220_v49 = vadd.f32 1.0, %v6222_v38  ;;  %v3989_v32 = vpop.f32.mrb[34].mxu0  ;;  %v7833_v11 = vadd.f32 %v7691_v19, %v4049_v7  ;;  %v3698_v53 = vpop.f32.mrb[34].mxu1 }
 0x32c   : > { %v6224_v12 = vpop.eup %6223  ;;  %v4589_v13 = vadd.f32 %v4588_v17, %v4556_v18  ;;  %v4557_v44 = vmul.f32 %v4458_v61, %v4319_v31  ;;  %v4050_v21 = vadd.f32 %v3989_v32, %v3751_v25  ;;  %v5969_v36 = vpop.f32.mrb[35].mxu0  ;;  %v3753_v58 = vadd.f32 %v3698_v53, %v7667_v28 }
 0x32d   : > { %6233 = vrcp.f32 %v4220_v49  ;;  %v4221_v42 = vadd.f32 1.0, %v6224_v12  ;;  %v5903_v37 = vpop.f32.mrb[35].mxu1  ;;  %v5182_v48 = vmul.f32 -1.442695, %v7833_v11  ;;  %v4473_v38 = vpop.permute.xlu0 %4472 }
 0x32e   : > { %v4590_v59 = vadd.f32 %v4589_v13, %v4557_v44  ;;  %v7838_v63 = vadd.f32 %v7691_v19, %v4050_v21  ;;  %v4478_v7 = vpop.permute.xlu1 %4477 }
 0x32f   : > { %v6226_v60 = vpop.eup %6225  ;;  %6235 = vrcp.f32 %v4221_v42 }
 0x330   : > { %v4320_v26 = vmul.f32 %v6226_v60, %v7797_v30  ;;  %6237 = vpow2.f32 %v5182_v48  ;;  %v5183_v24 = vmul.f32 -1.442695, %v7838_v63  ;;  %v3994_v6 = vpop.f32.mrb[36].mxu0  ;;  %v3703_v56 = vpop.f32.mrb[36].mxu1 }
 0x331   : > { %v6228_v29 = vpop.eup %6227  ;;  %v4051_v35 = vadd.f32 %v3994_v6, %v3752_v5  ;;  %v5972_v34 = vpop.f32.mrb[37].mxu0  ;;  %v3754_v8 = vadd.f32 %v3703_v56, %v7670_v41 }
 0x332   : > { %v6230_v20 = vpop.eup %6229  ;;  %v4558_v28 = vmul.f32 %v4463_v23, %v4320_v26  ;;  %v4321_v2 = vmul.f32 %v6228_v29, %v7802_v39  ;;  %6239 = vpow2.f32 %v5183_v24  ;;  %v5906_v51 = vpop.f32.mrb[37].mxu1 }
 0x333   : > { %v4222_v0 = vadd.f32 1.0, %v6230_v20  ;;  %v3997_v4 = vpop.f32.mrb[38].mxu0  ;;  %v7845_v17 = vadd.f32 %v7691_v19, %v4051_v35  ;;  %v3706_v33 = vpop.f32.mrb[38].mxu1 }
 0x334   : > { %v6232_v30 = vpop.eup %6231  ;;  %v4591_v25 = vadd.f32 %v4590_v59, %v4558_v28  ;;  %v4559_v27 = vmul.f32 %v4468_v46, %v4321_v2  ;;  %v4052_v54 = vadd.f32 %v3997_v4, %v3753_v58  ;;  %v5973_v62 = vpop.f32.mrb[39].mxu0  ;;  %v3755_v47 = vadd.f32 %v3706_v33, %v7673_v9 }
 0x335   : > { %6241 = vrcp.f32 %v4222_v0  ;;  %v4223_v39 = vadd.f32 1.0, %v6232_v30  ;;  %v5907_v52 = vpop.f32.mrb[39].mxu1  ;;  %v5184_v61 = vmul.f32 -1.442695, %v7845_v17  ;;  %v4483_v46 = vpop.permute.xlu0 %4482 }
 0x336   : > { %v4592_v22 = vadd.f32 %v4591_v25, %v4559_v27  ;;  %v7850_v41 = vadd.f32 %v7691_v19, %v4052_v54  ;;  %v4488_v2 = vpop.permute.xlu1 %4487 }
 0x337   : > { %v6234_v15 = vpop.eup %6233  ;;  %6243 = vrcp.f32 %v4223_v39 }
 0x338   : > { %v4322_v18 = vmul.f32 %v6234_v15, %v7809_v50  ;;  %6245 = vpow2.f32 %v5184_v61  ;;  %v5185_v31 = vmul.f32 -1.442695, %v7850_v41  ;;  %v4002_v1 = vpop.f32.mrb[40].mxu0  ;;  %v3711_v55 = vpop.f32.mrb[40].mxu1 }
 0x339   : > { %v6236_v43 = vpop.eup %6235  ;;  %v4053_v32 = vadd.f32 %v4002_v1, %v3754_v8  ;;  %v5976_v12 = vpop.f32.mrb[41].mxu0  ;;  %v3756_v44 = vadd.f32 %v3711_v55, %v7676_v57 }
 0x33a   : > { %v6238_v49 = vpop.eup %6237  ;;  %v4560_v9 = vmul.f32 %v4473_v38, %v4322_v18  ;;  %v4323_v5 = vmul.f32 %v6236_v43, %v7814_v40  ;;  %6247 = vpow2.f32 %v5185_v31  ;;  %v5910_v53 = vpop.f32.mrb[41].mxu1 }
 0x33b   : > { %v4224_v13 = vadd.f32 1.0, %v6238_v49  ;;  %v4005_v21 = vpop.f32.mrb[42].mxu0  ;;  %v7857_v58 = vadd.f32 %v7691_v19, %v4053_v32  ;;  %v3714_v37 = vpop.f32.mrb[42].mxu1 }
 0x33c   : > { %v6240_v50 = vpop.eup %6239  ;;  %v4593_v36 = vadd.f32 %v4592_v22, %v4560_v9  ;;  %v4561_v42 = vmul.f32 %v4478_v7, %v4323_v5  ;;  %v4054_v59 = vadd.f32 %v4005_v21, %v3755_v47  ;;  %v5977_v48 = vpop.f32.mrb[43].mxu0  ;;  %v3757_v60 = vadd.f32 %v3714_v37, %v7679_v16 }
 0x33d   : > { %6249 = vrcp.f32 %v4224_v13  ;;  %v4225_v40 = vadd.f32 1.0, %v6240_v50  ;;  %v5911_v23 = vpop.f32.mrb[43].mxu1  ;;  %v5186_v24 = vmul.f32 -1.442695, %v7857_v58  ;;  %v4493_v1 = vpop.permute.xlu0 %4492 }
 0x33e   : > { %v4594_v26 = vadd.f32 %v4593_v36, %v4561_v42  ;;  %v7862_v57 = vadd.f32 %v7691_v19, %v4054_v59  ;;  %v4498_v12 = vpop.permute.xlu1 %4497 }
 0x33f   : > { %v6242_v29 = vpop.eup %6241  ;;  %6251 = vrcp.f32 %v4225_v40 }
 0x340   : > { %v4324_v6 = vmul.f32 %v6242_v29, %v7821_v3  ;;  %6253 = vpow2.f32 %v5186_v24  ;;  %v5187_v20 = vmul.f32 -1.442695, %v7862_v57  ;;  %v4010_v56 = vpop.f32.mrb[44].mxu0  ;;  %v3719_v0 = vpop.f32.mrb[44].mxu1 }
 0x341   : > { %v6244_v28 = vpop.eup %6243  ;;  %v4055_v8 = vadd.f32 %v4010_v56, %v3756_v44  ;;  %v5980_v51 = vpop.f32.mrb[45].mxu0  ;;  %v3758_v30 = vadd.f32 %v3719_v0, %v7682_v10 }
 0x342   : > { %v6246_v35 = vpop.eup %6245  ;;  %v4562_v16 = vmul.f32 %v4483_v46, %v4324_v6  ;;  %v4325_v34 = vmul.f32 %v6244_v28, %v7826_v45  ;;  %6255 = vpow2.f32 %v5187_v20  ;;  %v5914_v25 = vpop.f32.mrb[45].mxu1 }
 0x343   : > { %v4226_v4 = vadd.f32 1.0, %v6246_v35  ;;  %v4013_v27 = vpop.f32.mrb[46].mxu0  ;;  %v7869_v62 = vadd.f32 %v7691_v19, %v4055_v8  ;;  %v3722_v39 = vpop.f32.mrb[46].mxu1 }
 0x344   : > { %v6248_v3 = vpop.eup %6247  ;;  %v4595_v33 = vadd.f32 %v4594_v26, %v4562_v16  ;;  %v4563_v54 = vmul.f32 %v4488_v2, %v4325_v34  ;;  %v4056_v47 = vadd.f32 %v4013_v27, %v3757_v60  ;;  %v5981_v52 = vpop.f32.mrb[47].mxu0  ;;  %v3759_v22 = vadd.f32 %v3722_v39, %v7685_v14 }
 0x345   : > { %6257 = vrcp.f32 %v4226_v4  ;;  %v4227_v45 = vadd.f32 1.0, %v6248_v3  ;;  %v5915_v61 = vpop.f32.mrb[47].mxu1  ;;  %v5188_v38 = vmul.f32 -1.442695, %v7869_v62  ;;  %v4503_v29 = vpop.permute.xlu0 %4502 }
 0x346   : > { %v4596_v15 = vadd.f32 %v4595_v33, %v4563_v54  ;;  %v7874_v10 = vadd.f32 %v7691_v19, %v4056_v47  ;;  %v4508_v20 = vpop.permute.xlu1 %4507 }
 0x347   : > { %v6250_v18 = vpop.eup %6249  ;;  %6259 = vrcp.f32 %v4227_v45 }
 0x348   : > { %v4326_v31 = vmul.f32 %v6250_v18, %v7833_v11  ;;  %6261 = vpow2.f32 %v5188_v38  ;;  %v5189_v43 = vmul.f32 -1.442695, %v7874_v10  ;;  %v4018_v49 = vpop.f32.mrb[48].mxu0 }
 0x349   : > { %v6252_v7 = vpop.eup %6251  ;;  %v4057_v55 = vadd.f32 %v4018_v49, %v3758_v30  ;;  %v5984_v32 = vpop.f32.mrb[49].mxu0 }
 0x34a   : > { %v6254_v9 = vpop.eup %6253  ;;  %v4564_v5 = vmul.f32 %v4493_v1, %v4326_v31  ;;  %v4327_v14 = vmul.f32 %v6252_v7, %v7838_v63  ;;  %6263 = vpow2.f32 %v5189_v43  ;;  %v4021_v44 = vpop.f32.mrb[50].mxu0  ;;  %v6287_v63 = vld [vmem:[%s7901_s2] ss:$0 sm:$0xff] }
 0x34b   : > { %v4228_v13 = vadd.f32 1.0, %v6254_v9  ;;  %v4096_v11 = vadd.f32 %v7691_v19, %v4057_v55  ;;  %v4058_v36 = vadd.f32 %v4021_v44, %v3759_v22  ;;  %v5985_v42 = vpop.f32.mrb[51].mxu0  ;;  %v4513_v51 = vpop.permute.xlu0 %4512 }
 0x34c   : > { %v6256_v53 = vpop.eup %6255  ;;  %v4597_v21 = vadd.f32 %v4596_v15, %v4564_v5  ;;  %v4565_v50 = vmul.f32 %v4498_v12, %v4327_v14 }
 0x34d   : > { %6265 = vrcp.f32 %v4228_v13  ;;  %v4229_v37 = vadd.f32 1.0, %v6256_v53  ;;  %v5190_v48 = vmul.f32 -1.442695, %v4096_v11  ;;  %v4097_v40 = vadd.f32 %v6287_v63, %v4058_v36 }
 0x34e   : > { %v4598_v59 = vadd.f32 %v4597_v21, %v4565_v50 }
 0x34f   : > { %v6258_v60 = vpop.eup %6257  ;;  %6267 = vrcp.f32 %v4229_v37  ;;  %v5191_v26 = vmul.f32 -1.442695, %v4097_v40 }
 0x350   : > { %v4328_v23 = vmul.f32 %v6258_v60, %v7845_v17  ;;  %6269 = vpow2.f32 %v5190_v48 }
 0x351   : > { %v6260_v24 = vpop.eup %6259  ;;  %6271 = vpow2.f32 %v5191_v26 }
 0x352   : > { %v6262_v19 = vpop.eup %6261  ;;  %v4566_v46 = vmul.f32 %v4503_v29, %v4328_v23  ;;  %v4329_v6 = vmul.f32 %v6260_v24, %v7850_v41  ;;  %v4518_v41 = vpop.permute.xlu1 %4517 }
 0x353   : > { %v4230_v28 = vadd.f32 1.0, %v6262_v19 }
 0x354   : > { %v6264_v2 = vpop.eup %6263  ;;  %v4599_v56 = vadd.f32 %v4598_v59, %v4566_v46  ;;  %v4567_v35 = vmul.f32 %v4508_v20, %v4329_v6 }
 0x355   : > { %6273 = vrcp.f32 %v4230_v28  ;;  %v4231_v16 = vadd.f32 1.0, %v6264_v2 }
 0x356   : > { %v4600_v34 = vadd.f32 %v4599_v56, %v4567_v35  ;;  %v4528_v38 = vpop.permute.xlu1 %4527 }
 0x357   : > { %v6266_v0 = vpop.eup %6265  ;;  %6275 = vrcp.f32 %v4231_v16 }
 0x358   : > { %v4330_v17 = vmul.f32 %v6266_v0, %v7857_v58  ;;  %v4523_v58 = vpop.permute.xlu0 %4522 }
 0x359   : > { %v6268_v8 = vpop.eup %6267 }
 0x35a   : > { %v6270_v4 = vpop.eup %6269  ;;  %v4568_v30 = vmul.f32 %v4513_v51, %v4330_v17  ;;  %v4331_v25 = vmul.f32 %v6268_v8, %v7862_v57  ;;  %v4538_v14 = vpop.permute.xlu1 %4537 }
 0x35b   : > { %v4232_v27 = vadd.f32 1.0, %v6270_v4  ;;  %v6272_v3 = vpop.eup %6271 }
 0x35c   : > { %v4601_v33 = vadd.f32 %v4600_v34, %v4568_v30  ;;  %v4569_v54 = vmul.f32 %v4518_v41, %v4331_v25  ;;  %v4233_v39 = vadd.f32 1.0, %v6272_v3  ;;  %v4533_v49 = vpop.permute.xlu0 %4532 }
 0x35d   : > { %6277 = vrcp.f32 %v4232_v27 }
 0x35e   : > { %v4602_v47 = vadd.f32 %v4601_v33, %v4569_v54  ;;  %6279 = vrcp.f32 %v4233_v39 }
 0x35f   : > { %v6274_v52 = vpop.eup %6273 }
 0x360   : > { %v4332_v45 = vmul.f32 %v6274_v52, %v7869_v62 }
 0x361   : > { %v6276_v22 = vpop.eup %6275 }
 0x362   : > { %v4570_v61 = vmul.f32 %v4523_v58, %v4332_v45  ;;  %v4333_v15 = vmul.f32 %v6276_v22, %v7874_v10  ;;  %v4613_v10 = vld [vmem:[%s7901_s2 + $0x1] sm:$0x1] }
 0x364   : > { %v4603_v18 = vadd.f32 %v4602_v47, %v4570_v61  ;;  %v4571_v57 = vmul.f32 %v4528_v38, %v4333_v15 }
 0x366   : > { %v4604_v31 = vadd.f32 %v4603_v18, %v4571_v57 }
 0x367   : > { %v6278_v43 = vpop.eup %6277 }
 0x368   : > { %v4334_v7 = vmul.f32 %v6278_v43, %v4096_v11  ;;  %v6280_v1 = vpop.eup %6279 }
 0x369   : > { %v4335_v5 = vmul.f32 %v6280_v1, %v4097_v40 }
 0x36a   : > { %v4572_v9 = vmul.f32 %v4533_v49, %v4334_v7 }
 0x36b   : > { %v4573_v32 = vmul.f32 %v4538_v14, %v4335_v5 }
 0x36c   : > { %v4605_v55 = vadd.f32 %v4604_v31, %v4572_v9 }
 0x36e   : > { %v4606_v12 = vadd.f32 %v4605_v55, %v4573_v32 }
 0x370   : > { %v4607_v62 = vrot.slane %v4606_v12, 4 }
 0x372   : > { %v4608_v13 = vadd.f32 %v4607_v62, %v4606_v12 }
 0x374   : > { %v4609_v44 = vrot.slane %v4608_v13, 2 }
 0x376   : > { %v4610_v53 = vadd.f32 %v4609_v44, %v4608_v13 }
 0x378   : > { %v4611_v21 = vrot.slane %v4610_v53, 1 }
 0x37a   : > { %v4612_v50 = vadd.f32 %v4611_v21, %v4610_v53 }
 0x37c   : > { %v4614_v11 = vmul.f32 %v4613_v10, %v4612_v50 }
 0x37e   : > { %v4616_v36 = vsel %vm4615_vm5, %v4614_v11, 0.0 }
 0x37f   : > { %4617 = vadd.xlane.f32.xlu0 %v4616_v36 }
 0x40c   : > { %v4618_v42 = vpop.xlane.xlu0 %4617 }
 0x40d   : > { %v4619_v37 = vrot.slane %v4618_v42, 4 }
 0x40f   : > { %v4620_v59 = vadd.f32 %v4619_v37, %v4618_v42 }
 0x411   : > { %v4621_v48 = vrot.slane %v4620_v59, 2 }
 0x413   : > { %v4622_v63 = vadd.f32 %v4621_v48, %v4620_v59 }
 0x415   : > { %v4623_v40 = vrot.slane %v4622_v63, 1 }
 0x417   : > { %v4624_v60 = vadd.f32 %v4623_v40, %v4622_v63 }
 0x419   : > { %5989 = vpush %v4624_v60 }
 0x44a   : > { %s5990_s24 = spop %5989 }
 0x44b   : > { %s4627_s28 = sadd.f32 %s5990_s24, %s4626_s4 }
 0x44d   : > { %v4628_v23 = vstv %s4627_s28 }
 0x44e   : > { %4629 = vst [vmem:[%s221_s27] sm:$0x1] %v4628_v23 }
 0x44f PF: > { %s16_s20 = sadd.s32 1, %s6294_s20  }
 0x450   : > { %p13_p4 = scmp.ge.s32.totalorder %s16_s20, 4  }
 0x452   :  { %15 = sbr.rel (!%p13_p4) target bundleno = 2 (0x2), region = 81 }

</bundles_post_ra>
